<compile_context>
chip_gen: v7x
topology: tpu7x:2x2x1
jax: 0.10.0
libtpu: 0.0.40
codegen_flags: <defaults>
</compile_context>

<pallas_src>
import math

import jax
import jax.numpy as jnp
from jax.experimental import pallas as pl
from jax.experimental.pallas import tpu as pltpu

_LANE = 128
_SUBLANE = 8
_MAX_FOLD = 32                          # beyond this the kron weight gets silly; fall back
_XOUT_VMEM_BUDGET = 16 * 1024 * 1024    # target bytes for double-buffered (x + out) tiles
_VMEM_LIMIT_CAP = 48 * 1024 * 1024      # keep headroom on v7x (64 MiB physical VMEM / TC)
_VMEM_LIMIT_FLOOR = 16 * 1024 * 1024


def _round_up(x, m):
    return (x + m - 1) // m * m


def _linear_kernel(x_ref, w_ref, b_ref, o_ref):
    # One MXU matmul per grid step, f32 accumulation, sublane-broadcast bias add.
    acc = jnp.dot(
        x_ref[...],
        w_ref[...],
        preferred_element_type=jnp.float32,
        precision=jax.lax.Precision.HIGHEST,
    )
    o_ref[...] = (acc + b_ref[...]).astype(o_ref.dtype)


@jax.jit
def output_process(x, w, b):
    """x: (B, T, latent_dim); w: (latent_dim, input_feats); b: (input_feats,)."""
    B, T, K = x.shape
    Kw, N = w.shape
    assert K == Kw
    M = B * T
    dtype = x.dtype
    itemsize = jnp.dtype(dtype).itemsize

    # ---- lane fold factor: smallest FOLD with FOLD*K and FOLD*N multiples of 128 ----
    fold_k = _LANE // math.gcd(K, _LANE)
    fold_n = _LANE // math.gcd(N, _LANE)
    fold = (fold_k * fold_n) // math.gcd(fold_k, fold_n)
    if fold > _MAX_FOLD:
        fold = 1  # fall back to the unfolded (still correct) layout

    Kf, Nf = fold * K, fold * N

    # Pad rows so the folded row count is a multiple of the sublane count.
    M_pad = _round_up(M, fold * _SUBLANE)
    Mf = M_pad // fold

    x2d = x.reshape(M, K)
    if M_pad != M:
        x2d = jnp.pad(x2d, ((0, M_pad - M), (0, 0)))
    xf = x2d.reshape(Mf, Kf)

    # Block-diagonal weight / tiled bias so folded-row matmul == per-row matmul.
    wf = jnp.kron(jnp.eye(fold, dtype=w.dtype), w)        # (Kf, Nf)
    bf = jnp.tile(b.reshape(1, N), (1, fold))             # (1, Nf)

    # ---- row tile: as big as the VMEM budget allows, but >=2 grid steps when possible ----
    row_bytes = (Kf + Nf) * itemsize                       # x row + out row (lane-dense)
    tm_max = max(_SUBLANE,
                 (_XOUT_VMEM_BUDGET // (2 * row_bytes)) // _SUBLANE * _SUBLANE)
    tm = min(tm_max, _round_up(pl.cdiv(Mf, 2), _SUBLANE), Mf)
    grid_m = pl.cdiv(Mf, tm)

    # ---- right-sized VMEM request (double-buffered x/out tiles + resident w/b) ----
    footprint = 2 * tm * row_bytes + 2 * Kf * Nf * itemsize + Nf * itemsize
    vmem_limit = min(_VMEM_LIMIT_CAP, max(_VMEM_LIMIT_FLOOR, footprint + 8 * 1024 * 1024))

    cost = pl.CostEstimate(
        flops=2 * M_pad * fold * K * N,                    # actual MXU flops executed
        bytes_accessed=itemsize * (M_pad * K + Kf * Nf + Nf + M_pad * N),
        transcendentals=0,
    )

    out_f = pl.pallas_call(
        _linear_kernel,
        out_shape=jax.ShapeDtypeStruct((Mf, Nf), dtype),
        grid_spec=pltpu.PrefetchScalarGridSpec(
            num_scalar_prefetch=0,
            grid=(grid_m,),
            in_specs=[
                # x: tile over folded rows only; lane dim stays whole (512, dense).
                pl.BlockSpec((tm, Kf), lambda i: (i, 0)),
                # w and b: same block every step -> VMEM-resident.
                pl.BlockSpec((Kf, Nf), lambda i: (0, 0)),
                pl.BlockSpec((1, Nf), lambda i: (0, 0)),
            ],
            out_specs=pl.BlockSpec((tm, Nf), lambda i: (i, 0)),
        ),
        compiler_params=pltpu.CompilerParams(
            dimension_semantics=("parallel",),             # split across TCs on v7x
            vmem_limit_bytes=vmem_limit,
        ),
        cost_estimate=cost,
    )(xf, wf, bf)

    # Folded output memory layout == (M_pad, N); unfold for free, drop padding rows.
    out2d = out_f.reshape(M_pad, N)[:M]
    return out2d.reshape(B, T, N)


if __name__ == "__main__":
    # Shapes consistent with the module: latent_dim=32, input_feats=24.
    B, T, latent_dim, input_feats = 2, 8, 32, 24

    key = jax.random.PRNGKey(0)
    kx, kw, kb = jax.random.split(key, 3)

    # torch weight is (input_feats, latent_dim); we store its transpose for x @ W.T.
    bound = 1.0 / (latent_dim ** 0.5)
    w_t = jax.random.uniform(
        kw, (latent_dim, input_feats), minval=-bound, maxval=bound, dtype=jnp.float32
    )
    b = jax.random.uniform(
        kb, (input_feats,), minval=-bound, maxval=bound, dtype=jnp.float32
    )
    x = jax.random.normal(kx, (B, T, latent_dim), dtype=jnp.float32)

    y = output_process(x, w_t, b)
    jax.block_until_ready(y)

    y_ref = (
        jnp.dot(x.reshape(-1, latent_dim), w_t, precision=jax.lax.Precision.HIGHEST)
        .reshape(B, T, input_feats)
        + b
    )
    assert y.shape == (B, T, input_feats)
    assert jnp.allclose(y, y_ref, atol=1e-4, rtol=1e-4)

    # Secondary check: multiple grid steps + row padding / slicing path.
    kx2 = jax.random.fold_in(kx, 1)
    x_big = jax.random.normal(kx2, (4, 1000, latent_dim), dtype=jnp.float32)  # M=4000
    y_big = output_process(x_big, w_t, b)
    jax.block_until_ready(y_big)
    y_big_ref = (
        jnp.dot(x_big.reshape(-1, latent_dim), w_t, precision=jax.lax.Precision.HIGHEST)
        .reshape(4, 1000, input_feats)
        + b
    )
    assert jnp.allclose(y_big, y_big_ref, atol=1e-4, rtol=1e-4)

    # TODO(synk): for very small B*T this projection is overhead-dominated; in the full
    # model it would be better fused into the preceding layer than run standalone.
    print("KERNEL_OK")
</pallas_src>

<mosaic_0001>
module attributes {stable_mosaic.version = 11 : i64} {
  func.func @_linear_kernel(%arg0: i32, %arg1: memref<8x512xf32, #tpu.memory_space<vmem>>, %arg2: memref<512x384xf32, #tpu.memory_space<vmem>>, %arg3: memref<1x384xf32, #tpu.memory_space<vmem>>, %arg4: memref<8x384xf32, #tpu.memory_space<vmem>>) attributes {dimension_semantics = [#tpu.dimension_semantics<parallel>], iteration_bounds = array<i64: 1>, scalar_prefetch = 0 : i64, scratch_operands = 0 : i64, tpu.core_type = #tpu.core_type<tc>, window_params = [{transform_indices = @transform_0, window_bounds = array<i64: 8, 512>}, {pipeline_mode = #tpu.pipeline_mode<synchronous>, transform_indices = @transform_1, window_bounds = array<i64: 512, 384>}, {pipeline_mode = #tpu.pipeline_mode<synchronous>, transform_indices = @transform_2, window_bounds = array<i64: 1, 384>}, {transform_indices = @transform_3, window_bounds = array<i64: 8, 384>}]} {
    %c0 = arith.constant 0 : index
    %c0_0 = arith.constant 0 : index
    %0 = vector.load %arg1[%c0, %c0_0] : memref<8x512xf32, #tpu.memory_space<vmem>>, vector<8x512xf32>
    %c0_1 = arith.constant 0 : index
    %c0_2 = arith.constant 0 : index
    %1 = vector.load %arg2[%c0_1, %c0_2] : memref<512x384xf32, #tpu.memory_space<vmem>>, vector<512x384xf32>
    %cst = arith.constant dense<0.000000e+00> : vector<8x384xf32>
    %2 = tpu.matmul %0, %1, %cst {dimension_numbers = #tpu.dot_dimension_numbers<[1], [0], [0], [1], [0, 0, 1, 1], [], []>, precision = #tpu.contract_precision<fp32>} : vector<8x512xf32>, vector<512x384xf32>, vector<8x384xf32> -> vector<8x384xf32>
    %c0_3 = arith.constant 0 : index
    %c0_4 = arith.constant 0 : index
    %3 = vector.load %arg3[%c0_3, %c0_4] : memref<1x384xf32, #tpu.memory_space<vmem>>, vector<1x384xf32>
    %4 = vector.broadcast %3 : vector<1x384xf32> to vector<8x384xf32>
    %5 = arith.addf %2, %4 : vector<8x384xf32>
    %c0_5 = arith.constant 0 : index
    %c0_6 = arith.constant 0 : index
    %6 = vector.load %arg4[%c0_5, %c0_6] : memref<8x384xf32, #tpu.memory_space<vmem>>, vector<8x384xf32>
    tpu.vector_store %arg4[%c0_5, %c0_6], %5 {strides = array<i32>} : memref<8x384xf32, #tpu.memory_space<vmem>>, vector<8x384xf32>,
    return
  }
  func.func @transform_0(%arg0: i32) -> (i32, i32) {
    %c0_i32 = arith.constant 0 : i32
    %c0_i32_0 = arith.constant 0 : i32
    return %arg0, %c0_i32 : i32, i32
  }
  func.func @transform_1(%arg0: i32) -> (i32, i32) {
    %c0_i32 = arith.constant 0 : i32
    %c0_i32_0 = arith.constant 0 : i32
    %c0_i32_1 = arith.constant 0 : i32
    return %c0_i32, %c0_i32_0 : i32, i32
  }
  func.func @transform_2(%arg0: i32) -> (i32, i32) {
    %c0_i32 = arith.constant 0 : i32
    %c0_i32_0 = arith.constant 0 : i32
    %c0_i32_1 = arith.constant 0 : i32
    return %c0_i32, %c0_i32_0 : i32, i32
  }
  func.func @transform_3(%arg0: i32) -> (i32, i32) {
    %c0_i32 = arith.constant 0 : i32
    %c0_i32_0 = arith.constant 0 : i32
    return %arg0, %c0_i32 : i32, i32
  }
}

</mosaic_0001>

<bundles_post_ra>
// kernel: output_process.1
= control target key start
LH: loop header
LB: loop body
LE: loop exit
PB: predicated region body
PF: predicated region fallthrough
CT: control target
= control target key end

     0   :  { %s9389_s1 = inlined_call_operand.vmem [shape: f32[512,384], index: 1, kind: input, shape index: {}]   ;;  %s9390_s0 = inlined_call_operand.vmem [shape: f32[8,512], index: 0, kind: input, shape index: {}]   ;;  %s9391_s2 = inlined_call_operand.vmem [shape: f32[1,384], index: 2, kind: input, shape index: {}]   ;;  %s9392_s3 = inlined_call_operand.vmem [shape: f32[8,384], index: 3, kind: output, shape index: {}]  }
   0x1   :  { %v19_v0 = vld [vmem:[%s9389_s1 + $0x8] sm:$0xff]  ;;  %v22_v1 = vld [vmem:[%s9389_s1 + $0x20] sm:$0xff]  ;;  %v21_v5 = vld [vmem:[%s9389_s1 + $0x18] sm:$0xff] }
   0x2   :  { %v18_v2 = vld [vmem:[%s9389_s1] sm:$0xff]  ;;  %v227_v3 = vand.u32 4294901760, %v19_v0  ;;  %v231_v4 = vand.u32 4294901760, %v22_v1  ;;  %v25_v7 = vld [vmem:[%s9389_s1 + $0x38] sm:$0xff]  ;;  %v28_v8 = vld [vmem:[%s9389_s1 + $0x50] sm:$0xff]  ;;  %v233_v9 = vand.u32 4294901760, %v21_v5 }
   0x3   :  { %v229_v6 = vand.u32 4294901760, %v18_v2  ;;  %v235_v10 = vand.u32 4294901760, %v25_v7  ;;  %v239_v11 = vand.u32 4294901760, %v28_v8  ;;  %v24_v12 = vld [vmem:[%s9389_s1 + $0x30] sm:$0xff]  ;;  %v27_v13 = vld [vmem:[%s9389_s1 + $0x48] sm:$0xff]  ;;  %v6174_v16 = vld [vmem:[%s9389_s1 + $0x80] sm:$0xff] }
   0x4   :  { %v31_v14 = vld [vmem:[%s9389_s1 + $0x68] sm:$0xff]  ;;  %v6169_v15 = vpack.c.bf16 %v231_v4, %v227_v3  ;;  %v6179_v17 = vld [vmem:[%s9389_s1 + $0x60] sm:$0xff]  ;;  %v6184_v18 = vld [vmem:[%s9389_s1 + $0x78] sm:$0xff]  ;;  %v237_v23 = vand.u32 4294901760, %v24_v12  ;;  %v241_v24 = vand.u32 4294901760, %v27_v13  ;;  %v247_v26 = vand.u32 4294901760, %v6174_v16 }
   0x5   :  { %v6186_v19 = vpack.c.bf16 %v233_v9, %v229_v6  ;;  %v6188_v20 = vpack.c.bf16 %v239_v11, %v235_v10  ;;  %v37_v21 = vld [vmem:[%s9389_s1 + $0x98] sm:$0xff]  ;;  %v40_v22 = vld [vmem:[%s9389_s1 + $0xb0] sm:$0xff]  ;;  %v243_v25 = vand.u32 4294901760, %v31_v14  ;;  %v245_v27 = vand.u32 4294901760, %v6179_v17  ;;  %v39_v33 = vld [vmem:[%s9389_s1 + $0xa8] sm:$0xff] }
   0x6   :  { %9884 = vst [vmem:[#allocation2_spill] sm:$0xff] %v6169_v15  ;;  %4947 = vmatprep.subr.bf16.mxu1 %v6169_v15  ;;  %5139 = vmatprep.subr.bf16.mxu0 %v6169_v15  ;;  %v249_v28 = vand.u32 4294901760, %v6184_v18  ;;  %v6205_v29 = vpack.c.bf16 %v241_v24, %v237_v23  ;;  %v251_v30 = vand.u32 4294901760, %v37_v21  ;;  %v255_v31 = vand.u32 4294901760, %v40_v22  ;;  %v36_v32 = vld [vmem:[%s9389_s1 + $0x90] sm:$0xff]  ;;  %v43_v35 = vld [vmem:[%s9389_s1 + $0xc8] sm:$0xff] }
   0x7   :  { %9885 = vst [vmem:[#allocation3_spill] sm:$0xff] %v6186_v19  ;;  %9886 = vst [vmem:[#allocation4_spill] sm:$0xff] %v6188_v20  ;;  %4949 = vmatpush1.bf16.msra.mxu1 %v6186_v19  ;;  %5141 = vmatpush1.bf16.msra.mxu0 %v6186_v19  ;;  %v6213_v34 = vpack.c.bf16 %v247_v26, %v243_v25  ;;  %v46_v36 = vld [vmem:[%s9389_s1 + $0xe0] sm:$0xff]  ;;  %v253_v38 = vand.u32 4294901760, %v36_v32  ;;  %v257_v39 = vand.u32 4294901760, %v39_v33  ;;  %v259_v41 = vand.u32 4294901760, %v43_v35 }
   0x8   :  { %4951 = vmatprep.subr.bf16.mxu1 %v6188_v20  ;;  %5143 = vmatprep.subr.bf16.mxu0 %v6188_v20  ;;  %9887 = vst [vmem:[#allocation5_spill] sm:$0xff] %v6205_v29  ;;  %v6223_v37 = vpack.c.bf16 %v249_v28, %v245_v27  ;;  %v6227_v40 = vpack.c.bf16 %v255_v31, %v251_v30  ;;  %v263_v42 = vand.u32 4294901760, %v46_v36  ;;  %v42_v43 = vld [vmem:[%s9389_s1 + $0xc0] sm:$0xff]  ;;  %v45_v44 = vld [vmem:[%s9389_s1 + $0xd8] sm:$0xff]  ;;  %v52_v49 = vld [vmem:[%s9389_s1 + $0x110] sm:$0xff] }
   0x9   :  { %9888 = vst [vmem:[#allocation6_spill] sm:$0xff] %v6213_v34  ;;  %v6235_v45 = vsub.f32 %v19_v0, %v227_v3  ;;  %v6237_v46 = vsub.f32 %v22_v1, %v231_v4  ;;  %v6239_v47 = vsub.f32 %v18_v2, %v229_v6  ;;  %v49_v48 = vld [vmem:[%s9389_s1 + $0xf8] sm:$0xff]  ;;  %v6247_v50 = vsub.f32 %v21_v5, %v233_v9  ;;  %v48_v58 = vld [vmem:[%s9389_s1 + $0xf0] sm:$0xff]  ;;  %v51_v59 = vld [vmem:[%s9389_s1 + $0x108] sm:$0xff] }
   0xa   :  { %9889 = vst [vmem:[#allocation7_spill] sm:$0xff] %v6223_v37  ;;  %9890 = vst [vmem:[#allocation8_spill] sm:$0xff] %v6227_v40  ;;  %v6249_v51 = vsub.f32 %v25_v7, %v235_v10  ;;  %v6251_v52 = vsub.f32 %v28_v8, %v239_v11  ;;  %v6253_v53 = vsub.f32 %v24_v12, %v237_v23  ;;  %v261_v56 = vand.u32 4294901760, %v42_v43  ;;  %v55_v0 = vld [vmem:[%s9389_s1 + $0x128] sm:$0xff]  ;;  %v58_v1 = vld [vmem:[%s9389_s1 + $0x140] sm:$0xff] }
   0xb   :  { %4953 = vmatpush1.bf16.msra.mxu1 %v6205_v29  ;;  %5145 = vmatpush1.bf16.msra.mxu0 %v6205_v29  ;;  %9891 = vst [vmem:[#allocation9_spill] sm:$0xff] %v6235_v45  ;;  %9892 = vst [vmem:[#allocation10_spill] sm:$0xff] %v6237_v46  ;;  %v6255_v54 = vsub.f32 %v27_v13, %v241_v24  ;;  %v6259_v55 = vpack.c.bf16 %v257_v39, %v253_v38  ;;  %v265_v57 = vand.u32 4294901760, %v45_v44  ;;  %v54_v10 = vld [vmem:[%s9389_s1 + $0x120] sm:$0xff]  ;;  %v57_v11 = vld [vmem:[%s9389_s1 + $0x138] sm:$0xff] }
   0xc   :  { %4955 = vmatprep.subr.bf16.mxu1 %v6213_v34  ;;  %5147 = vmatprep.subr.bf16.mxu0 %v6213_v34  ;;  %9893 = vst [vmem:[#allocation11_spill] sm:$0xff] %v6239_v47  ;;  %9894 = vst [vmem:[#allocation12_spill] sm:$0xff] %v6247_v50  ;;  %v6267_v60 = vsub.f32 %v31_v14, %v243_v25  ;;  %v6271_v61 = vpack.c.bf16 %v263_v42, %v259_v41  ;;  %v267_v62 = vand.u32 4294901760, %v49_v48  ;;  %v64_v23 = vld [vmem:[%s9389_s1 + $0x170] sm:$0xff] }
   0xd   :  { %9895 = vst [vmem:[#allocation13_spill] sm:$0xff] %v6249_v51  ;;  %9896 = vst [vmem:[#allocation14_spill] sm:$0xff] %v6251_v52  ;;  %v271_v63 = vand.u32 4294901760, %v52_v49  ;;  %v6280_v2 = vsub.f32 %v6174_v16, %v247_v26  ;;  %v6283_v3 = vsub.f32 %v6179_v17, %v245_v27  ;;  %v6286_v4 = vsub.f32 %v6184_v18, %v249_v28  ;;  %v60_v28 = vld [vmem:[%s9389_s1 + $0x150] sm:$0xff] }
   0xe   :  { %9897 = vst [vmem:[#allocation15_spill] sm:$0xff] %v6259_v55  ;;  %9898 = vst [vmem:[#allocation16_spill] sm:$0xff] %v6271_v61  ;;  %v6288_v5 = vsub.f32 %v37_v21, %v251_v30  ;;  %v6290_v6 = vsub.f32 %v40_v22, %v255_v31  ;;  %v6292_v7 = vsub.f32 %v36_v32, %v253_v38  ;;  %v269_v8 = vand.u32 4294901760, %v48_v58  ;;  %v61_v22 = vld [vmem:[%s9389_s1 + $0x158] sm:$0xff]  ;;  %v63_v30 = vld [vmem:[%s9389_s1 + $0x168] sm:$0xff] }
   0xf   :  { %4957 = vmatpush1.bf16.msra.mxu1 %v6223_v37  ;;  %5149 = vmatpush1.bf16.msra.mxu0 %v6223_v37  ;;  %9899 = vst [vmem:[#allocation17_spill] sm:$0xff] %v6286_v4  ;;  %v273_v9 = vand.u32 4294901760, %v51_v59  ;;  %v6301_v12 = vsub.f32 %v39_v33, %v257_v39  ;;  %v6304_v13 = vpack.c.bf16 %v265_v57, %v261_v56  ;;  %v275_v14 = vand.u32 4294901760, %v55_v0  ;;  %v70_v38 = vld [vmem:[%s9389_s1 + $0x1a0] sm:$0xff]  ;;  %v79_v37 = vld [vmem:[%s9389_s1 + $0x1e8] sm:$0xff] }
  0x10   :  { %4959 = vmatprep.subr.bf16.mxu1 %v6227_v40  ;;  %5151 = vmatprep.subr.bf16.mxu0 %v6227_v40  ;;  %9900 = vst [vmem:[#allocation18_spill] sm:$0xff] %v6288_v5  ;;  %9901 = vst [vmem:[#allocation19_spill] sm:$0xff] %v6292_v7  ;;  %v279_v16 = vand.u32 4294901760, %v58_v1  ;;  %v6307_v17 = vsub.f32 %v43_v35, %v259_v41  ;;  %v6309_v18 = vsub.f32 %v46_v36, %v263_v42  ;;  %v67_v36 = vld [vmem:[%s9389_s1 + $0x188] sm:$0xff] }
  0x11   :  { %9902 = vst [vmem:[#allocation20_spill] sm:$0xff] %v6301_v12  ;;  %9903 = vst [vmem:[#allocation21_spill] sm:$0xff] %v6304_v13  ;;  %v6312_v21 = vpack.c.bf16 %v271_v63, %v267_v62  ;;  %v6320_v24 = vsub.f32 %v42_v43, %v261_v56  ;;  %v6322_v25 = vsub.f32 %v45_v44, %v265_v57  ;;  %v277_v26 = vand.u32 4294901760, %v54_v10  ;;  %v66_v44 = vld [vmem:[%s9389_s1 + $0x180] sm:$0xff] }
  0x12   :  { %9904 = vst [vmem:[#allocation22_spill] sm:$0xff] %v6307_v17  ;;  %9905 = vst [vmem:[#allocation23_spill] sm:$0xff] %v6309_v18  ;;  %v281_v27 = vand.u32 4294901760, %v57_v11  ;;  %v6330_v31 = vsub.f32 %v49_v48, %v267_v62  ;;  %v6332_v32 = vsub.f32 %v52_v49, %v271_v63  ;;  %v6334_v33 = vpack.c.bf16 %v273_v9, %v269_v8  ;;  %v69_v48 = vld [vmem:[%s9389_s1 + $0x198] sm:$0xff]  ;;  %v76_v62 = vld [vmem:[%s9389_s1 + $0x1d0] sm:$0xff] }
  0x13   :  { %4961 = vmatpush1.bf16.msra.mxu1 %v6259_v55  ;;  %5153 = vmatpush1.bf16.msra.mxu0 %v6259_v55  ;;  %9906 = vst [vmem:[#allocation24_spill] sm:$0xff] %v6312_v21  ;;  %9907 = vst [vmem:[#allocation25_spill] sm:$0xff] %v6320_v24  ;;  %v6336_v35 = vsub.f32 %v48_v58, %v269_v8  ;;  %v6346_v39 = vsub.f32 %v51_v59, %v273_v9  ;;  %v283_v42 = vand.u32 4294901760, %v61_v22  ;;  %v73_v59 = vld [vmem:[%s9389_s1 + $0x1b8] sm:$0xff] }
  0x14   :  { %4963 = vmatprep.subr.bf16.mxu1 %v6271_v61  ;;  %5155 = vmatprep.subr.bf16.mxu0 %v6271_v61  ;;  %9908 = vst [vmem:[#allocation26_spill] sm:$0xff] %v6322_v25  ;;  %9909 = vst [vmem:[#allocation27_spill] sm:$0xff] %v6330_v31  ;;  %v6348_v41 = vpack.c.bf16 %v279_v16, %v275_v14  ;;  %v287_v43 = vand.u32 4294901760, %v64_v23  ;;  %v6358_v49 = vsub.f32 %v55_v0, %v275_v14  ;;  %v72_v0 = vld [vmem:[%s9389_s1 + $0x1b0] sm:$0xff] }
  0x15   :  { %9910 = vst [vmem:[#allocation28_spill] sm:$0xff] %v6332_v32  ;;  %9911 = vst [vmem:[#allocation29_spill] sm:$0xff] %v6334_v33  ;;  %v6360_v56 = vsub.f32 %v58_v1, %v279_v16  ;;  %v285_v57 = vand.u32 4294901760, %v60_v28  ;;  %v289_v58 = vand.u32 4294901760, %v63_v30  ;;  %v6368_v63 = vpack.c.bf16 %v281_v27, %v277_v26  ;;  %v75_v1 = vld [vmem:[%s9389_s1 + $0x1c8] sm:$0xff] }
  0x16   :  { %9912 = vst [vmem:[#allocation30_spill] sm:$0xff] %v6336_v35  ;;  %9913 = vst [vmem:[#allocation31_spill] sm:$0xff] %v6346_v39  ;;  %v6370_v8 = vsub.f32 %v54_v10, %v277_v26  ;;  %v291_v9 = vand.u32 4294901760, %v67_v36  ;;  %v6378_v14 = vsub.f32 %v57_v11, %v281_v27  ;;  %v6380_v16 = vsub.f32 %v61_v22, %v283_v42  ;;  %v82_v11 = vld [vmem:[%s9389_s1 + $0x200] sm:$0xff] }
  0x17   :  { %4965 = vmatpush1.bf16.msra.mxu1 %v6304_v13  ;;  %5157 = vmatpush1.bf16.msra.mxu0 %v6304_v13  ;;  %9914 = vst [vmem:[#allocation32_spill] sm:$0xff] %v6348_v41  ;;  %9915 = vst [vmem:[#allocation33_spill] sm:$0xff] %v6358_v49  ;;  %v293_v13 = vand.u32 4294901760, %v66_v44  ;;  %v297_v61 = vand.u32 4294901760, %v69_v48  ;;  %v6384_v10 = vpack.c.bf16 %v287_v43, %v283_v42  ;;  %v299_v55 = vand.u32 4294901760, %v73_v59 }
  0x18   :  { %4967 = vmatprep.subr.bf16.mxu1 %v6312_v21  ;;  %5159 = vmatprep.subr.bf16.mxu0 %v6312_v21  ;;  %9916 = vst [vmem:[#allocation34_spill] sm:$0xff] %v6360_v56  ;;  %9917 = vst [vmem:[#allocation35_spill] sm:$0xff] %v6368_v63  ;;  %v295_v21 = vand.u32 4294901760, %v70_v38  ;;  %v6386_v26 = vsub.f32 %v64_v23, %v287_v43  ;;  %v303_v40 = vand.u32 4294901760, %v76_v62  ;;  %v301_v23 = vand.u32 4294901760, %v72_v0  ;;  %v78_v43 = vld [vmem:[%s9389_s1 + $0x1e0] sm:$0xff] }
  0x19   :  { %9918 = vst [vmem:[#allocation36_spill] sm:$0xff] %v6370_v8  ;;  %9919 = vst [vmem:[#allocation37_spill] sm:$0xff] %v6378_v14  ;;  %v6396_v22 = vpack.c.bf16 %v289_v58, %v285_v57  ;;  %v6398_v27 = vsub.f32 %v60_v28, %v285_v57  ;;  %v305_v42 = vand.u32 4294901760, %v75_v1  ;;  %v6406_v34 = vsub.f32 %v63_v30, %v289_v58  ;;  %v88_v30 = vld [vmem:[%s9389_s1 + $0x230] sm:$0xff]  ;;  %v87_v58 = vld [vmem:[%s9389_s1 + $0x228] sm:$0xff] }
  0x1a   :  { %9920 = vst [vmem:[#allocation38_spill] sm:$0xff] %v6380_v16  ;;  %9921 = vst [vmem:[#allocation39_spill] sm:$0xff] %v6384_v10  ;;  %v6408_v29 = vpack.c.bf16 %v295_v21, %v291_v9  ;;  %v6410_v20 = vsub.f32 %v67_v36, %v291_v9  ;;  %v6414_v28 = vpack.c.bf16 %v297_v61, %v293_v13  ;;  %v307_v19 = vand.u32 4294901760, %v79_v37 }
  0x1b   :  { %4969 = vmatpush1.bf16.msra.mxu1 %v6334_v33  ;;  %5161 = vmatpush1.bf16.msra.mxu0 %v6334_v33  ;;  %9922 = vst [vmem:[#allocation40_spill] sm:$0xff] %v6386_v26  ;;  %9923 = vst [vmem:[#allocation41_spill] sm:$0xff] %v6396_v22  ;;  %v81_v33 = vld [vmem:[%s9389_s1 + $0x1f8] sm:$0xff]  ;;  %v6416_v57 = vsub.f32 %v66_v44, %v293_v13  ;;  %v311_v15 = vand.u32 4294901760, %v82_v11  ;;  %v6428_v36 = vpack.c.bf16 %v303_v40, %v299_v55  ;;  %v84_v44 = vld [vmem:[%s9389_s1 + $0x210] sm:$0xff] }
  0x1c   :  { %4971 = vmatprep.subr.bf16.mxu1 %v6348_v41  ;;  %5163 = vmatprep.subr.bf16.mxu0 %v6348_v41  ;;  %9924 = vst [vmem:[#allocation42_spill] sm:$0xff] %v6398_v27  ;;  %9925 = vst [vmem:[#allocation43_spill] sm:$0xff] %v6406_v34  ;;  %v6412_v41 = vsub.f32 %v70_v38, %v295_v21  ;;  %v85_v27 = vld [vmem:[%s9389_s1 + $0x218] sm:$0xff]  ;;  %v6426_v21 = vsub.f32 %v69_v48, %v297_v61  ;;  %v309_v13 = vand.u32 4294901760, %v78_v43 }
  0x1d   :  { %9926 = vst [vmem:[#allocation44_spill] sm:$0xff] %v6408_v29  ;;  %9927 = vst [vmem:[#allocation45_spill] sm:$0xff] %v6410_v20  ;;  %v313_v38 = vand.u32 4294901760, %v81_v33  ;;  %v6438_v9 = vsub.f32 %v73_v59, %v299_v55  ;;  %v6440_v61 = vsub.f32 %v76_v62, %v303_v40  ;;  %v6442_v48 = vpack.c.bf16 %v305_v42, %v301_v23  ;;  %v90_v40 = vld [vmem:[%s9389_s1 + $0x240] sm:$0xff]  ;;  %v93_v55 = vld [vmem:[%s9389_s1 + $0x258] sm:$0xff] }
  0x1e   :  { %9928 = vst [vmem:[#allocation46_spill] sm:$0xff] %v6412_v41  ;;  %9929 = vst [vmem:[#allocation47_spill] sm:$0xff] %v6414_v28  ;;  %v6452_v41 = vsub.f32 %v75_v1, %v305_v42  ;;  %v315_v20 = vand.u32 4294901760, %v85_v27  ;;  %v6460_v59 = vpack.c.bf16 %v311_v15, %v307_v19  ;;  %v6462_v62 = vsub.f32 %v79_v37, %v307_v19  ;;  %v100_v1 = vld [vmem:[%s9389_s1 + $0x290] sm:$0xff] }
  0x1f   :  { %9930 = vst [vmem:[#allocation48_spill] sm:$0xff] %v6416_v57  ;;  %4973 = vmatpush1.bf16.msra.mxu1 %v6368_v63  ;;  %5165 = vmatpush1.bf16.msra.mxu0 %v6368_v63  ;;  %9931 = vst [vmem:[#allocation49_spill] sm:$0xff] %v6426_v21  ;;  %v91_v63 = vld [vmem:[%s9389_s1 + $0x248] sm:$0xff]  ;;  %v94_v21 = vld [vmem:[%s9389_s1 + $0x260] sm:$0xff]  ;;  %v6450_v57 = vsub.f32 %v72_v0, %v301_v23  ;;  %v6472_v23 = vsub.f32 %v82_v11, %v311_v15  ;;  %v329_v34 = vand.u32 4294901760, %v93_v55 }
  0x20   :  { %9932 = vst [vmem:[#allocation50_spill] sm:$0xff] %v6428_v36  ;;  %4975 = vmatprep.subr.bf16.mxu1 %v6384_v10  ;;  %5167 = vmatprep.subr.bf16.mxu0 %v6384_v10  ;;  %9933 = vst [vmem:[#allocation51_spill] sm:$0xff] %v6438_v9  ;;  %v319_v10 = vand.u32 4294901760, %v88_v30  ;;  %v321_v9 = vand.u32 4294901760, %v87_v58  ;;  %v97_v0 = vld [vmem:[%s9389_s1 + $0x278] sm:$0xff]  ;;  %v6474_v42 = vpack.c.bf16 %v313_v38, %v309_v13  ;;  %v323_v19 = vand.u32 4294901760, %v91_v63 }
  0x21   :  { %9934 = vst [vmem:[#allocation52_spill] sm:$0xff] %v6440_v61  ;;  %9935 = vst [vmem:[#allocation53_spill] sm:$0xff] %v6442_v48  ;;  %v317_v61 = vand.u32 4294901760, %v84_v44  ;;  %v327_v37 = vand.u32 4294901760, %v94_v21  ;;  %v6484_v16 = vsub.f32 %v85_v27, %v315_v20  ;;  %v331_v15 = vand.u32 4294901760, %v97_v0 }
  0x22   :  { %9936 = vst [vmem:[#allocation54_spill] sm:$0xff] %v6450_v57  ;;  %9937 = vst [vmem:[#allocation55_spill] sm:$0xff] %v6452_v41  ;;  %v6480_v41 = vsub.f32 %v81_v33, %v313_v38  ;;  %v325_v57 = vand.u32 4294901760, %v90_v40  ;;  %v6482_v26 = vpack.c.bf16 %v319_v10, %v315_v20  ;;  %v335_v11 = vand.u32 4294901760, %v100_v1  ;;  %v15_v20 = vld [vmem:[%s9390_s0 + $0x8] sm:$0xff] }
  0x23   :  { %9938 = vst [vmem:[#allocation56_spill] sm:$0xff] %v6460_v59  ;;  %9939 = vst [vmem:[#allocation57_spill] sm:$0xff] %v6462_v62  ;;  %4977 = vmatpush1.bf16.msra.mxu1 %v6396_v22  ;;  %5169 = vmatpush1.bf16.msra.mxu0 %v6396_v22  ;;  %v6478_v62 = vsub.f32 %v78_v43, %v309_v13  ;;  %v96_v22 = vld [vmem:[%s9389_s1 + $0x270] sm:$0xff]  ;;  %v6492_v43 = vsub.f32 %v88_v30, %v319_v10  ;;  %v103_v30 = vld [vmem:[%s9389_s1 + $0x2a8] sm:$0xff] }
  0x24   :  { %9940 = vst [vmem:[#allocation58_spill] sm:$0xff] %v6472_v23  ;;  %9941 = vst [vmem:[#allocation59_spill] sm:$0xff] %v6474_v42  ;;  %4979 = vmatprep.subr.bf16.mxu1 %v6408_v29  ;;  %5171 = vmatprep.subr.bf16.mxu0 %v6408_v29  ;;  %v99_v29 = vld [vmem:[%s9389_s1 + $0x288] sm:$0xff]  ;;  %v6494_v33 = vpack.c.bf16 %v321_v9, %v317_v61  ;;  %v6496_v13 = vsub.f32 %v84_v44, %v317_v61  ;;  %v106_v44 = vld [vmem:[%s9389_s1 + $0x2c0] sm:$0xff] }
  0x25   :  { %9942 = vst [vmem:[#allocation60_spill] sm:$0xff] %v6478_v62  ;;  %9943 = vst [vmem:[#allocation61_spill] sm:$0xff] %v6480_v41  ;;  %v6498_v38 = vsub.f32 %v87_v58, %v321_v9  ;;  %v6505_v27 = vpack.c.bf16 %v327_v37, %v323_v19  ;;  %v6509_v10 = vsub.f32 %v94_v21, %v327_v37  ;;  %v14_v58 = vld [vmem:[%s9390_s0] sm:$0xff]  ;;  %v333_v9 = vand.u32 4294901760, %v96_v22  ;;  %v105_v37 = vld [vmem:[%s9389_s1 + $0x2b8] sm:$0xff] }
  0x26   :  { %9944 = vst [vmem:[#allocation62_spill] sm:$0xff] %v6482_v26  ;;  %9945 = vst [vmem:[#allocation63_spill] sm:$0xff] %v6484_v16  ;;  %v6507_v16 = vsub.f32 %v91_v63, %v323_v19  ;;  %v6522_v63 = vpack.c.bf16 %v329_v34, %v325_v57  ;;  %v6524_v21 = vsub.f32 %v90_v40, %v325_v57  ;;  %v337_v61 = vand.u32 4294901760, %v99_v29  ;;  %v102_v19 = vld [vmem:[%s9389_s1 + $0x2a0] sm:$0xff] }
  0x27   :  { %9946 = vst [vmem:[#allocation64_spill] sm:$0xff] %v6492_v43  ;;  %9947 = vst [vmem:[#allocation65_spill] sm:$0xff] %v6494_v33  ;;  %4981 = vmatpush1.bf16.msra.mxu1 %v6414_v28  ;;  %5173 = vmatpush1.bf16.msra.mxu0 %v6414_v28  ;;  %v6532_v28 = vsub.f32 %v93_v55, %v329_v34  ;;  %v6540_v57 = vsub.f32 %v100_v1, %v335_v11  ;;  %v339_v40 = vand.u32 4294901760, %v103_v30 }
  0x28   :  { %9948 = vst [vmem:[#allocation66_spill] sm:$0xff] %v6496_v13  ;;  %9949 = vst [vmem:[#allocation67_spill] sm:$0xff] %v6498_v38  ;;  %4983 = vmatprep.subr.bf16.mxu1 %v6428_v36  ;;  %5175 = vmatprep.subr.bf16.mxu0 %v6428_v36  ;;  %v6538_v36 = vand.u32 4294901760, %v15_v20  ;;  %v6542_v38 = vand.u32 4294901760, %v14_v58  ;;  %v6546_v13 = vsub.f32 %v96_v22, %v333_v9  ;;  %v341_v34 = vand.u32 4294901760, %v102_v19  ;;  %v112_v22 = vld [vmem:[%s9389_s1 + $0x2f0] sm:$0xff] }
  0x29   :  { %9950 = vst [vmem:[#allocation68_spill] sm:$0xff] %v6505_v27  ;;  %9951 = vst [vmem:[#allocation69_spill] sm:$0xff] %v6507_v16  ;;  %v6536_v16 = vsub.f32 %v97_v0, %v331_v15  ;;  %v345_v55 = vand.u32 4294901760, %v105_v37  ;;  %v109_v0 = vld [vmem:[%s9389_s1 + $0x2d8] sm:$0xff]  ;;  %v6556_v1 = vpack.c.bf16 %v337_v61, %v333_v9  ;;  %v392_v9 = vand.u32 4294901760, %v6247_v50 }
  0x2a   :  { %9952 = vst [vmem:[#allocation70_spill] sm:$0xff] %v6509_v10  ;;  %9953 = vst [vmem:[#allocation71_spill] sm:$0xff] %v6522_v63  ;;  %v6534_v10 = vpack.c.bf16 %v335_v11, %v331_v15  ;;  %v6552_v15 = vsub.f32 %v15_v20, %v6538_v36  ;;  %v6558_v11 = vsub.f32 %v99_v29, %v337_v61  ;;  %v386_v20 = vand.u32 4294901760, %v6237_v46 }
  0x2b   :  { %9954 = vst [vmem:[#allocation72_spill] sm:$0xff] %v6524_v21  ;;  %9955 = vst [vmem:[#allocation73_spill] sm:$0xff] %v6532_v28  ;;  %v343_v21 = vand.u32 4294901760, %v106_v44  ;;  %4985 = vmatpush1.bf16.msra.mxu1 %v6442_v48  ;;  %5177 = vmatpush1.bf16.msra.mxu0 %v6442_v48  ;;  %v6560_v48 = vsub.f32 %v103_v30, %v339_v40  ;;  %v347_v30 = vand.u32 4294901760, %v109_v0  ;;  %v108_v28 = vld [vmem:[%s9389_s1 + $0x2d0] sm:$0xff] }
  0x2c   :  { %9956 = vst [vmem:[#allocation74_spill] sm:$0xff] %v6534_v10  ;;  %9957 = vst [vmem:[#allocation75_spill] sm:$0xff] %v6536_v16  ;;  %4987 = vmatprep.subr.bf16.mxu1 %v6460_v59  ;;  %5179 = vmatprep.subr.bf16.mxu0 %v6460_v59  ;;  %v380_v16 = vand.u32 4294901760, %v6239_v47  ;;  %v6577_v61 = vsub.f32 %v14_v58, %v6542_v38  ;;  %v398_v58 = vand.u32 4294901760, %v6249_v51 }
  0x2d   :  { %9958 = vst [vmem:[#allocation76_spill] sm:$0xff] %v6538_v36  ;;  %9959 = vst [vmem:[#allocation77_spill] sm:$0xff] %v6540_v57  ;;  %v6567_v57 = vand.u32 4294901760, %v6552_v15  ;;  %v6572_v59 = vpack.c.bf16 %v343_v21, %v339_v40  ;;  %v6574_v29 = vsub.f32 %v106_v44, %v343_v21  ;;  %v111_v44 = vld [vmem:[%s9389_s1 + $0x2e8] sm:$0xff]  ;;  %v6594_v40 = vsub.f32 %v102_v19, %v341_v34 }
  0x2e   :  { %9960 = vst [vmem:[#allocation78_spill] sm:$0xff] %v6542_v38  ;;  %9961 = vst [vmem:[#allocation79_spill] sm:$0xff] %v6546_v13  ;;  %v374_v13 = vand.u32 4294901760, %v6235_v45  ;;  %v387_v41 = vsub.f32 %v6237_v46, %v386_v20  ;;  %v393_v62 = vsub.f32 %v6247_v50, %v392_v9  ;;  %v6606_v23 = vsub.f32 %v109_v0, %v347_v30 }
  0x2f   :  { %9962 = vst [vmem:[#allocation80_spill] sm:$0xff] %v6552_v15  ;;  %9963 = vst [vmem:[#allocation81_spill] sm:$0xff] %v6556_v1  ;;  %4989 = vmatpush1.bf16.msra.mxu1 %v6474_v42  ;;  %5181 = vmatpush1.bf16.msra.mxu0 %v6474_v42  ;;  %v358_v21 = vsub.f32 %v6552_v15, %v6567_v57  ;;  %v6596_v42 = vsub.f32 %v105_v37, %v345_v55  ;;  %v349_v19 = vand.u32 4294901760, %v108_v28 }
  0x30   :  { %9964 = vst [vmem:[#allocation82_spill] sm:$0xff] %v6558_v11  ;;  %9965 = vst [vmem:[#allocation83_spill] sm:$0xff] %v6560_v48  ;;  %v6581_v48 = vpack.c.bf16 %v345_v55, %v341_v34  ;;  %v351_v11 = vand.u32 4294901760, %v112_v22  ;;  %4991 = vmatprep.subr.bf16.mxu1 %v6482_v26  ;;  %5183 = vmatprep.subr.bf16.mxu0 %v6482_v26  ;;  %v375_v38 = vsub.f32 %v6235_v45, %v374_v13 }
  0x31   :  { %9966 = vst [vmem:[#allocation84_spill] sm:$0xff] %v6567_v57  ;;  %9967 = vst [vmem:[#allocation85_spill] sm:$0xff] %v6572_v59  ;;  %v6600_v43 = vand.u32 4294901760, %v358_v21  ;;  %1099 = vmatprep.mubr.f32.mxu0 %v6567_v57  ;;  %v381_v15 = vsub.f32 %v6239_v47, %v380_v16  ;;  %v353_v34 = vand.u32 4294901760, %v111_v44  ;;  %v6609_v37 = vand.u32 4294901760, %v6577_v61 }
  0x32   :  { %9968 = vst [vmem:[#allocation86_spill] sm:$0xff] %v6574_v29  ;;  %9969 = vst [vmem:[#allocation87_spill] sm:$0xff] %v6577_v61  ;;  %v410_v29 = vand.u32 4294901760, %v6251_v52  ;;  %v399_v55 = vsub.f32 %v6249_v51, %v398_v58  ;;  %v404_v57 = vand.u32 4294901760, %v6253_v53  ;;  %v416_v26 = vand.u32 4294901760, %v6255_v54 }
  0x33   :  { %9970 = vst [vmem:[#allocation88_spill] sm:$0xff] %v6581_v48  ;;  %9971 = vst [vmem:[#allocation89_spill] sm:$0xff] %v6596_v42  ;;  %4993 = vmatpush1.bf16.msra.mxu1 %v6494_v33  ;;  %5185 = vmatpush1.bf16.msra.mxu0 %v6494_v33  ;;  %v6619_v0 = vpack.c.bf16 %v351_v11, %v347_v30  ;;  %v6621_v50 = vsub.f32 %v112_v22, %v351_v11  ;;  %v376_v33 = vand.u32 4294901760, %v375_v38 }
  0x34   :  { %9972 = vst [vmem:[#allocation90_spill] sm:$0xff] %v6600_v43  ;;  %9973 = vst [vmem:[#allocation91_spill] sm:$0xff] %v6606_v23  ;;  %v411_v21 = vsub.f32 %v6251_v52, %v410_v29  ;;  %4995 = vmatprep.subr.bf16.mxu1 %v6505_v27  ;;  %5187 = vmatprep.subr.bf16.mxu0 %v6505_v27  ;;  %v6623_v47 = vsub.f32 %v108_v28, %v349_v19  ;;  %v388_v51 = vand.u32 4294901760, %v387_v41 }
  0x35   :  { %9974 = vst [vmem:[#allocation92_spill] sm:$0xff] %v6609_v37  ;;  %9975 = vst [vmem:[#allocation93_spill] sm:$0xff] %v6619_v0  ;;  %360 = vmatprep.mubr.f32.mxu1 %v6600_v43  ;;  %v382_v46 = vand.u32 4294901760, %v381_v15  ;;  %v394_v52 = vand.u32 4294901760, %v393_v62  ;;  %v6626_v45 = vpack.c.bf16 %v353_v34, %v349_v19  ;;  %v364_v23 = vsub.f32 %v6577_v61, %v6609_v37 }
  0x36   :  { %9976 = vst [vmem:[#allocation94_spill] sm:$0xff] %v6623_v47  ;;  %v422_v42 = vand.u32 4294901760, %v6267_v60  ;;  %v434_v30 = vand.u32 4294901760, %v6280_v2  ;;  %v400_v28 = vand.u32 4294901760, %v399_v55  ;;  %v412_v11 = vand.u32 4294901760, %v411_v21 }
  0x37   :  { %9977 = vst [vmem:[#allocation95_spill] sm:$0xff] %v6626_v45  ;;  %4997 = vmatpush1.bf16.msra.mxu1 %v6522_v63  ;;  %5189 = vmatpush1.bf16.msra.mxu0 %v6522_v63  ;;  %v405_v38 = vsub.f32 %v6253_v53, %v404_v57  ;;  %v417_v41 = vsub.f32 %v6255_v54, %v416_v26  ;;  %v428_v19 = vand.u32 4294901760, %v6283_v3  ;;  %v440_v21 = vand.u32 4294901760, %v6286_v4 }
  0x38   :  { %4999 = vmatprep.subr.bf16.mxu1 %v6534_v10  ;;  %5191 = vmatprep.subr.bf16.mxu0 %v6534_v10  ;;  %v6638_v62 = vsub.f32 %v111_v44, %v353_v34  ;;  %v5202_v15 = vpack.c.bf16 %v386_v20, %v374_v13  ;;  %v6640_v22 = vpack.c.bf16 %v392_v9, %v380_v16  ;;  %v6648_v63 = vand.u32 4294901760, %v364_v23 }
  0x39   :  { %v5010_v43 = vpack.c.bf16 %v388_v51, %v376_v33  ;;  %v6643_v61 = vpack.c.bf16 %v394_v52, %v382_v46  ;;  %v6645_v55 = vpack.c.bf16 %v410_v29, %v398_v58  ;;  %v6650_v27 = vpack.c.bf16 %v416_v26, %v404_v57 }
  0x3a   :  { %9978 = vst [vmem:[#allocation96_spill] sm:$0xff] %v6638_v62  ;;  %9979 = vst [vmem:[#allocation97_spill] sm:$0xff] %v6648_v63  ;;  %v423_v10 = vsub.f32 %v6267_v60, %v422_v42  ;;  %v435_v44 = vsub.f32 %v6280_v2, %v434_v30  ;;  %v6656_v16 = vpack.c.bf16 %v412_v11, %v400_v28  ;;  %v406_v46 = vand.u32 4294901760, %v405_v38 }
  0x3b   :  { %5001 = vmatpush1.bf16.msra.mxu1 %v6556_v1  ;;  %5193 = vmatpush1.bf16.msra.mxu0 %v6556_v1  ;;  %v418_v51 = vand.u32 4294901760, %v417_v41  ;;  %v446_v52 = vand.u32 4294901760, %v6288_v5  ;;  %v429_v26 = vsub.f32 %v6283_v3, %v428_v19  ;;  %v458_v23 = vand.u32 4294901760, %v6290_v6 }
  0x3c   :  { %5003 = vmatprep.subr.bf16.mxu1 %v6572_v59  ;;  %5195 = vmatprep.subr.bf16.mxu0 %v6572_v59  ;;  %v452_v33 = vand.u32 4294901760, %v6292_v7  ;;  %v464_v13 = vand.u32 4294901760, %v6301_v12  ;;  %v441_v57 = vsub.f32 %v6286_v4, %v440_v21  ;;  %v470_v20 = vand.u32 4294901760, %v6307_v17 }
  0x3d   :  { %v482_v9 = vand.u32 4294901760, %v6309_v18  ;;  %v476_v29 = vand.u32 4294901760, %v6320_v24  ;;  %v424_v58 = vand.u32 4294901760, %v423_v10  ;;  %v436_v34 = vand.u32 4294901760, %v435_v44 }
  0x3e   :  { %v6669_v28 = vpack.c.bf16 %v434_v30, %v422_v42  ;;  %v488_v11 = vand.u32 4294901760, %v6322_v25  ;;  %v5016_v38 = vpack.c.bf16 %v418_v51, %v406_v46  ;;  %v447_v41 = vsub.f32 %v6288_v5, %v446_v52 }
  0x3f   :  { %5005 = vmatpush1.bf16.msra.mxu1 %v6581_v48  ;;  %5197 = vmatpush1.bf16.msra.mxu0 %v6581_v48  ;;  %v494_v59 = vand.u32 4294901760, %v6330_v31  ;;  %v506_v1 = vand.u32 4294901760, %v6332_v32  ;;  %v430_v10 = vand.u32 4294901760, %v429_v26  ;;  %v459_v42 = vsub.f32 %v6290_v6, %v458_v23 }
  0x40   :  { %5007 = vmatprep.subr.bf16.mxu1 %v6619_v0  ;;  %5199 = vmatprep.subr.bf16.mxu0 %v6619_v0  ;;  %v453_v30 = vsub.f32 %v6292_v7, %v452_v33  ;;  %v465_v44 = vsub.f32 %v6301_v12, %v464_v13  ;;  %v442_v62 = vand.u32 4294901760, %v441_v57  ;;  %v471_v46 = vsub.f32 %v6307_v17, %v470_v20 }
  0x41   :  { %v483_v51 = vsub.f32 %v6309_v18, %v482_v9  ;;  %v477_v48 = vsub.f32 %v6320_v24, %v476_v29  ;;  %v5018_v47 = vpack.c.bf16 %v436_v34, %v424_v58  ;;  %v6685_v5 = vpack.c.bf16 %v440_v21, %v428_v19 }
  0x42   :  { %v489_v4 = vsub.f32 %v6322_v25, %v488_v11  ;;  %v500_v26 = vand.u32 4294901760, %v6336_v35  ;;  %v448_v0 = vand.u32 4294901760, %v447_v41  ;;  %v6691_v12 = vpack.c.bf16 %v458_v23, %v446_v52 }
  0x43   :  { %5009 = vmatpush1.bf16.msra.mxu1 %v6626_v45  ;;  %5201 = vmatpush1.bf16.msra.mxu0 %v6626_v45  ;;  %v495_v57 = vsub.f32 %v6330_v31, %v494_v59  ;;  %v507_v18 = vsub.f32 %v6332_v32, %v506_v1  ;;  %v460_v58 = vand.u32 4294901760, %v459_v42  ;;  %v454_v19 = vand.u32 4294901760, %v453_v30  ;;  %v10033_v31 = vld [vmem:[#allocation43_spill] sm:$0xff] }
  0x44   :  { %5011 = vmatprep.subr.bf16.mxu1 %v5010_v43  ;;  %5203 = vmatprep.subr.bf16.mxu0 %v5202_v15  ;;  %v466_v21 = vand.u32 4294901760, %v465_v44  ;;  %v512_v34 = vand.u32 4294901760, %v6346_v39  ;;  %v5020_v25 = vpack.c.bf16 %v442_v62, %v430_v10  ;;  %v472_v24 = vand.u32 4294901760, %v471_v46  ;;  %v10050_v32 = vld [vmem:[#allocation67_spill] sm:$0xff] }
  0x45   :  { %v484_v17 = vand.u32 4294901760, %v483_v51  ;;  %v478_v7 = vand.u32 4294901760, %v477_v48  ;;  %v490_v52 = vand.u32 4294901760, %v489_v4  ;;  %v501_v23 = vsub.f32 %v6336_v35, %v500_v26 }
  0x46   :  { %366 = vmatmul.mubr.f32.vlgmr.msra.gmra.mrb[0].mxu1 %v6648_v63  ;;  %1103 = vmatmul.mubr.f32.vlgmr.msra.gmra.mrb[0].mxu0 %v6609_v37  ;;  %v518_v41 = vand.u32 4294901760, %v6358_v49  ;;  %v530_v43 = vand.u32 4294901760, %v6360_v56  ;;  %v5216_v15 = vpack.c.bf16 %v464_v13, %v452_v33  ;;  %v6703_v62 = vpack.c.bf16 %v482_v9, %v470_v20  ;;  %v9981_v33 = vld [vmem:[#allocation40_spill] sm:$0xff]  ;;  %v9982_v9 = vld [vmem:[#allocation42_spill] sm:$0xff] }
  0x47   :  { %5013 = vmatpush1.bf16.msra.mxu1 %v6643_v61  ;;  %5205 = vmatpush1.bf16.msra.mxu0 %v6640_v22  ;;  %v496_v10 = vand.u32 4294901760, %v495_v57  ;;  %v508_v48 = vand.u32 4294901760, %v507_v18  ;;  %v5022_v4 = vpack.c.bf16 %v460_v58, %v448_v0  ;;  %v5024_v42 = vpack.c.bf16 %v466_v21, %v454_v19  ;;  %v9985_v19 = vld [vmem:[#allocation46_spill] sm:$0xff]  ;;  %v9989_v37 = vld [vmem:[#allocation52_spill] sm:$0xff] }
  0x48   :  { %5015 = vmatprep.subr.bf16.mxu1 %v6656_v16  ;;  %5207 = vmatprep.subr.bf16.mxu0 %v6645_v55  ;;  %v513_v30 = vsub.f32 %v6346_v39, %v512_v34  ;;  %v524_v44 = vand.u32 4294901760, %v6370_v8  ;;  %v5026_v46 = vpack.c.bf16 %v484_v17, %v472_v24  ;;  %v6709_v51 = vpack.c.bf16 %v488_v11, %v476_v29  ;;  %v9983_v11 = vld [vmem:[#allocation43_spill] sm:$0xff]  ;;  %v10049_v39 = vld [vmem:[#allocation66_spill] sm:$0xff] }
  0x49   :  { %v6711_v61 = vpack.c.bf16 %v506_v1, %v494_v59  ;;  %v536_v22 = vand.u32 4294901760, %v6378_v14  ;;  %757 = vmatprep.mubr.f32.mxu1 %v6538_v36  ;;  %v6715_v18 = vpack.c.bf16 %v490_v52, %v478_v7  ;;  %v502_v16 = vand.u32 4294901760, %v501_v23  ;;  %1366 = vmatprep.mubr.f32.mxu0 %v6538_v36  ;;  %v9980_v59 = vld [vmem:[#allocation38_spill] sm:$0xff] }
  0x4a   :  { %v519_v55 = vsub.f32 %v6358_v49, %v518_v41  ;;  %v531_v0 = vsub.f32 %v6360_v56, %v530_v43  ;;  %v6721_v17 = vpack.c.bf16 %v508_v48, %v496_v10  ;;  %v6723_v24 = vpack.c.bf16 %v512_v34, %v500_v26  ;;  %v9984_v26 = vld [vmem:[#allocation45_spill] sm:$0xff]  ;;  %v9990_v56 = vld [vmem:[#allocation54_spill] sm:$0xff] }
  0x4b   :  { %5017 = vmatpush1.bf16.msra.mxu1 %v5016_v38  ;;  %5209 = vmatpush1.bf16.msra.mxu0 %v6650_v27  ;;  %v542_v1 = vand.u32 4294901760, %v9980_v59  ;;  %v554_v13 = vand.u32 4294901760, %v9981_v33  ;;  %v514_v7 = vand.u32 4294901760, %v513_v30  ;;  %v525_v20 = vsub.f32 %v6370_v8, %v524_v44 }
  0x4c   :  { %5019 = vmatprep.subr.bf16.mxu1 %v5018_v47  ;;  %5211 = vmatprep.subr.bf16.mxu0 %v6669_v28  ;;  %v548_v29 = vand.u32 4294901760, %v9982_v9  ;;  %v560_v38 = vand.u32 4294901760, %v9983_v11  ;;  %v6731_v57 = vpack.c.bf16 %v530_v43, %v518_v41  ;;  %v537_v27 = vsub.f32 %v6378_v14, %v536_v22  ;;  %v9986_v47 = vld [vmem:[#allocation48_spill] sm:$0xff]  ;;  %v9987_v28 = vld [vmem:[#allocation49_spill] sm:$0xff]  ;;  %v9988_v43 = vld [vmem:[#allocation51_spill] sm:$0xff] }
  0x4d   :  { %v566_v58 = vand.u32 4294901760, %v9984_v26  ;;  %v578_v21 = vand.u32 4294901760, %v9985_v19  ;;  %v520_v34 = vand.u32 4294901760, %v519_v55  ;;  %v532_v52 = vand.u32 4294901760, %v531_v0 }
  0x4e   :  { %v572_v23 = vand.u32 4294901760, %v9986_v47  ;;  %v584_v10 = vand.u32 4294901760, %v9987_v28  ;;  %v543_v48 = vsub.f32 %v9980_v59, %v542_v1  ;;  %v555_v41 = vsub.f32 %v9981_v33, %v554_v13 }
  0x4f   :  { %5021 = vmatpush1.bf16.msra.mxu1 %v5020_v25  ;;  %5213 = vmatpush1.bf16.msra.mxu0 %v6685_v5  ;;  %v590_v30 = vand.u32 4294901760, %v9988_v43  ;;  %v602_v63 = vand.u32 4294901760, %v9989_v37  ;;  %v5032_v55 = vpack.c.bf16 %v514_v7, %v502_v16  ;;  %v526_v0 = vand.u32 4294901760, %v525_v20 }
  0x50   :  { %5023 = vmatprep.subr.bf16.mxu1 %v5022_v4  ;;  %5215 = vmatprep.subr.bf16.mxu0 %v6691_v12  ;;  %v549_v45 = vsub.f32 %v9982_v9, %v548_v29  ;;  %v561_v36 = vsub.f32 %v9983_v11, %v560_v38  ;;  %v538_v25 = vand.u32 4294901760, %v537_v27  ;;  %v6746_v14 = vpack.c.bf16 %v536_v22, %v524_v44 }
  0x51   :  { %v567_v5 = vsub.f32 %v9984_v26, %v566_v58  ;;  %v579_v33 = vsub.f32 %v9985_v19, %v578_v21  ;;  %v5034_v59 = vpack.c.bf16 %v532_v52, %v520_v34  ;;  %v573_v8 = vsub.f32 %v9986_v47, %v572_v23  ;;  %v9991_v52 = vld [vmem:[#allocation55_spill] sm:$0xff] }
  0x52   :  { %v585_v4 = vsub.f32 %v9987_v28, %v584_v10  ;;  %v596_v12 = vand.u32 4294901760, %v9990_v56  ;;  %v544_v16 = vand.u32 4294901760, %v543_v48  ;;  %v556_v7 = vand.u32 4294901760, %v555_v41 }
  0x53   :  { %5025 = vmatpush1.bf16.msra.mxu1 %v5024_v42  ;;  %5217 = vmatpush1.bf16.msra.mxu0 %v5216_v15  ;;  %v591_v20 = vsub.f32 %v9988_v43, %v590_v30  ;;  %v603_v44 = vsub.f32 %v9989_v37, %v602_v63  ;;  %v5230_v22 = vpack.c.bf16 %v554_v13, %v542_v1  ;;  %v550_v27 = vand.u32 4294901760, %v549_v45  ;;  %v9992_v43 = vld [vmem:[#allocation57_spill] sm:$0xff] }
  0x54   :  { %5027 = vmatprep.subr.bf16.mxu1 %v5026_v46  ;;  %5219 = vmatprep.subr.bf16.mxu0 %v6703_v62  ;;  %v562_v34 = vand.u32 4294901760, %v561_v36  ;;  %v608_v47 = vand.u32 4294901760, %v9991_v52  ;;  %v5036_v19 = vpack.c.bf16 %v538_v25, %v526_v0  ;;  %v6757_v28 = vpack.c.bf16 %v560_v38, %v548_v29  ;;  %v9993_v46 = vld [vmem:[#allocation58_spill] sm:$0xff]  ;;  %v9994_v29 = vld [vmem:[#allocation60_spill] sm:$0xff] }
  0x55   :  { %v568_v26 = vand.u32 4294901760, %v567_v5  ;;  %v580_v42 = vand.u32 4294901760, %v579_v33  ;;  %v574_v15 = vand.u32 4294901760, %v573_v8  ;;  %v586_v48 = vand.u32 4294901760, %v585_v4 }
  0x56   :  { %v597_v41 = vsub.f32 %v9990_v56, %v596_v12  ;;  %v614_v11 = vand.u32 4294901760, %v9992_v43  ;;  %v5038_v62 = vpack.c.bf16 %v556_v7, %v544_v16  ;;  %v592_v45 = vand.u32 4294901760, %v591_v20  ;;  %v9999_v20 = vld [vmem:[#allocation67_spill] sm:$0xff] }
  0x57   :  { %5029 = vmatpush1.bf16.msra.mxu1 %v6715_v18  ;;  %5221 = vmatpush1.bf16.msra.mxu0 %v6709_v51  ;;  %v604_v36 = vand.u32 4294901760, %v603_v44  ;;  %v626_v1 = vand.u32 4294901760, %v9993_v46  ;;  %v5040_v33 = vpack.c.bf16 %v562_v34, %v550_v27  ;;  %v5234_v8 = vpack.c.bf16 %v578_v21, %v566_v58  ;;  %v9995_v51 = vld [vmem:[#allocation61_spill] sm:$0xff]  ;;  %v9996_v58 = vld [vmem:[#allocation63_spill] sm:$0xff] }
  0x58   :  { %5031 = vmatprep.subr.bf16.mxu1 %v6721_v17  ;;  %5223 = vmatprep.subr.bf16.mxu0 %v6711_v61  ;;  %v609_v13 = vsub.f32 %v9991_v52, %v608_v47  ;;  %v620_v38 = vand.u32 4294901760, %v9994_v29  ;;  %v5042_v0 = vpack.c.bf16 %v580_v42, %v568_v26  ;;  %v6768_v25 = vpack.c.bf16 %v584_v10, %v572_v23  ;;  %v10000_v27 = vld [vmem:[#allocation69_spill] sm:$0xff]  ;;  %v10001_v42 = vld [vmem:[#allocation70_spill] sm:$0xff] }
  0x59   :  { %v6770_v18 = vpack.c.bf16 %v602_v63, %v590_v30  ;;  %v632_v5 = vand.u32 4294901760, %v9995_v51  ;;  %v6773_v4 = vpack.c.bf16 %v586_v48, %v574_v15  ;;  %v598_v16 = vand.u32 4294901760, %v597_v41  ;;  %v9997_v63 = vld [vmem:[#allocation64_spill] sm:$0xff]  ;;  %v9998_v30 = vld [vmem:[#allocation66_spill] sm:$0xff] }
  0x5a   :  { %v6775_v7 = vpack.c.bf16 %v608_v47, %v596_v12  ;;  %v615_v61 = vsub.f32 %v9992_v43, %v614_v11  ;;  %v6779_v17 = vpack.c.bf16 %v604_v36, %v592_v45  ;;  %v627_v26 = vsub.f32 %v9993_v46, %v626_v1  ;;  %v10002_v41 = vld [vmem:[#allocation72_spill] sm:$0xff]  ;;  %v10003_v45 = vld [vmem:[#allocation73_spill] sm:$0xff]  ;;  %v10004_v36 = vld [vmem:[#allocation75_spill] sm:$0xff] }
  0x5b   :  { %5033 = vmatpush1.bf16.msra.mxu1 %v5032_v55  ;;  %5225 = vmatpush1.bf16.msra.mxu0 %v6723_v24  ;;  %v638_v21 = vand.u32 4294901760, %v9996_v58  ;;  %v650_v23 = vand.u32 4294901760, %v9997_v63  ;;  %v610_v10 = vand.u32 4294901760, %v609_v13  ;;  %v621_v47 = vsub.f32 %v9994_v29, %v620_v38 }
  0x5c   :  { %5035 = vmatprep.subr.bf16.mxu1 %v5034_v59  ;;  %5227 = vmatprep.subr.bf16.mxu0 %v6731_v57  ;;  %v644_v12 = vand.u32 4294901760, %v9998_v30  ;;  %v656_v55 = vand.u32 4294901760, %v9999_v20  ;;  %v6788_v44 = vpack.c.bf16 %v626_v1, %v614_v11  ;;  %v633_v24 = vsub.f32 %v9995_v51, %v632_v5  ;;  %v10005_v51 = vld [vmem:[#allocation77_spill] sm:$0xff] }
  0x5d   :  { %v662_v34 = vand.u32 4294901760, %v10000_v27  ;;  %v674_v15 = vand.u32 4294901760, %v10001_v42  ;;  %v616_v48 = vand.u32 4294901760, %v615_v61  ;;  %v668_v59 = vand.u32 4294901760, %v10002_v41 }
  0x5e   :  { %v680_v57 = vand.u32 4294901760, %v10003_v45  ;;  %v686_v13 = vand.u32 4294901760, %v10004_v36  ;;  %v628_v29 = vand.u32 4294901760, %v627_v26  ;;  %v639_v11 = vsub.f32 %v9996_v58, %v638_v21 }
  0x5f   :  { %5037 = vmatpush1.bf16.msra.mxu1 %v5036_v19  ;;  %5229 = vmatpush1.bf16.msra.mxu0 %v6746_v14  ;;  %v651_v1 = vsub.f32 %v9997_v63, %v650_v23  ;;  %v698_v46 = vand.u32 4294901760, %v10005_v51  ;;  %v5048_v43 = vpack.c.bf16 %v610_v10, %v598_v16  ;;  %v622_v61 = vand.u32 4294901760, %v621_v47 }
  0x60   :  { %5039 = vmatprep.subr.bf16.mxu1 %v5038_v62  ;;  %5231 = vmatprep.subr.bf16.mxu0 %v5230_v22  ;;  %v645_v52 = vsub.f32 %v9998_v30, %v644_v12  ;;  %v657_v56 = vsub.f32 %v9999_v20, %v656_v55  ;;  %v634_v37 = vand.u32 4294901760, %v633_v24  ;;  %v6802_v9 = vpack.c.bf16 %v632_v5, %v620_v38  ;;  %v10006_v38 = vld [vmem:[#allocation79_spill] sm:$0xff] }
  0x61   :  { %v663_v14 = vsub.f32 %v10000_v27, %v662_v34  ;;  %v675_v19 = vsub.f32 %v10001_v42, %v674_v15  ;;  %v669_v26 = vsub.f32 %v10002_v41, %v668_v59  ;;  %v681_v63 = vsub.f32 %v10003_v45, %v680_v57  ;;  %v10007_v41 = vld [vmem:[#allocation82_spill] sm:$0xff] }
  0x62   :  { %v687_v62 = vsub.f32 %v10004_v36, %v686_v13  ;;  %v699_v22 = vsub.f32 %v10005_v51, %v698_v46  ;;  %v5050_v16 = vpack.c.bf16 %v628_v29, %v616_v48  ;;  %v640_v10 = vand.u32 4294901760, %v639_v11 }
  0x63   :  { %5041 = vmatpush1.bf16.msra.mxu1 %v5040_v33  ;;  %5233 = vmatpush1.bf16.msra.mxu0 %v6757_v28  ;;  %v652_v47 = vand.u32 4294901760, %v651_v1  ;;  %v9537_v5 = vand.u32 4294901760, %v10006_v38  ;;  %v5246_v24 = vpack.c.bf16 %v650_v23, %v638_v21  ;;  %v646_v42 = vand.u32 4294901760, %v645_v52  ;;  %v10013_v1 = vld [vmem:[#allocation10_spill] sm:$0xff] }
  0x64   :  { %5043 = vmatprep.subr.bf16.mxu1 %v5042_v0  ;;  %5235 = vmatprep.subr.bf16.mxu0 %v5234_v8  ;;  %v658_v27 = vand.u32 4294901760, %v657_v56  ;;  %v9536_v20 = vand.u32 4294901760, %v10007_v41  ;;  %v5052_v45 = vpack.c.bf16 %v634_v37, %v622_v61  ;;  %v6813_v30 = vpack.c.bf16 %v656_v55, %v644_v12  ;;  %v10008_v37 = vld [vmem:[#allocation83_spill] sm:$0xff]  ;;  %v10052_v61 = vld [vmem:[#allocation70_spill] sm:$0xff] }
  0x65   :  { %v664_v36 = vand.u32 4294901760, %v663_v14  ;;  %v676_v51 = vand.u32 4294901760, %v675_v19  ;;  %v670_v33 = vand.u32 4294901760, %v669_v26  ;;  %v682_v58 = vand.u32 4294901760, %v681_v63 }
  0x66   :  { %v688_v28 = vand.u32 4294901760, %v687_v62  ;;  %v700_v29 = vand.u32 4294901760, %v699_v22  ;;  %v5054_v0 = vpack.c.bf16 %v652_v47, %v640_v10  ;;  %v6817_v8 = vpack.c.bf16 %v674_v15, %v662_v34  ;;  %v10010_v15 = vld [vmem:[#allocation89_spill] sm:$0xff] }
  0x67   :  { %5045 = vmatpush1.bf16.msra.mxu1 %v6773_v4  ;;  %5237 = vmatpush1.bf16.msra.mxu0 %v6768_v25  ;;  %v6822_v56 = vsub.f32 %v10006_v38, %v9537_v5  ;;  %v9535_v52 = vand.u32 4294901760, %v10008_v37  ;;  %v5056_v21 = vpack.c.bf16 %v658_v27, %v646_v42  ;;  %v6830_v4 = vsub.f32 %v10007_v41, %v9536_v20  ;;  %v10009_v25 = vld [vmem:[#allocation86_spill] sm:$0xff]  ;;  %v10012_v42 = vld [vmem:[#allocation9_spill] sm:$0xff]  ;;  %v10031_v20 = vld [vmem:[#allocation40_spill] sm:$0xff] }
  0x68   :  { %5047 = vmatprep.subr.bf16.mxu1 %v6779_v17  ;;  %5239 = vmatprep.subr.bf16.mxu0 %v6770_v18  ;;  %v9534_v63 = vand.u32 4294901760, %v10009_v25  ;;  %v9533_v23 = vand.u32 4294901760, %v6594_v40  ;;  %v5058_v12 = vpack.c.bf16 %v676_v51, %v664_v36  ;;  %v6834_v55 = vpack.c.bf16 %v680_v57, %v668_v59  ;;  %v10011_v18 = vld [vmem:[#allocation91_spill] sm:$0xff]  ;;  %v10015_v59 = vld [vmem:[#allocation12_spill] sm:$0xff]  ;;  %v10016_v57 = vld [vmem:[#allocation13_spill] sm:$0xff] }
  0x69   :  { %v6836_v34 = vpack.c.bf16 %v698_v46, %v686_v13  ;;  %v9531_v48 = vand.u32 4294901760, %v10010_v15  ;;  %v5060_v17 = vpack.c.bf16 %v682_v58, %v670_v33  ;;  %v6839_v11 = vpack.c.bf16 %v700_v29, %v688_v28  ;;  %v10014_v51 = vld [vmem:[#allocation11_spill] sm:$0xff]  ;;  %v10017_v36 = vld [vmem:[#allocation14_spill] sm:$0xff]  ;;  %v10046_v28 = vld [vmem:[#allocation96_spill] sm:$0xff] }
  0x6a   :  { %v9532_v27 = vand.u32 4294901760, %v10011_v18  ;;  %v694_v14 = vand.u32 4294901760, %v6822_v56  ;;  %v6849_v46 = vsub.f32 %v10008_v37, %v9535_v52  ;;  %v6863_v19 = vsub.f32 %v6594_v40, %v9533_v23  ;;  %v10019_v33 = vld [vmem:[#allocation18_spill] sm:$0xff]  ;;  %v10020_v29 = vld [vmem:[#allocation19_spill] sm:$0xff]  ;;  %v10021_v56 = vld [vmem:[#allocation20_spill] sm:$0xff] }
  0x6b   :  { %5049 = vmatpush1.bf16.msra.mxu1 %v5048_v43  ;;  %5241 = vmatpush1.bf16.msra.mxu0 %v6775_v7  ;;  %v706_v43 = vand.u32 4294901760, %v6830_v4  ;;  %v723_v7 = vsub.f32 %v10009_v25, %v9534_v63  ;;  %v9542_v26 = vand.u32 4294901760, %v6621_v50  ;;  %v729_v62 = vsub.f32 %v10010_v15, %v9531_v48  ;;  %v10032_v5 = vld [vmem:[#allocation42_spill] sm:$0xff]  ;;  %v10051_v10 = vld [vmem:[#allocation69_spill] sm:$0xff] }
  0x6c   :  { %5051 = vmatprep.subr.bf16.mxu1 %v5050_v16  ;;  %5243 = vmatprep.subr.bf16.mxu0 %v6788_v44  ;;  %v10018_v16 = vld [vmem:[#allocation17_spill] sm:$0xff]  ;;  %v6878_v47 = vsub.f32 %v10011_v18, %v9532_v27  ;;  %v712_v22 = vand.u32 4294901760, %v6849_v46  ;;  %v10040_v58 = vld [vmem:[#allocation54_spill] sm:$0xff]  ;;  %v10041_v46 = vld [vmem:[#allocation55_spill] sm:$0xff]  ;;  %v752_v35 = vand.u32 4294901760, %v10046_v28  ;;  %v10058_v27 = vand.u32 4294901760, %v10007_v41 }
  0x6d   :  { %v747_v44 = vsub.f32 %v6621_v50, %v9542_v26  ;;  %v724_v23 = vand.u32 4294901760, %v723_v7  ;;  %v10054_v52 = vld [vmem:[#allocation73_spill] sm:$0xff]  ;;  %v5064_v7 = vpack.c.bf16 %v706_v43, %v694_v14  ;;  %v718_v26 = vand.u32 4294901760, %v6863_v19 }
  0x6e   :  { %v730_v48 = vand.u32 4294901760, %v729_v62  ;;  %v753_v63 = vsub.f32 %v10046_v28, %v752_v35  ;;  %v10059_v43 = vand.u32 4294901760, %v10008_v37  ;;  %v10061_v62 = vand.u32 4294901760, %v6594_v40 }
  0x6f   :  { %5053 = vmatpush1.bf16.msra.mxu1 %v5052_v45  ;;  %5245 = vmatpush1.bf16.msra.mxu0 %v6802_v9  ;;  %v10026_v45 = vld [vmem:[#allocation94_spill] sm:$0xff]  ;;  %v10053_v9 = vld [vmem:[#allocation72_spill] sm:$0xff]  ;;  %v5066_v14 = vpack.c.bf16 %v724_v23, %v712_v22  ;;  %v10064_v22 = vand.u32 4294901760, %v6621_v50 }
  0x70   :  { %5055 = vmatprep.subr.bf16.mxu1 %v5054_v0  ;;  %5247 = vmatprep.subr.bf16.mxu0 %v5246_v24  ;;  %v740_v4 = vand.u32 4294901760, %v10026_v45  ;;  %v10047_v0 = vld [vmem:[#allocation63_spill] sm:$0xff]  ;;  %v10048_v24 = vld [vmem:[#allocation64_spill] sm:$0xff]  ;;  %v5068_v19 = vpack.c.bf16 %v730_v48, %v718_v26  ;;  %v10065_v48 = vpack.c.bf16 %v10013_v1, %v10012_v42  ;;  %v10068_v26 = vpack.c.bf16 %v10015_v59, %v10014_v51  ;;  %v10077_v59 = vld [vmem:[#allocation6_spill] sm:$0xff] }
  0x71   :  { %v10072_v42 = vld [vmem:[#allocation80_spill] sm:$0xff]  ;;  %v10076_v51 = vpack.c.bf16 %v6280_v2, %v6267_v60 }
  0x72   :  { %v741_v13 = vsub.f32 %v10026_v45, %v740_v4  ;;  %v754_v45 = vand.u32 4294901760, %v753_v63  ;;  %v10066_v63 = vld [vmem:[#allocation2_spill] sm:$0xff]  ;;  %v10073_v1 = vld [vmem:[#allocation76_spill] sm:$0xff] }
  0x73   :  { %5057 = vmatpush1.bf16.msra.mxu1 %v5056_v21  ;;  %5249 = vmatpush1.bf16.msra.mxu0 %v6813_v30  ;;  %v10056_v30 = vld [vmem:[#allocation77_spill] sm:$0xff]  ;;  %v10057_v21 = vand.u32 4294901760, %v10006_v38  ;;  %v10081_v60 = vld [vmem:[#allocation8_spill] sm:$0xff] }
  0x74   :  { %5059 = vmatprep.subr.bf16.mxu1 %v5058_v12  ;;  %5251 = vmatprep.subr.bf16.mxu0 %v6817_v8  ;;  %v10060_v8 = vand.u32 4294901760, %v10009_v25  ;;  %v68_v2 = vld [vmem:[%s9389_s1 + $0x190] sm:$0xff] }
  0x75   :  { %v5256_v49 = vpack.c.bf16 %v10058_v27, %v10057_v21  ;;  %v10062_v21 = vand.u32 4294901760, %v10010_v15 }
  0x76   :  { %v5258_v27 = vpack.c.bf16 %v10060_v8, %v10059_v43  ;;  %v10082_v43 = vpack.c.bf16 %v10021_v56, %v10020_v29 }
  0x77   :  { %5061 = vmatpush1.bf16.msra.mxu1 %v5060_v17  ;;  %5253 = vmatpush1.bf16.msra.mxu0 %v6834_v55  ;;  %v736_v17 = vand.u32 4294901760, %v6878_v47  ;;  %v748_v55 = vand.u32 4294901760, %v747_v44  ;;  %v5260_v12 = vpack.c.bf16 %v10062_v21, %v10061_v62  ;;  %v10069_v47 = vld [vmem:[#allocation3_spill] sm:$0xff] }
  0x78   :  { %5063 = vmatprep.subr.bf16.mxu1 %v6839_v11  ;;  %5255 = vmatprep.subr.bf16.mxu0 %v6836_v34  ;;  %v742_v11 = vand.u32 4294901760, %v741_v13  ;;  %v10063_v34 = vand.u32 4294901760, %v10011_v18  ;;  %v10067_v13 = vld [vmem:[#allocation78_spill] sm:$0xff]  ;;  %v23_v62 = vld [vmem:[%s9389_s1 + $0x28] sm:$0xff] }
  0x79   :  { %v5070_v23 = vpack.c.bf16 %v748_v55, %v736_v17  ;;  %v2844_v17 = vand.u32 4294901760, %v68_v2  ;;  %v10084_v21 = vld [vmem:[#allocation23_spill] sm:$0xff] }
  0x7a   :  { %v5262_v8 = vpack.c.bf16 %v10064_v22, %v10063_v34  ;;  %v5072_v44 = vpack.c.bf16 %v754_v45, %v742_v11  ;;  %v10074_v45 = vpack.c.bf16 %v6255_v54, %v6253_v53  ;;  %v118_v53 = vld [vmem:[%s9389_s1 + $0x320] sm:$0xff]  ;;  %v10080_v54 = vpack.c.bf16 %v6290_v6, %v10019_v33  ;;  %v10087_v34 = vld [vmem:[#allocation16_spill] sm:$0xff]  ;;  %v121_v22 = vld [vmem:[%s9389_s1 + $0x338] sm:$0xff] }
  0x7b   :  { %5065 = vmatpush1.bf16.msra.mxu1 %v5064_v7  ;;  %5257 = vmatpush1.bf16.msra.mxu0 %v5256_v49  ;;  %v5264_v49 = vpack.c.bf16 %v752_v35, %v740_v4  ;;  %v10070_v35 = vpack.c.bf16 %v10017_v36, %v10016_v57  ;;  %v10071_v4 = vld [vmem:[#allocation4_spill] sm:$0xff]  ;;  %v10078_v57 = vpack.c.bf16 %v10018_v16, %v6283_v3  ;;  %v10079_v36 = vld [vmem:[#allocation7_spill] sm:$0xff]  ;;  %v114_v16 = vld [vmem:[%s9389_s1 + $0x300] sm:$0xff]  ;;  %v1515_v33 = vand.u32 4294901760, %v118_v53 }
  0x7c   :  { %5067 = vmatprep.subr.bf16.mxu1 %v5066_v14  ;;  %5259 = vmatprep.subr.bf16.mxu0 %v5258_v27  ;;  %v115_v7 = vld [vmem:[%s9389_s1 + $0x308] sm:$0xff]  ;;  %v117_v14 = vld [vmem:[%s9389_s1 + $0x318] sm:$0xff]  ;;  %v10085_v11 = vld [vmem:[#allocation22_spill] sm:$0xff]  ;;  %v1513_v29 = vand.u32 4294901760, %v114_v16 }
  0x7d   :  { %v71_v3 = vld [vmem:[%s9389_s1 + $0x1a8] sm:$0xff]  ;;  %v1511_v6 = vand.u32 4294901760, %v115_v7  ;;  %v1517_v56 = vand.u32 4294901760, %v117_v14 }
  0x7e   :  { %v10083_v27 = vld [vmem:[#allocation15_spill] sm:$0xff]  ;;  %v2847_v55 = vand.u32 4294901760, %v71_v3 }
  0x7f   :  { %5069 = vmatpush1.bf16.msra.mxu1 %v5068_v19  ;;  %5261 = vmatpush1.bf16.msra.mxu0 %v5260_v12  ;;  %v10075_v12 = vld [vmem:[#allocation5_spill] sm:$0xff]  ;;  %v20_v19 = vld [vmem:[%s9389_s1 + $0x10] sm:$0xff] }
  0x80   :  { %5071 = vmatprep.subr.bf16.mxu1 %v5070_v23  ;;  %5263 = vmatprep.subr.bf16.mxu0 %v5262_v8  ;;  %v10086_v23 = vpack.c.bf16 %v10084_v21, %v10085_v11  ;;  %v124_v8 = vld [vmem:[%s9389_s1 + $0x350] sm:$0xff]  ;;  %v7066_v21 = vpack.c.bf16 %v1517_v56, %v1513_v29  ;;  %v26_v11 = vld [vmem:[%s9389_s1 + $0x40] sm:$0xff] }
  0x82   :  { %10102 = vst [vmem:[#allocation9_spill] sm:$0xff] %v7066_v21 }
  0x83   :  { %5073 = vmatpush1.bf16.msra.mxu1 %v5072_v44  ;;  %5265 = vmatpush1.bf16.msra.mxu0 %v5264_v49  ;;  %v7034_v44 = vpack.c.bf16 %v1515_v33, %v1511_v6  ;;  %v7036_v49 = vsub.f32 %v115_v7, %v1511_v6  ;;  %v120_v7 = vld [vmem:[%s9389_s1 + $0x330] sm:$0xff]  ;;  %v10097_v6 = vld [vmem:[#allocation27_spill] sm:$0xff] }
  0x84   :  { %5075 = vmatprep.subr.bf16.mxu1 %v10065_v48  ;;  %5267 = vmatprep.subr.bf16.mxu0 %v10066_v63  ;;  %v2796_v48 = vand.u32 4294901760, %v20_v19  ;;  %v2799_v63 = vand.u32 4294901760, %v23_v62 }
  0x85   :  { %10088 = vst [vmem:[#allocation79_spill] sm:$0xff] %v7034_v44  ;;  %10089 = vst [vmem:[#allocation82_spill] sm:$0xff] %v7036_v49 }
  0x86   :  { %759 = vmatmul.mubr.f32.vlgmr.msra.gmra.mrb[0].mxu1 %v10067_v13  ;;  %1368 = vmatmul.mubr.f32.vlgmr.msra.gmra.mrb[0].mxu0 %v10067_v13 }
  0x87   :  { %5077 = vmatpush1.bf16.msra.mxu1 %v10068_v26  ;;  %5269 = vmatpush1.bf16.msra.mxu0 %v10069_v47  ;;  %v74_v26 = vld [vmem:[%s9389_s1 + $0x1c0] sm:$0xff]  ;;  %v77_v47 = vld [vmem:[%s9389_s1 + $0x1d8] sm:$0xff] }
  0x88   :  { %5079 = vmatprep.subr.bf16.mxu1 %v10070_v35  ;;  %5271 = vmatprep.subr.bf16.mxu0 %v10071_v4  ;;  %v10090_v35 = vld [vmem:[#allocation26_spill] sm:$0xff]  ;;  %v10091_v4 = vld [vmem:[#allocation25_spill] sm:$0xff] }
  0x89   :  { %959 = vmatprep.mubr.f32.mxu1 %v10072_v42  ;;  %1503 = vmatprep.mubr.f32.mxu0 %v10073_v1  ;;  %v83_v42 = vld [vmem:[%s9389_s1 + $0x208] sm:$0xff] }
  0x8a   :  { %v10127_v1 = vld [vmem:[#allocation35_spill] sm:$0xff] }
  0x8b   :  { %5081 = vmatpush1.bf16.msra.mxu1 %v10074_v45  ;;  %5273 = vmatpush1.bf16.msra.mxu0 %v10075_v12  ;;  %v10092_v45 = vpack.c.bf16 %v10090_v35, %v10091_v4  ;;  %v10093_v12 = vld [vmem:[#allocation21_spill] sm:$0xff]  ;;  %v7076_v35 = vsub.f32 %v117_v14, %v1517_v56  ;;  %v2850_v4 = vand.u32 4294901760, %v74_v26 }
  0x8c   :  { %5083 = vmatprep.subr.bf16.mxu1 %v10076_v51  ;;  %5275 = vmatprep.subr.bf16.mxu0 %v10077_v59  ;;  %v7048_v51 = vsub.f32 %v118_v53, %v1515_v33  ;;  %v7050_v59 = vpack.c.bf16 %v2847_v55, %v2844_v17  ;;  %v7062_v53 = vsub.f32 %v68_v2, %v2844_v17  ;;  %v1521_v17 = vand.u32 4294901760, %v120_v7  ;;  %v10110_v56 = vld [vmem:[#allocation29_spill] sm:$0xff] }
  0x8d   :  { %v7064_v33 = vsub.f32 %v71_v3, %v2847_v55  ;;  %10104 = vst [vmem:[#allocation11_spill] sm:$0xff] %v7076_v35  ;;  %v7078_v2 = vpack.c.bf16 %v2799_v63, %v2796_v48  ;;  %v7080_v3 = vsub.f32 %v20_v19, %v2796_v48  ;;  %v2802_v48 = vand.u32 4294901760, %v26_v11  ;;  %v10113_v35 = vld [vmem:[#allocation34_spill] sm:$0xff] }
  0x8e   :  { %10094 = vst [vmem:[#allocation83_spill] sm:$0xff] %v7048_v51  ;;  %10095 = vst [vmem:[#allocation86_spill] sm:$0xff] %v7050_v59  ;;  %v129_v51 = vld [vmem:[%s9389_s1 + $0x378] sm:$0xff] }
  0x8f   :  { %5085 = vmatpush1.bf16.msra.mxu1 %v10078_v57  ;;  %5277 = vmatpush1.bf16.msra.mxu0 %v10079_v36  ;;  %v1519_v57 = vand.u32 4294901760, %v121_v22  ;;  %v1523_v36 = vand.u32 4294901760, %v124_v8  ;;  %10100 = vst [vmem:[#allocation89_spill] sm:$0xff] %v7062_v53  ;;  %10101 = vst [vmem:[#allocation91_spill] sm:$0xff] %v7064_v33  ;;  %v7150_v21 = vsub.f32 %v26_v11, %v2802_v48  ;;  %v132_v11 = vld [vmem:[%s9389_s1 + $0x390] sm:$0xff] }
  0x90   :  { %5087 = vmatprep.subr.bf16.mxu1 %v10080_v54  ;;  %5279 = vmatprep.subr.bf16.mxu0 %v10081_v60  ;;  %v123_v54 = vld [vmem:[%s9389_s1 + $0x348] sm:$0xff]  ;;  %v10096_v60 = vld [vmem:[#allocation28_spill] sm:$0xff]  ;;  %10105 = vst [vmem:[#allocation12_spill] sm:$0xff] %v7078_v2  ;;  %10106 = vst [vmem:[#allocation13_spill] sm:$0xff] %v7080_v3 }
  0x91   :  { %v1525_v55 = vand.u32 4294901760, %v123_v54  ;;  %v7094_v19 = vpack.c.bf16 %v1523_v36, %v1519_v57  ;;  %v10132_v2 = vld [vmem:[#allocation39_spill] sm:$0xff]  ;;  %10133 = vst [vmem:[#allocation63_spill] sm:$0xff] %v7150_v21 }
  0x93   :  { %5089 = vmatpush1.bf16.msra.mxu1 %v10082_v43  ;;  %5281 = vmatpush1.bf16.msra.mxu0 %v10083_v27  ;;  %v10098_v43 = vpack.c.bf16 %v10096_v60, %v10097_v6  ;;  %v10099_v27 = vld [vmem:[#allocation24_spill] sm:$0xff]  ;;  %v130_v60 = vld [vmem:[%s9389_s1 + $0x380] sm:$0xff]  ;;  %v7092_v6 = vsub.f32 %v23_v62, %v2799_v63  ;;  %10112 = vst [vmem:[#allocation17_spill] sm:$0xff] %v7094_v19 }
  0x94   :  { %5091 = vmatprep.subr.bf16.mxu1 %v10086_v23  ;;  %5283 = vmatprep.subr.bf16.mxu0 %v10087_v34  ;;  %v29_v23 = vld [vmem:[%s9389_s1 + $0x58] sm:$0xff]  ;;  %v7074_v34 = vsub.f32 %v114_v16, %v1513_v29  ;;  %v10107_v16 = vld [vmem:[#allocation31_spill] sm:$0xff]  ;;  %v10108_v29 = vld [vmem:[#allocation30_spill] sm:$0xff]  ;;  %v7106_v62 = vsub.f32 %v121_v22, %v1519_v57  ;;  %v7108_v63 = vsub.f32 %v124_v8, %v1523_v36 }
  0x95   :  { %v10109_v14 = vpack.c.bf16 %v10107_v16, %v10108_v29  ;;  %10111 = vst [vmem:[#allocation14_spill] sm:$0xff] %v7092_v6  ;;  %v10116_v29 = vld [vmem:[#allocation32_spill] sm:$0xff]  ;;  %v35_v8 = vld [vmem:[%s9389_s1 + $0x88] sm:$0xff]  ;;  %v7130_v57 = vsub.f32 %v120_v7, %v1521_v17 }
  0x96   :  { %10103 = vst [vmem:[#allocation10_spill] sm:$0xff] %v7074_v34  ;;  %v10114_v34 = vld [vmem:[#allocation33_spill] sm:$0xff]  ;;  %10117 = vst [vmem:[#allocation18_spill] sm:$0xff] %v7106_v62  ;;  %v32_v22 = vld [vmem:[%s9389_s1 + $0x70] sm:$0xff] }
  0x97   :  { %5093 = vmatpush1.bf16.msra.mxu1 %v10092_v45  ;;  %5285 = vmatpush1.bf16.msra.mxu0 %v10093_v12  ;;  %v2853_v45 = vand.u32 4294901760, %v77_v47  ;;  %v127_v12 = vld [vmem:[%s9389_s1 + $0x368] sm:$0xff]  ;;  %v10115_v16 = vpack.c.bf16 %v10113_v35, %v10114_v34  ;;  %10118 = vst [vmem:[#allocation19_spill] sm:$0xff] %v7108_v63  ;;  %10123 = vst [vmem:[#allocation54_spill] sm:$0xff] %v7130_v57  ;;  %v10125_v63 = vld [vmem:[#allocation36_spill] sm:$0xff]  ;;  %v1533_v57 = vand.u32 4294901760, %v129_v51 }
  0x98   :  { %5095 = vmatprep.subr.bf16.mxu1 %v10098_v43  ;;  %5287 = vmatprep.subr.bf16.mxu0 %v10099_v27  ;;  %v2805_v43 = vand.u32 4294901760, %v29_v23  ;;  %v80_v27 = vld [vmem:[%s9389_s1 + $0x1f0] sm:$0xff]  ;;  %v1527_v35 = vand.u32 4294901760, %v127_v12 }
  0x99   :  { %v7118_v49 = vpack.c.bf16 %v2853_v45, %v2850_v4  ;;  %v7120_v34 = vsub.f32 %v77_v47, %v2853_v45  ;;  %v2856_v36 = vand.u32 4294901760, %v80_v27  ;;  %v133_v47 = vld [vmem:[%s9389_s1 + $0x398] sm:$0xff] }
  0x9a   :  { %v10124_v45 = vld [vmem:[#allocation37_spill] sm:$0xff]  ;;  %v7144_v7 = vpack.c.bf16 %v2805_v43, %v2802_v48  ;;  %v7152_v13 = vsub.f32 %v29_v23, %v2805_v43  ;;  %v135_v23 = vld [vmem:[%s9389_s1 + $0x3a8] sm:$0xff] }
  0x9b   :  { %5097 = vmatpush1.bf16.msra.mxu1 %v10109_v14  ;;  %5289 = vmatpush1.bf16.msra.mxu0 %v10110_v56  ;;  %v7110_v14 = vsub.f32 %v74_v26, %v2850_v4  ;;  %v126_v56 = vld [vmem:[%s9389_s1 + $0x360] sm:$0xff]  ;;  %10120 = vst [vmem:[#allocation40_spill] sm:$0xff] %v7118_v49  ;;  %10121 = vst [vmem:[#allocation42_spill] sm:$0xff] %v7120_v34  ;;  %v7128_v26 = vpack.c.bf16 %v1525_v55, %v1521_v17  ;;  %v136_v4 = vld [vmem:[%s9389_s1 + $0x3b0] sm:$0xff] }
  0x9c   :  { %5099 = vmatprep.subr.bf16.mxu1 %v10115_v16  ;;  %5291 = vmatprep.subr.bf16.mxu0 %v10116_v29  ;;  %v1531_v16 = vand.u32 4294901760, %v130_v60  ;;  %v2859_v29 = vand.u32 4294901760, %v83_v42  ;;  %v10126_v62 = vpack.c.bf16 %v10124_v45, %v10125_v63  ;;  %v7142_v49 = vsub.f32 %v123_v54, %v1525_v55  ;;  %10129 = vst [vmem:[#allocation96_spill] sm:$0xff] %v7144_v7  ;;  %v89_v54 = vld [vmem:[%s9389_s1 + $0x238] sm:$0xff] }
  0x9d   :  { %10119 = vst [vmem:[#allocation20_spill] sm:$0xff] %v7110_v14  ;;  %10122 = vst [vmem:[#allocation43_spill] sm:$0xff] %v7128_v26  ;;  %v1529_v17 = vand.u32 4294901760, %v126_v56  ;;  %v10130_v26 = vld [vmem:[#allocation38_spill] sm:$0xff]  ;;  %v2808_v63 = vand.u32 4294901760, %v32_v22  ;;  %v2865_v7 = vand.u32 4294901760, %v89_v54 }
  0x9e   :  { %10128 = vst [vmem:[#allocation55_spill] sm:$0xff] %v7142_v49  ;;  %v10131_v19 = vpack.c.bf16 %v10031_v20, %v10130_v26  ;;  %10134 = vst [vmem:[#allocation64_spill] sm:$0xff] %v7152_v13  ;;  %v7160_v55 = vpack.c.bf16 %v1531_v16, %v1527_v35  ;;  %v7162_v20 = vsub.f32 %v127_v12, %v1527_v35  ;;  %v10142_v35 = vld [vmem:[#allocation41_spill] sm:$0xff] }
  0x9f   :  { %5101 = vmatpush1.bf16.msra.mxu1 %v10126_v62  ;;  %5293 = vmatpush1.bf16.msra.mxu0 %v10127_v1  ;;  %v2811_v62 = vand.u32 4294901760, %v35_v8  ;;  %v86_v1 = vld [vmem:[%s9389_s1 + $0x220] sm:$0xff]  ;;  %v7170_v48 = vsub.f32 %v130_v60, %v1531_v16  ;;  %v7172_v43 = vpack.c.bf16 %v2859_v29, %v2856_v36  ;;  %v7174_v26 = vsub.f32 %v80_v27, %v2856_v36  ;;  %v10146_v16 = vld [vmem:[#allocation45_spill] sm:$0xff] }
  0xa0   :  { %5103 = vmatprep.subr.bf16.mxu1 %v10131_v19  ;;  %5295 = vmatprep.subr.bf16.mxu0 %v10132_v2  ;;  %10135 = vst [vmem:[#allocation66_spill] sm:$0xff] %v7160_v55  ;;  %10136 = vst [vmem:[#allocation67_spill] sm:$0xff] %v7162_v20  ;;  %v1535_v19 = vand.u32 4294901760, %v133_v47  ;;  %v1539_v2 = vand.u32 4294901760, %v136_v4  ;;  %v7176_v45 = vsub.f32 %v83_v42, %v2859_v29  ;;  %v2862_v55 = vand.u32 4294901760, %v86_v1  ;;  %v38_v60 = vld [vmem:[%s9389_s1 + $0xa0] sm:$0xff] }
  0xa1   :  { %10137 = vst [vmem:[#allocation69_spill] sm:$0xff] %v7170_v48  ;;  %10138 = vst [vmem:[#allocation70_spill] sm:$0xff] %v7172_v43  ;;  %v10141_v12 = vpack.c.bf16 %v10033_v31, %v10032_v5  ;;  %v7182_v20 = vpack.c.bf16 %v1533_v57, %v1529_v17  ;;  %v7184_v49 = vsub.f32 %v126_v56, %v1529_v17  ;;  %v41_v42 = vld [vmem:[%s9389_s1 + $0xb8] sm:$0xff]  ;;  %v10145_v27 = vld [vmem:[#allocation46_spill] sm:$0xff]  ;;  %v1537_v29 = vand.u32 4294901760, %v132_v11 }
  0xa2   :  { %10139 = vst [vmem:[#allocation72_spill] sm:$0xff] %v7174_v26  ;;  %10140 = vst [vmem:[#allocation73_spill] sm:$0xff] %v7176_v45  ;;  %v10147_v31 = vpack.c.bf16 %v10145_v27, %v10146_v16  ;;  %v10148_v5 = vld [vmem:[#allocation44_spill] sm:$0xff]  ;;  %v7196_v36 = vsub.f32 %v129_v51, %v1533_v57  ;;  %v7198_v56 = vpack.c.bf16 %v2811_v62, %v2808_v63  ;;  %v1541_v17 = vand.u32 4294901760, %v135_v23  ;;  %v145_v43 = vld [vmem:[%s9389_s1 + $0x3f8] sm:$0xff] }
  0xa3   :  { %5105 = vmatpush1.bf16.msra.mxu1 %v10141_v12  ;;  %5297 = vmatpush1.bf16.msra.mxu0 %v10142_v35  ;;  %10143 = vst [vmem:[#allocation77_spill] sm:$0xff] %v7182_v20  ;;  %10144 = vst [vmem:[#allocation2_spill] sm:$0xff] %v7184_v49  ;;  %v139_v12 = vld [vmem:[%s9389_s1 + $0x3c8] sm:$0xff]  ;;  %v142_v35 = vld [vmem:[%s9389_s1 + $0x3e0] sm:$0xff]  ;;  %v7206_v49 = vsub.f32 %v32_v22, %v2808_v63  ;;  %v7208_v27 = vsub.f32 %v35_v8, %v2811_v62  ;;  %v2817_v48 = vand.u32 4294901760, %v41_v42 }
  0xa4   :  { %5107 = vmatprep.subr.bf16.mxu1 %v10147_v31  ;;  %5299 = vmatprep.subr.bf16.mxu0 %v10148_v5  ;;  %10149 = vst [vmem:[#allocation3_spill] sm:$0xff] %v7196_v36  ;;  %10150 = vst [vmem:[#allocation4_spill] sm:$0xff] %v7198_v56  ;;  %v7210_v16 = vpack.c.bf16 %v1539_v2, %v1535_v19  ;;  %v7212_v51 = vsub.f32 %v133_v47, %v1535_v19  ;;  %v92_v57 = vld [vmem:[%s9389_s1 + $0x250] sm:$0xff]  ;;  %v2814_v36 = vand.u32 4294901760, %v38_v60  ;;  %v95_v22 = vld [vmem:[%s9389_s1 + $0x268] sm:$0xff] }
  0xa5   :  { %10151 = vst [vmem:[#allocation5_spill] sm:$0xff] %v7206_v49  ;;  %10152 = vst [vmem:[#allocation6_spill] sm:$0xff] %v7208_v27  ;;  %v7217_v31 = vsub.f32 %v136_v4, %v1539_v2  ;;  %v7219_v5 = vsub.f32 %v86_v1, %v2862_v55  ;;  %v138_v8 = vld [vmem:[%s9389_s1 + $0x3c0] sm:$0xff]  ;;  %v141_v47 = vld [vmem:[%s9389_s1 + $0x3d8] sm:$0xff]  ;;  %v7234_v19 = vpack.c.bf16 %v2865_v7, %v2862_v55 }
  0xa6   :  { %10153 = vst [vmem:[#allocation7_spill] sm:$0xff] %v7210_v16  ;;  %10154 = vst [vmem:[#allocation8_spill] sm:$0xff] %v7212_v51  ;;  %v10157_v63 = vld [vmem:[#allocation49_spill] sm:$0xff]  ;;  %v10158_v62 = vld [vmem:[#allocation48_spill] sm:$0xff]  ;;  %v7236_v2 = vsub.f32 %v89_v54, %v2865_v7  ;;  %v1547_v51 = vand.u32 4294901760, %v142_v35  ;;  %v7248_v55 = vpack.c.bf16 %v1541_v17, %v1537_v29  ;;  %v7250_v7 = vsub.f32 %v132_v11, %v1537_v29 }
  0xa7   :  { %10155 = vst [vmem:[#allocation15_spill] sm:$0xff] %v7217_v31  ;;  %10156 = vst [vmem:[#allocation23_spill] sm:$0xff] %v7219_v5  ;;  %v10159_v4 = vpack.c.bf16 %v10157_v63, %v10158_v62  ;;  %v10160_v1 = vld [vmem:[#allocation47_spill] sm:$0xff]  ;;  %v1543_v31 = vand.u32 4294901760, %v139_v12  ;;  %v44_v16 = vld [vmem:[%s9389_s1 + $0xd0] sm:$0xff]  ;;  %v7252_v54 = vsub.f32 %v135_v23, %v1541_v17  ;;  %v10172_v23 = vpack.c.bf16 %v10041_v46, %v10040_v58 }
  0xa8   :  { %5301 = vmatpush1.bf16.msra.mxu0 %v10160_v1  ;;  %10161 = vst [vmem:[#allocation22_spill] sm:$0xff] %v7234_v19  ;;  %10162 = vst [vmem:[#allocation16_spill] sm:$0xff] %v7236_v2  ;;  %v47_v56 = vld [vmem:[%s9389_s1 + $0xe8] sm:$0xff]  ;;  %v10163_v20 = vld [vmem:[#allocation52_spill] sm:$0xff]  ;;  %v2871_v1 = vand.u32 4294901760, %v95_v22  ;;  %v1545_v19 = vand.u32 4294901760, %v138_v8 }
  0xa9   :  { %5109 = vmatpush1.bf16.msra.mxu1 %v10159_v4  ;;  %v10164_v5 = vld [vmem:[#allocation51_spill] sm:$0xff]  ;;  %v10166_v62 = vld [vmem:[#allocation50_spill] sm:$0xff]  ;;  %10167 = vst [vmem:[#allocation26_spill] sm:$0xff] %v7248_v55  ;;  %10168 = vst [vmem:[#allocation25_spill] sm:$0xff] %v7250_v7  ;;  %v2868_v4 = vand.u32 4294901760, %v92_v57  ;;  %v1549_v2 = vand.u32 4294901760, %v141_v47  ;;  %v7272_v7 = vsub.f32 %v139_v12, %v1543_v31 }
  0xaa   :  { %v10165_v63 = vpack.c.bf16 %v10163_v20, %v10164_v5  ;;  %5303 = vmatprep.subr.bf16.mxu0 %v10166_v62  ;;  %10169 = vst [vmem:[#allocation21_spill] sm:$0xff] %v7252_v54  ;;  %v148_v20 = vld [vmem:[%s9389_s1 + $0x410] sm:$0xff]  ;;  %v7260_v5 = vpack.c.bf16 %v2817_v48, %v2814_v36  ;;  %v2820_v11 = vand.u32 4294901760, %v44_v16  ;;  %v2823_v29 = vand.u32 4294901760, %v47_v56  ;;  %v10173_v17 = vld [vmem:[#allocation53_spill] sm:$0xff] }
  0xab   :  { %v7268_v62 = vsub.f32 %v41_v42, %v2817_v48  ;;  %v7270_v54 = vpack.c.bf16 %v1547_v51, %v1543_v31  ;;  %10176 = vst [vmem:[#allocation30_spill] sm:$0xff] %v7272_v7  ;;  %v10178_v55 = vld [vmem:[#allocation57_spill] sm:$0xff]  ;;  %v10180_v46 = vld [vmem:[#allocation56_spill] sm:$0xff]  ;;  %v7284_v48 = vsub.f32 %v142_v35, %v1547_v51  ;;  %v7286_v42 = vsub.f32 %v92_v57, %v2868_v4  ;;  %v50_v51 = vld [vmem:[%s9389_s1 + $0x100] sm:$0xff] }
  0xac   :  { %5111 = vmatprep.subr.bf16.mxu1 %v10165_v63  ;;  %10170 = vst [vmem:[#allocation28_spill] sm:$0xff] %v7260_v5  ;;  %v7262_v63 = vsub.f32 %v38_v60, %v2814_v36  ;;  %5305 = vmatpush1.bf16.msra.mxu0 %v10173_v17  ;;  %v98_v5 = vld [vmem:[%s9389_s1 + $0x280] sm:$0xff]  ;;  %v101_v60 = vld [vmem:[%s9389_s1 + $0x298] sm:$0xff]  ;;  %v1551_v12 = vand.u32 4294901760, %v145_v43  ;;  %v1555_v31 = vand.u32 4294901760, %v148_v20  ;;  %v147_v17 = vld [vmem:[%s9389_s1 + $0x408] sm:$0xff]  ;;  %v7294_v7 = vpack.c.bf16 %v2871_v1, %v2868_v4 }
  0xad   :  { %5113 = vmatpush1.bf16.msra.mxu1 %v10172_v23  ;;  %10174 = vst [vmem:[#allocation24_spill] sm:$0xff] %v7268_v62  ;;  %10175 = vst [vmem:[#allocation31_spill] sm:$0xff] %v7270_v54  ;;  %v10177_v36 = vld [vmem:[#allocation58_spill] sm:$0xff]  ;;  %5307 = vmatprep.subr.bf16.mxu0 %v10180_v46  ;;  %v144_v23 = vld [vmem:[%s9389_s1 + $0x3f0] sm:$0xff]  ;;  %v7300_v35 = vsub.f32 %v138_v8, %v1545_v19  ;;  %v7310_v46 = vpack.c.bf16 %v2823_v29, %v2820_v11  ;;  %v2874_v4 = vand.u32 4294901760, %v98_v5 }
  0xae   :  { %10171 = vst [vmem:[#allocation27_spill] sm:$0xff] %v7262_v63  ;;  %v10179_v58 = vpack.c.bf16 %v10177_v36, %v10178_v55  ;;  %10181 = vst [vmem:[#allocation29_spill] sm:$0xff] %v7284_v48  ;;  %v7296_v55 = vsub.f32 %v95_v22, %v2871_v1  ;;  %v7298_v36 = vpack.c.bf16 %v1549_v2, %v1545_v19  ;;  %v53_v57 = vld [vmem:[%s9389_s1 + $0x118] sm:$0xff]  ;;  %v2877_v48 = vand.u32 4294901760, %v101_v60  ;;  %v151_v22 = vld [vmem:[%s9389_s1 + $0x428] sm:$0xff] }
  0xaf   :  { %10182 = vst [vmem:[#allocation34_spill] sm:$0xff] %v7286_v42  ;;  %10183 = vst [vmem:[#allocation33_spill] sm:$0xff] %v7294_v7  ;;  %v154_v8 = vld [vmem:[%s9389_s1 + $0x440] sm:$0xff]  ;;  %v10189_v19 = vld [vmem:[#allocation61_spill] sm:$0xff] }
  0xb0   :  { %5115 = vmatprep.subr.bf16.mxu1 %v10179_v58  ;;  %10184 = vst [vmem:[#allocation32_spill] sm:$0xff] %v7296_v55  ;;  %10185 = vst [vmem:[#allocation37_spill] sm:$0xff] %v7298_v36  ;;  %v7308_v58 = vsub.f32 %v141_v47, %v1549_v2  ;;  %v10190_v1 = vld [vmem:[#allocation60_spill] sm:$0xff]  ;;  %v10192_v36 = vld [vmem:[#allocation59_spill] sm:$0xff]  ;;  %v7322_v47 = vsub.f32 %v44_v16, %v2820_v11  ;;  %v7324_v2 = vsub.f32 %v47_v56, %v2823_v29 }
  0xb1   :  { %10186 = vst [vmem:[#allocation36_spill] sm:$0xff] %v7300_v35  ;;  %10188 = vst [vmem:[#allocation38_spill] sm:$0xff] %v7310_v46  ;;  %v10191_v35 = vpack.c.bf16 %v10189_v19, %v10190_v1  ;;  %5309 = vmatpush1.bf16.msra.mxu0 %v10192_v36  ;;  %v1557_v46 = vand.u32 4294901760, %v147_v17  ;;  %v104_v55 = vld [vmem:[%s9389_s1 + $0x2b0] sm:$0xff]  ;;  %v107_v42 = vld [vmem:[%s9389_s1 + $0x2c8] sm:$0xff]  ;;  %v10195_v19 = vpack.c.bf16 %v10048_v24, %v10047_v0  ;;  %v2826_v11 = vand.u32 4294901760, %v50_v51 }
  0xb2   :  { %10187 = vst [vmem:[#allocation35_spill] sm:$0xff] %v7308_v58  ;;  %10193 = vst [vmem:[#allocation39_spill] sm:$0xff] %v7322_v47  ;;  %v1553_v58 = vand.u32 4294901760, %v144_v23  ;;  %v7336_v16 = vpack.c.bf16 %v1555_v31, %v1551_v12  ;;  %v7338_v56 = vsub.f32 %v145_v43, %v1551_v12  ;;  %v2829_v29 = vand.u32 4294901760, %v53_v57  ;;  %v150_v36 = vld [vmem:[%s9389_s1 + $0x420] sm:$0xff]  ;;  %v153_v1 = vld [vmem:[%s9389_s1 + $0x438] sm:$0xff] }
  0xb3   :  { %5117 = vmatpush1.bf16.msra.mxu1 %v10191_v35  ;;  %10194 = vst [vmem:[#allocation41_spill] sm:$0xff] %v7324_v2  ;;  %v10196_v35 = vld [vmem:[#allocation62_spill] sm:$0xff]  ;;  %v7346_v2 = vsub.f32 %v148_v20, %v1555_v31  ;;  %v7348_v0 = vsub.f32 %v98_v5, %v2874_v4  ;;  %v1559_v24 = vand.u32 4294901760, %v151_v22  ;;  %v7352_v43 = vsub.f32 %v101_v60, %v2877_v48  ;;  %v59_v47 = vld [vmem:[%s9389_s1 + $0x148] sm:$0xff]  ;;  %v10204_v5 = vld [vmem:[#allocation65_spill] sm:$0xff] }
  0xb4   :  { %5119 = vmatprep.subr.bf16.mxu1 %v10195_v19  ;;  %5311 = vmatprep.subr.bf16.mxu0 %v10196_v35  ;;  %10197 = vst [vmem:[#allocation46_spill] sm:$0xff] %v7336_v16  ;;  %10198 = vst [vmem:[#allocation45_spill] sm:$0xff] %v7338_v56  ;;  %v1563_v19 = vand.u32 4294901760, %v154_v8  ;;  %v7350_v35 = vpack.c.bf16 %v2877_v48, %v2874_v4  ;;  %v2880_v12 = vand.u32 4294901760, %v104_v55  ;;  %v2883_v56 = vand.u32 4294901760, %v107_v42  ;;  %v56_v16 = vld [vmem:[%s9389_s1 + $0x130] sm:$0xff] }
  0xb5   :  { %10199 = vst [vmem:[#allocation44_spill] sm:$0xff] %v7346_v2  ;;  %10200 = vst [vmem:[#allocation49_spill] sm:$0xff] %v7348_v0  ;;  %v10203_v20 = vpack.c.bf16 %v10050_v32, %v10049_v39  ;;  %5313 = vmatpush1.bf16.msra.mxu0 %v10204_v5  ;;  %v7364_v31 = vpack.c.bf16 %v1557_v46, %v1553_v58  ;;  %v7366_v60 = vsub.f32 %v144_v23, %v1553_v58  ;;  %v157_v39 = vld [vmem:[%s9389_s1 + $0x458] sm:$0xff]  ;;  %v160_v23 = vld [vmem:[%s9389_s1 + $0x470] sm:$0xff] }
  0xb6   :  { %10201 = vst [vmem:[#allocation48_spill] sm:$0xff] %v7350_v35  ;;  %10202 = vst [vmem:[#allocation47_spill] sm:$0xff] %v7352_v43  ;;  %v1561_v48 = vand.u32 4294901760, %v150_v36  ;;  %v1565_v4 = vand.u32 4294901760, %v153_v1  ;;  %v10207_v2 = vpack.c.bf16 %v10052_v61, %v10051_v10  ;;  %v10208_v43 = vld [vmem:[#allocation68_spill] sm:$0xff]  ;;  %v7372_v0 = vsub.f32 %v147_v17, %v1557_v46  ;;  %v110_v17 = vld [vmem:[%s9389_s1 + $0x2e0] sm:$0xff] }
  0xb7   :  { %5121 = vmatpush1.bf16.msra.mxu1 %v10203_v20  ;;  %10205 = vst [vmem:[#allocation52_spill] sm:$0xff] %v7364_v31  ;;  %10206 = vst [vmem:[#allocation51_spill] sm:$0xff] %v7366_v60  ;;  %5315 = vmatprep.subr.bf16.mxu0 %v10208_v43  ;;  %v7374_v35 = vpack.c.bf16 %v2829_v29, %v2826_v11  ;;  %v7376_v32 = vsub.f32 %v50_v51, %v2826_v11  ;;  %v2832_v10 = vand.u32 4294901760, %v56_v16  ;;  %v113_v51 = vld [vmem:[%s9389_s1 + $0x2f8] sm:$0xff]  ;;  %v159_v20 = vld [vmem:[%s9389_s1 + $0x468] sm:$0xff] }
  0xb8   :  { %5123 = vmatprep.subr.bf16.mxu1 %v10207_v2  ;;  %10209 = vst [vmem:[#allocation50_spill] sm:$0xff] %v7372_v0  ;;  %v7384_v58 = vsub.f32 %v53_v57, %v2829_v29  ;;  %v7386_v61 = vpack.c.bf16 %v1563_v19, %v1559_v24  ;;  %v2835_v2 = vand.u32 4294901760, %v59_v47  ;;  %v7394_v46 = vsub.f32 %v151_v22, %v1559_v24  ;;  %v156_v29 = vld [vmem:[%s9389_s1 + $0x450] sm:$0xff]  ;;  %v10217_v22 = vld [vmem:[#allocation71_spill] sm:$0xff] }
  0xb9   :  { %10210 = vst [vmem:[#allocation53_spill] sm:$0xff] %v7374_v35  ;;  %v7396_v11 = vsub.f32 %v154_v8, %v1563_v19  ;;  %v7398_v43 = vpack.c.bf16 %v2883_v56, %v2880_v12  ;;  %v7400_v57 = vsub.f32 %v104_v55, %v2880_v12  ;;  %v10216_v5 = vpack.c.bf16 %v10054_v52, %v10053_v9  ;;  %v10220_v12 = vld [vmem:[#allocation75_spill] sm:$0xff] }
  0xba   :  { %10211 = vst [vmem:[#allocation58_spill] sm:$0xff] %v7384_v58  ;;  %10212 = vst [vmem:[#allocation57_spill] sm:$0xff] %v7386_v61  ;;  %5317 = vmatpush1.bf16.msra.mxu0 %v10217_v22  ;;  %v7412_v8 = vsub.f32 %v107_v42, %v2883_v56  ;;  %v7414_v24 = vpack.c.bf16 %v1565_v4, %v1561_v48  ;;  %v1567_v55 = vand.u32 4294901760, %v157_v39  ;;  %v1571_v19 = vand.u32 4294901760, %v160_v23  ;;  %v62_v42 = vld [vmem:[%s9389_s1 + $0x160] sm:$0xff]  ;;  %v65_v56 = vld [vmem:[%s9389_s1 + $0x178] sm:$0xff] }
  0xbb   :  { %10213 = vst [vmem:[#allocation56_spill] sm:$0xff] %v7394_v46  ;;  %10214 = vst [vmem:[#allocation61_spill] sm:$0xff] %v7396_v11  ;;  %5125 = vmatpush1.bf16.msra.mxu1 %v10216_v5  ;;  %v10221_v11 = vpack.c.bf16 %v10056_v30, %v10220_v12  ;;  %v10222_v46 = vld [vmem:[#allocation74_spill] sm:$0xff]  ;;  %v7420_v0 = vsub.f32 %v150_v36, %v1561_v48  ;;  %v7422_v60 = vsub.f32 %v153_v1, %v1565_v4  ;;  %v163_v48 = vld [vmem:[%s9389_s1 + $0x488] sm:$0xff] }
  0xbc   :  { %10215 = vst [vmem:[#allocation60_spill] sm:$0xff] %v7398_v43  ;;  %10218 = vst [vmem:[#allocation59_spill] sm:$0xff] %v7412_v8  ;;  %5319 = vmatprep.subr.bf16.mxu0 %v10222_v46  ;;  %v2886_v52 = vand.u32 4294901760, %v110_v17  ;;  %v2889_v9 = vand.u32 4294901760, %v113_v51  ;;  %v7430_v5 = vpack.c.bf16 %v2835_v2, %v2832_v10  ;;  %v7432_v30 = vsub.f32 %v56_v16, %v2832_v10  ;;  %v166_v4 = vld [vmem:[%s9389_s1 + $0x4a0] sm:$0xff] }
  0xbd   :  { %10219 = vst [vmem:[#allocation62_spill] sm:$0xff] %v7414_v24  ;;  %5127 = vmatprep.subr.bf16.mxu1 %v10221_v11  ;;  %10223 = vst [vmem:[#allocation65_spill] sm:$0xff] %v7420_v0  ;;  %v1569_v11 = vand.u32 4294901760, %v156_v29  ;;  %v1573_v46 = vand.u32 4294901760, %v159_v20  ;;  %v7434_v36 = vsub.f32 %v59_v47, %v2835_v2  ;;  %v7436_v1 = vsub.f32 %v157_v39, %v1567_v55  ;;  %v10230_v47 = vld [vmem:[#allocation81_spill] sm:$0xff] }
  0xbe   :  { %10224 = vst [vmem:[#allocation68_spill] sm:$0xff] %v7422_v60  ;;  %10225 = vst [vmem:[#allocation71_spill] sm:$0xff] %v7430_v5  ;;  %v10229_v16 = vpack.c.bf16 %v10007_v41, %v10006_v38  ;;  %5321 = vmatpush1.bf16.msra.mxu0 %v10230_v47  ;;  %v7450_v39 = vpack.c.bf16 %v1571_v19, %v1567_v55  ;;  %v7452_v10 = vsub.f32 %v160_v23, %v1571_v19  ;;  %v10234_v0 = vld [vmem:[#allocation85_spill] sm:$0xff]  ;;  %v172_v38 = vld [vmem:[%s9389_s1 + $0x4d0] sm:$0xff] }
  0xbf   :  { %10226 = vst [vmem:[#allocation75_spill] sm:$0xff] %v7432_v30  ;;  %10227 = vst [vmem:[#allocation74_spill] sm:$0xff] %v7434_v36  ;;  %v2838_v2 = vand.u32 4294901760, %v62_v42  ;;  %v10233_v60 = vpack.c.bf16 %v10009_v25, %v10008_v37  ;;  %5323 = vmatprep.subr.bf16.mxu0 %v10234_v0  ;;  %v7458_v22 = vpack.c.bf16 %v2889_v9, %v2886_v52  ;;  %v1575_v19 = vand.u32 4294901760, %v163_v48  ;;  %v162_v37 = vld [vmem:[%s9389_s1 + $0x480] sm:$0xff]  ;;  %v165_v25 = vld [vmem:[%s9389_s1 + $0x498] sm:$0xff] }
  0xc0   :  { %10228 = vst [vmem:[#allocation98_spill] sm:$0xff] %v7436_v1  ;;  %5129 = vmatpush1.bf16.msra.mxu1 %v10229_v16  ;;  %10231 = vst [vmem:[#allocation81_spill] sm:$0xff] %v7450_v39  ;;  %v2841_v1 = vand.u32 4294901760, %v65_v56  ;;  %v7460_v12 = vsub.f32 %v110_v17, %v2886_v52  ;;  %v7464_v55 = vsub.f32 %v113_v51, %v2889_v9  ;;  %v1579_v16 = vand.u32 4294901760, %v166_v4  ;;  %v169_v47 = vld [vmem:[%s9389_s1 + $0x4b8] sm:$0xff] }
  0xc1   :  { %10232 = vst [vmem:[#allocation99_spill] sm:$0xff] %v7452_v10  ;;  %5131 = vmatprep.subr.bf16.mxu1 %v10233_v60  ;;  %10235 = vst [vmem:[#allocation85_spill] sm:$0xff] %v7458_v22  ;;  %v7466_v23 = vpack.c.bf16 %v1573_v46, %v1569_v11  ;;  %v7474_v0 = vsub.f32 %v156_v29, %v1569_v11  ;;  %v7476_v60 = vsub.f32 %v159_v20, %v1573_v46  ;;  %v10244_v20 = vld [vmem:[#allocation88_spill] sm:$0xff] }
  0xc2   :  { %10236 = vst [vmem:[#allocation100_spill] sm:$0xff] %v7460_v12  ;;  %10237 = vst [vmem:[#allocation101_spill] sm:$0xff] %v7464_v55  ;;  %v10241_v17 = vand.u32 4294901760, %v7062_v53  ;;  %v10242_v52 = vand.u32 4294901760, %v7064_v33  ;;  %v10243_v29 = vpack.c.bf16 %v10010_v15, %v6594_v40  ;;  %5325 = vmatpush1.bf16.msra.mxu0 %v10244_v20  ;;  %v7494_v11 = vpack.c.bf16 %v2841_v1, %v2838_v2 }
  0xc3   :  { %10238 = vst [vmem:[#allocation102_spill] sm:$0xff] %v7466_v23  ;;  %10239 = vst [vmem:[#allocation103_spill] sm:$0xff] %v7474_v0  ;;  %v7496_v46 = vsub.f32 %v62_v42, %v2838_v2  ;;  %v10247_v41 = vpack.c.bf16 %v6621_v50, %v10011_v18  ;;  %v1577_v0 = vand.u32 4294901760, %v162_v37  ;;  %v1581_v10 = vand.u32 4294901760, %v165_v25 }
  0xc4   :  { %10240 = vst [vmem:[#allocation104_spill] sm:$0xff] %v7476_v60  ;;  %v3023_v51 = vsub.f32 %v7062_v53, %v10241_v17  ;;  %v3030_v9 = vsub.f32 %v7064_v33, %v10242_v52  ;;  %5133 = vmatpush1.bf16.msra.mxu1 %v10243_v29  ;;  %10245 = vst [vmem:[#allocation88_spill] sm:$0xff] %v7494_v11  ;;  %v10248_v60 = vld [vmem:[#allocation93_spill] sm:$0xff]  ;;  %v10249_v40 = vand.u32 4294901760, %v7080_v3  ;;  %v10250_v29 = vand.u32 4294901760, %v7092_v6 }
  0xc5   :  { %10246 = vst [vmem:[#allocation105_spill] sm:$0xff] %v7496_v46  ;;  %5135 = vmatprep.subr.bf16.mxu1 %v10247_v41  ;;  %5327 = vmatprep.subr.bf16.mxu0 %v10248_v60  ;;  %v7510_v2 = vsub.f32 %v65_v56, %v2841_v1  ;;  %v7512_v20 = vpack.c.bf16 %v1579_v16, %v1575_v19  ;;  %v1583_v52 = vand.u32 4294901760, %v169_v47  ;;  %v1587_v17 = vand.u32 4294901760, %v172_v38  ;;  %v10255_v56 = vld [vmem:[#allocation94_spill] sm:$0xff] }
  0xc6   :  { %v2911_v15 = vsub.f32 %v7080_v3, %v10249_v40  ;;  %v2918_v42 = vsub.f32 %v7092_v6, %v10250_v29  ;;  %v7514_v50 = vsub.f32 %v163_v48, %v1575_v19  ;;  %v7516_v18 = vsub.f32 %v166_v4, %v1579_v16  ;;  %v168_v40 = vld [vmem:[%s9389_s1 + $0x4b0] sm:$0xff]  ;;  %v171_v29 = vld [vmem:[%s9389_s1 + $0x4c8] sm:$0xff]  ;;  %v10305_v3 = vld [vmem:[#allocation26_spill] sm:$0xff] }
  0xc7   :  { %10251 = vst [vmem:[#allocation93_spill] sm:$0xff] %v7510_v2  ;;  %10252 = vst [vmem:[#allocation106_spill] sm:$0xff] %v7512_v20  ;;  %v3024_v41 = vand.u32 4294901760, %v3023_v51  ;;  %v3031_v60 = vand.u32 4294901760, %v3030_v9  ;;  %v10256_v1 = vpack.c.bf16 %v10046_v28, %v10255_v56  ;;  %v10257_v6 = vld [vmem:[#allocation95_spill] sm:$0xff]  ;;  %v10258_v48 = vand.u32 4294901760, %v7110_v14 }
  0xc8   :  { %10253 = vst [vmem:[#allocation107_spill] sm:$0xff] %v7514_v50  ;;  %10254 = vst [vmem:[#allocation108_spill] sm:$0xff] %v7516_v18  ;;  %5329 = vmatpush1.bf16.msra.mxu0 %v10257_v6  ;;  %v10259_v19 = vand.u32 4294901760, %v7120_v34  ;;  %v7538_v28 = vpack.c.bf16 %v1581_v10, %v1577_v0  ;;  %v7540_v56 = vsub.f32 %v162_v37, %v1577_v0  ;;  %v2912_v6 = vand.u32 4294901760, %v2911_v15  ;;  %v175_v9 = vld [vmem:[%s9389_s1 + $0x4e8] sm:$0xff]  ;;  %v178_v51 = vld [vmem:[%s9389_s1 + $0x500] sm:$0xff] }
  0xc9   :  { %5137 = vmatpush1.bf16.msra.mxu1 %v10256_v1  ;;  %v3037_v4 = vsub.f32 %v7110_v14, %v10258_v48  ;;  %5331 = vmatprep.subr.bf16.mxu0 %v7034_v44  ;;  %v2919_v1 = vand.u32 4294901760, %v2918_v42  ;;  %v7542_v18 = vsub.f32 %v165_v25, %v1581_v10  ;;  %v7544_v48 = vpack.c.bf16 %v1587_v17, %v1583_v52  ;;  %v10264_v44 = vld [vmem:[#allocation87_spill] sm:$0xff]  ;;  %v10265_v37 = vld [vmem:[#allocation78_spill] sm:$0xff]  ;;  %v10267_v42 = vld [vmem:[#allocation9_spill] sm:$0xff] }
  0xca   :  { %v3044_v16 = vsub.f32 %v7120_v34, %v10259_v19  ;;  %5715 = vmatprep.subr.bf16.mxu1 %v7050_v59  ;;  %10260 = vst [vmem:[#allocation94_spill] sm:$0xff] %v7538_v28  ;;  %10261 = vst [vmem:[#allocation95_spill] sm:$0xff] %v7540_v56  ;;  %v1585_v50 = vand.u32 4294901760, %v168_v40  ;;  %v1589_v19 = vand.u32 4294901760, %v171_v29  ;;  %v7554_v0 = vpack.c.bf16 %v3031_v60, %v3024_v41  ;;  %v10268_v59 = vld [vmem:[#allocation12_spill] sm:$0xff] }
  0xcb   :  { %10262 = vst [vmem:[#allocation109_spill] sm:$0xff] %v7542_v18  ;;  %10263 = vst [vmem:[#allocation110_spill] sm:$0xff] %v7544_v48  ;;  %1505 = vmatmul.mubr.f32.vlgmr.msra.gmra.mrb[0].mxu0 %v10265_v37  ;;  %v7556_v10 = vsub.f32 %v169_v47, %v1583_v52  ;;  %v3038_v18 = vand.u32 4294901760, %v3037_v4  ;;  %v10269_v34 = vand.u32 4294901760, %v7150_v21  ;;  %v10270_v37 = vand.u32 4294901760, %v7152_v13  ;;  %v17_v47 = vld [vmem:[%s9390_s0 + $0x18] sm:$0xff] }
  0xcc   :  { %962 = vmatmul.mubr.f32.vlgmr.msra.gmra.mrb[0].mxu1 %v10264_v44  ;;  %5333 = vmatpush1.bf16.msra.mxu0 %v10267_v42  ;;  %v3045_v56 = vand.u32 4294901760, %v3044_v16  ;;  %v10271_v52 = vld [vmem:[#allocation17_spill] sm:$0xff]  ;;  %v10272_v60 = vld [vmem:[#allocation40_spill] sm:$0xff]  ;;  %v7573_v15 = vpack.c.bf16 %v2919_v1, %v2912_v6  ;;  %v7575_v4 = vsub.f32 %v172_v38, %v1587_v17  ;;  %v1591_v16 = vand.u32 4294901760, %v175_v9  ;;  %v10274_v42 = vld [vmem:[#allocation90_spill] sm:$0xff] }
  0xcd   :  { %10266 = vst [vmem:[#allocation111_spill] sm:$0xff] %v7556_v10  ;;  %5717 = vmatpush3.bf16.msra.mxu1 %v10268_v59  ;;  %v2925_v44 = vsub.f32 %v7150_v21, %v10269_v34  ;;  %v2932_v41 = vsub.f32 %v7152_v13, %v10270_v37  ;;  %5335 = vmatprep.subr.bf16.mxu0 %v10271_v52  ;;  %v1595_v25 = vand.u32 4294901760, %v178_v51  ;;  %v174_v34 = vld [vmem:[%s9389_s1 + $0x4e0] sm:$0xff]  ;;  %v177_v52 = vld [vmem:[%s9389_s1 + $0x4f8] sm:$0xff]  ;;  %v10278_v1 = vand.u32 4294901760, %v7174_v26 }
  0xce   :  { %5719 = vmatprep.subr.bf16.mxu1 %v10272_v60  ;;  %10273 = vst [vmem:[#allocation112_spill] sm:$0xff] %v7575_v4  ;;  %2896 = vmatprep.mubr.f32.mxu1 %v10274_v42  ;;  %v7581_v37 = vpack.c.bf16 %v1589_v19, %v1585_v50  ;;  %v7583_v59 = vsub.f32 %v168_v40, %v1585_v50  ;;  %v10279_v42 = vand.u32 4294901760, %v7176_v45  ;;  %v7598_v50 = vand.u32 4294901760, %v17_v47  ;;  %v10281_v40 = vld [vmem:[#allocation43_spill] sm:$0xff] }
  0xcf   :  { %v7590_v17 = vsub.f32 %v171_v29, %v1589_v19  ;;  %v3051_v60 = vsub.f32 %v7174_v26, %v10278_v1  ;;  %v7602_v10 = vpack.c.bf16 %v3045_v56, %v3038_v18  ;;  %v2926_v6 = vand.u32 4294901760, %v2925_v44  ;;  %v10283_v19 = vld [vmem:[#allocation66_spill] sm:$0xff] }
  0xd0   :  { %10275 = vst [vmem:[#allocation90_spill] sm:$0xff] %v7581_v37  ;;  %10276 = vst [vmem:[#allocation113_spill] sm:$0xff] %v7583_v59  ;;  %v3058_v4 = vsub.f32 %v7176_v45, %v10279_v42  ;;  %5337 = vmatpush1.bf16.msra.mxu0 %v10281_v40  ;;  %v10282_v59 = vld [vmem:[#allocation96_spill] sm:$0xff]  ;;  %v2933_v38 = vand.u32 4294901760, %v2932_v41  ;;  %v1593_v29 = vand.u32 4294901760, %v174_v34  ;;  %v7606_v1 = vpack.c.bf16 %v1595_v25, %v1591_v16 }
  0xd1   :  { %10277 = vst [vmem:[#allocation114_spill] sm:$0xff] %v7590_v17  ;;  %10280 = vst [vmem:[#allocation115_spill] sm:$0xff] %v7598_v50  ;;  %5721 = vmatpush3.bf16.msra.mxu1 %v10282_v59  ;;  %5339 = vmatprep.subr.bf16.mxu0 %v10283_v19  ;;  %v10284_v17 = vld [vmem:[#allocation70_spill] sm:$0xff]  ;;  %v7608_v26 = vsub.f32 %v175_v9, %v1591_v16  ;;  %v1597_v42 = vand.u32 4294901760, %v177_v52  ;;  %v7611_v45 = vsub.f32 %v17_v47, %v7598_v50  ;;  %v181_v19 = vld [vmem:[%s9389_s1 + $0x518] sm:$0xff] }
  0xd2   :  { %5723 = vmatprep.subr.bf16.mxu1 %v10284_v17  ;;  %10285 = vst [vmem:[#allocation116_spill] sm:$0xff] %v7606_v1  ;;  %v7613_v40 = vsub.f32 %v178_v51, %v1595_v25  ;;  %v10289_v18 = vand.u32 4294901760, %v7206_v49  ;;  %v10290_v56 = vand.u32 4294901760, %v7208_v27  ;;  %v184_v9 = vld [vmem:[%s9389_s1 + $0x530] sm:$0xff]  ;;  %v10291_v47 = vld [vmem:[#allocation23_spill] sm:$0xff]  ;;  %v3052_v51 = vand.u32 4294901760, %v3051_v60 }
  0xd3   :  { %10286 = vst [vmem:[#allocation117_spill] sm:$0xff] %v7608_v26  ;;  %10287 = vst [vmem:[#allocation118_spill] sm:$0xff] %v7611_v45  ;;  %v3059_v25 = vand.u32 4294901760, %v3058_v4  ;;  %v10292_v17 = vld [vmem:[#allocation16_spill] sm:$0xff]  ;;  %v7634_v26 = vpack.c.bf16 %v2933_v38, %v2926_v6  ;;  %v7636_v50 = vsub.f32 %v174_v34, %v1593_v29  ;;  %v10297_v16 = vld [vmem:[#allocation7_spill] sm:$0xff]  ;;  %v7642_v4 = vpack.c.bf16 %v1597_v42, %v1593_v29 }
  0xd4   :  { %10288 = vst [vmem:[#allocation119_spill] sm:$0xff] %v7613_v40  ;;  %v2939_v44 = vsub.f32 %v7206_v49, %v10289_v18  ;;  %v2946_v41 = vsub.f32 %v7208_v27, %v10290_v56  ;;  %v7630_v18 = vand.u32 4294901760, %v7611_v45  ;;  %v10294_v40 = vld [vmem:[#allocation77_spill] sm:$0xff]  ;;  %v10295_v56 = vld [vmem:[#allocation4_spill] sm:$0xff]  ;;  %v10298_v60 = vld [vmem:[#allocation22_spill] sm:$0xff]  ;;  %v1599_v59 = vand.u32 4294901760, %v181_v19 }
  0xd5   :  { %5341 = vmatpush1.bf16.msra.mxu0 %v10294_v40  ;;  %5725 = vmatpush3.bf16.msra.mxu1 %v10295_v56  ;;  %10296 = vst [vmem:[#allocation121_spill] sm:$0xff] %v7636_v50  ;;  %10299 = vst [vmem:[#allocation122_spill] sm:$0xff] %v7642_v4  ;;  %v1603_v13 = vand.u32 4294901760, %v184_v9  ;;  %v180_v40 = vld [vmem:[%s9389_s1 + $0x510] sm:$0xff]  ;;  %v183_v34 = vld [vmem:[%s9389_s1 + $0x528] sm:$0xff]  ;;  %v7652_v38 = vsub.f32 %v177_v52, %v1597_v42  ;;  %v10301_v29 = vand.u32 4294901760, %v10291_v47 }
  0xd6   :  { %10293 = vst [vmem:[#allocation120_spill] sm:$0xff] %v7630_v18  ;;  %5343 = vmatprep.subr.bf16.mxu0 %v10297_v16  ;;  %5727 = vmatprep.subr.bf16.mxu1 %v10298_v60  ;;  %v1642_v6 = vsub.f32 %v7611_v45, %v7630_v18  ;;  %v2940_v49 = vand.u32 4294901760, %v2939_v44  ;;  %v2947_v27 = vand.u32 4294901760, %v2946_v41  ;;  %v7657_v60 = vpack.c.bf16 %v3059_v25, %v3052_v51  ;;  %v10306_v52 = vld [vmem:[#allocation28_spill] sm:$0xff]  ;;  %v190_v25 = vld [vmem:[%s9389_s1 + $0x560] sm:$0xff] }
  0xd7   :  { %10300 = vst [vmem:[#allocation123_spill] sm:$0xff] %v7652_v38  ;;  %v3065_v16 = vsub.f32 %v10291_v47, %v10301_v29  ;;  %v7659_v56 = vsub.f32 %v181_v19, %v1599_v59  ;;  %v10303_v50 = vand.u32 4294901760, %v10292_v17  ;;  %v1601_v42 = vand.u32 4294901760, %v180_v40  ;;  %v10312_v45 = vld [vmem:[#allocation32_spill] sm:$0xff]  ;;  %v186_v38 = vld [vmem:[%s9389_s1 + $0x540] sm:$0xff] }
  0xd8   :  { %v7664_v14 = vand.u32 4294901760, %v1642_v6  ;;  %v1605_v44 = vand.u32 4294901760, %v183_v34  ;;  %v10307_v41 = vand.u32 4294901760, %v7262_v63  ;;  %v10308_v51 = vand.u32 4294901760, %v7268_v62 }
  0xd9   :  { %10302 = vst [vmem:[#allocation124_spill] sm:$0xff] %v7659_v56  ;;  %v3072_v21 = vsub.f32 %v10292_v17, %v10303_v50  ;;  %5345 = vmatpush1.bf16.msra.mxu0 %v10305_v3  ;;  %5729 = vmatpush3.bf16.msra.mxu1 %v10306_v52  ;;  %v187_v50 = vld [vmem:[%s9389_s1 + $0x548] sm:$0xff]  ;;  %v7682_v6 = vpack.c.bf16 %v1603_v13, %v1599_v59  ;;  %v3066_v56 = vand.u32 4294901760, %v3065_v16  ;;  %v1611_v18 = vand.u32 4294901760, %v190_v25  ;;  %v189_v17 = vld [vmem:[%s9389_s1 + $0x558] sm:$0xff] }
  0xda   :  { %10304 = vst [vmem:[#allocation125_spill] sm:$0xff] %v7664_v14  ;;  %v2953_v29 = vsub.f32 %v7262_v63, %v10307_v41  ;;  %v2960_v19 = vsub.f32 %v7268_v62, %v10308_v51  ;;  %5347 = vmatprep.subr.bf16.mxu0 %v7270_v54  ;;  %5731 = vmatprep.subr.bf16.mxu1 %v7294_v7  ;;  %v10311_v41 = vld [vmem:[#allocation34_spill] sm:$0xff]  ;;  %v10313_v62 = vld [vmem:[#allocation39_spill] sm:$0xff]  ;;  %v10314_v54 = vld [vmem:[#allocation41_spill] sm:$0xff] }
  0xdb   :  { %10309 = vst [vmem:[#allocation126_spill] sm:$0xff] %v7682_v6  ;;  %v7684_v3 = vsub.f32 %v184_v9, %v1603_v13  ;;  %v7688_v52 = vpack.c.bf16 %v2947_v27, %v2940_v49  ;;  %1644 = vmatprep.mubr.f32.mxu0 %v7664_v14  ;;  %v3073_v59 = vand.u32 4294901760, %v3072_v21  ;;  %v7696_v13 = vsub.f32 %v180_v40, %v1601_v42  ;;  %v10316_v7 = vld [vmem:[#allocation37_spill] sm:$0xff]  ;;  %v10317_v49 = vld [vmem:[#allocation38_spill] sm:$0xff]  ;;  %v10321_v21 = vld [vmem:[#allocation48_spill] sm:$0xff] }
  0xdc   :  { %v1607_v9 = vand.u32 4294901760, %v187_v50  ;;  %v7700_v27 = vpack.c.bf16 %v1605_v44, %v1601_v42  ;;  %v7702_v16 = vsub.f32 %v183_v34, %v1605_v44  ;;  %v2954_v51 = vand.u32 4294901760, %v2953_v29  ;;  %v10320_v63 = vld [vmem:[#allocation46_spill] sm:$0xff] }
  0xdd   :  { %10310 = vst [vmem:[#allocation127_spill] sm:$0xff] %v7684_v3  ;;  %10315 = vst [vmem:[#allocation128_spill] sm:$0xff] %v7696_v13  ;;  %5349 = vmatpush1.bf16.msra.mxu0 %v10316_v7  ;;  %5733 = vmatpush3.bf16.msra.mxu1 %v10317_v49  ;;  %v2961_v3 = vand.u32 4294901760, %v2960_v19  ;;  %v10323_v7 = vand.u32 4294901760, %v10311_v41  ;;  %v10324_v42 = vand.u32 4294901760, %v10312_v45  ;;  %v1609_v44 = vand.u32 4294901760, %v186_v38 }
  0xde   :  { %10318 = vst [vmem:[#allocation129_spill] sm:$0xff] %v7700_v27  ;;  %10319 = vst [vmem:[#allocation130_spill] sm:$0xff] %v7702_v16  ;;  %5351 = vmatprep.subr.bf16.mxu0 %v10320_v63  ;;  %5735 = vmatprep.subr.bf16.mxu1 %v10321_v21  ;;  %v7709_v40 = vsub.f32 %v187_v50, %v1607_v9  ;;  %v10325_v29 = vand.u32 4294901760, %v10313_v62  ;;  %v10326_v49 = vand.u32 4294901760, %v10314_v54  ;;  %v193_v50 = vld [vmem:[%s9389_s1 + $0x578] sm:$0xff] }
  0xdf   :  { %v3079_v14 = vsub.f32 %v10311_v41, %v10323_v7  ;;  %v3086_v34 = vsub.f32 %v10312_v45, %v10324_v42  ;;  %v196_v7 = vld [vmem:[%s9389_s1 + $0x590] sm:$0xff]  ;;  %v10327_v21 = vld [vmem:[#allocation49_spill] sm:$0xff]  ;;  %v10328_v42 = vld [vmem:[#allocation47_spill] sm:$0xff]  ;;  %v7731_v13 = vpack.c.bf16 %v3073_v59, %v3066_v56  ;;  %v7733_v45 = vpack.c.bf16 %v1611_v18, %v1607_v9 }
  0xe0   :  { %10322 = vst [vmem:[#allocation131_spill] sm:$0xff] %v7709_v40  ;;  %v2967_v19 = vsub.f32 %v10313_v62, %v10325_v29  ;;  %v2974_v63 = vsub.f32 %v10314_v54, %v10326_v49  ;;  %v7735_v29 = vsub.f32 %v190_v25, %v1611_v18  ;;  %v1613_v62 = vand.u32 4294901760, %v189_v17  ;;  %v192_v40 = vld [vmem:[%s9389_s1 + $0x570] sm:$0xff]  ;;  %v195_v59 = vld [vmem:[%s9389_s1 + $0x588] sm:$0xff] }
  0xe1   :  { %10329 = vst [vmem:[#allocation49_spill] sm:$0xff] %v7733_v45  ;;  %5353 = vmatpush1.bf16.msra.mxu0 %v7364_v31  ;;  %5737 = vmatpush3.bf16.msra.mxu1 %v7374_v35  ;;  %v7739_v49 = vpack.c.bf16 %v2961_v3, %v2954_v51  ;;  %v7741_v54 = vsub.f32 %v186_v38, %v1609_v44  ;;  %v3080_v18 = vand.u32 4294901760, %v3079_v14  ;;  %v3087_v25 = vand.u32 4294901760, %v3086_v34  ;;  %v10432_v41 = vld [vmem:[#allocation39_spill] sm:$0xff] }
  0xe2   :  { %10330 = vst [vmem:[#allocation132_spill] sm:$0xff] %v7735_v29  ;;  %5355 = vmatprep.subr.bf16.mxu0 %v7386_v61  ;;  %5739 = vmatprep.subr.bf16.mxu1 %v7398_v43  ;;  %v1615_v9 = vand.u32 4294901760, %v193_v50  ;;  %v1619_v16 = vand.u32 4294901760, %v196_v7  ;;  %v2968_v3 = vand.u32 4294901760, %v2967_v19  ;;  %v2975_v51 = vand.u32 4294901760, %v2974_v63 }
  0xe3   :  { %10331 = vst [vmem:[#allocation133_spill] sm:$0xff] %v7741_v54  ;;  %v10332_v38 = vand.u32 4294901760, %v10327_v21  ;;  %v10333_v35 = vand.u32 4294901760, %v10328_v42  ;;  %v7759_v61 = vpack.c.bf16 %v1613_v62, %v1609_v44  ;;  %v7761_v14 = vsub.f32 %v189_v17, %v1613_v62  ;;  %v199_v62 = vld [vmem:[%s9389_s1 + $0x5a8] sm:$0xff]  ;;  %v202_v17 = vld [vmem:[%s9389_s1 + $0x5c0] sm:$0xff] }
  0xe4   :  { %v7763_v34 = vsub.f32 %v193_v50, %v1615_v9  ;;  %v1617_v19 = vand.u32 4294901760, %v192_v40  ;;  %v10337_v63 = vand.u32 4294901760, %v7376_v32  ;;  %v1623_v44 = vand.u32 4294901760, %v199_v62  ;;  %v198_v50 = vld [vmem:[%s9389_s1 + $0x5a0] sm:$0xff] }
  0xe5   :  { %v3093_v31 = vsub.f32 %v10327_v21, %v10332_v38  ;;  %v3100_v56 = vsub.f32 %v10328_v42, %v10333_v35  ;;  %10334 = vst [vmem:[#allocation134_spill] sm:$0xff] %v7759_v61  ;;  %10335 = vst [vmem:[#allocation135_spill] sm:$0xff] %v7761_v14  ;;  %5357 = vmatpush1.bf16.msra.mxu0 %v7414_v24  ;;  %5741 = vmatpush3.bf16.msra.mxu1 %v7430_v5  ;;  %v10338_v35 = vand.u32 4294901760, %v7384_v58 }
  0xe6   :  { %10336 = vst [vmem:[#allocation136_spill] sm:$0xff] %v7763_v34  ;;  %v2981_v38 = vsub.f32 %v7376_v32, %v10337_v63  ;;  %5359 = vmatprep.subr.bf16.mxu0 %v7450_v39  ;;  %5743 = vmatprep.subr.bf16.mxu1 %v7458_v22  ;;  %v7783_v63 = vpack.c.bf16 %v3087_v25, %v3080_v18  ;;  %v1621_v5 = vand.u32 4294901760, %v195_v59  ;;  %v201_v18 = vld [vmem:[%s9389_s1 + $0x5b8] sm:$0xff] }
  0xe7   :  { %v2988_v43 = vsub.f32 %v7384_v58, %v10338_v35  ;;  %v7785_v24 = vpack.c.bf16 %v1619_v16, %v1615_v9  ;;  %v7787_v35 = vsub.f32 %v196_v7, %v1619_v16  ;;  %v7789_v34 = vpack.c.bf16 %v2975_v51, %v2968_v3 }
  0xe8   :  { %v3094_v14 = vand.u32 4294901760, %v3093_v31  ;;  %v3101_v54 = vand.u32 4294901760, %v3100_v56  ;;  %v7791_v29 = vsub.f32 %v192_v40, %v1617_v19  ;;  %v1627_v58 = vand.u32 4294901760, %v202_v17 }
  0xe9   :  { %10339 = vst [vmem:[#allocation137_spill] sm:$0xff] %v7785_v24  ;;  %10340 = vst [vmem:[#allocation138_spill] sm:$0xff] %v7787_v35  ;;  %5361 = vmatpush1.bf16.msra.mxu0 %v7466_v23  ;;  %5745 = vmatpush3.bf16.msra.mxu1 %v7494_v11  ;;  %v2982_v31 = vand.u32 4294901760, %v2981_v38  ;;  %v2989_v40 = vand.u32 4294901760, %v2988_v43  ;;  %v10342_v56 = vand.u32 4294901760, %v7400_v57  ;;  %v10343_v9 = vand.u32 4294901760, %v7412_v8 }
  0xea   :  { %10341 = vst [vmem:[#allocation139_spill] sm:$0xff] %v7791_v29  ;;  %5363 = vmatprep.subr.bf16.mxu0 %v7512_v20  ;;  %5747 = vmatprep.subr.bf16.mxu1 %v7554_v0  ;;  %v7811_v51 = vpack.c.bf16 %v1621_v5, %v1617_v19  ;;  %v7813_v7 = vsub.f32 %v195_v59, %v1621_v5  ;;  %v1629_v39 = vand.u32 4294901760, %v201_v18  ;;  %v208_v0 = vld [vmem:[%s9389_s1 + $0x5f0] sm:$0xff]  ;;  %v10347_v5 = vld [vmem:[#allocation97_spill] sm:$0xff] }
  0xeb   :  { %v3107_v25 = vsub.f32 %v7400_v57, %v10342_v56  ;;  %v3114_v3 = vsub.f32 %v7412_v8, %v10343_v9  ;;  %v7817_v38 = vpack.c.bf16 %v3101_v54, %v3094_v14  ;;  %v7819_v23 = vsub.f32 %v199_v62, %v1623_v44  ;;  %v205_v9 = vld [vmem:[%s9389_s1 + $0x5d8] sm:$0xff]  ;;  %v10357_v11 = vld [vmem:[#allocation76_spill] sm:$0xff] }
  0xec   :  { %10344 = vst [vmem:[#allocation140_spill] sm:$0xff] %v7811_v51  ;;  %10345 = vst [vmem:[#allocation141_spill] sm:$0xff] %v7813_v7  ;;  %v1625_v56 = vand.u32 4294901760, %v198_v50  ;;  %2902 = vmatmul.mubr.f32.vlgmr.msra.gmra.mrb[2].mxu1 %v10347_v5  ;;  %v7828_v59 = vpack.c.bf16 %v1627_v58, %v1623_v44  ;;  %v7830_v19 = vsub.f32 %v202_v17, %v1627_v58  ;;  %v10350_v54 = vand.u32 4294901760, %v7432_v30  ;;  %v204_v58 = vld [vmem:[%s9389_s1 + $0x5d0] sm:$0xff]  ;;  %v207_v17 = vld [vmem:[%s9389_s1 + $0x5e8] sm:$0xff] }
  0xed   :  { %10346 = vst [vmem:[#allocation142_spill] sm:$0xff] %v7819_v23  ;;  %v10351_v62 = vand.u32 4294901760, %v7434_v36  ;;  %5365 = vmatpush1.bf16.msra.mxu0 %v7538_v28  ;;  %5749 = vmatpush3.bf16.msra.mxu1 %v7573_v15  ;;  %v7840_v16 = vpack.c.bf16 %v2989_v40, %v2982_v31  ;;  %v3108_v20 = vand.u32 4294901760, %v3107_v25  ;;  %v3115_v5 = vand.u32 4294901760, %v3114_v3  ;;  %v10402_v7 = vld [vmem:[#allocation72_spill] sm:$0xff]  ;;  %v10405_v23 = vld [vmem:[#allocation29_spill] sm:$0xff] }
  0xee   :  { %10348 = vst [vmem:[#allocation97_spill] sm:$0xff] %v7828_v59  ;;  %10349 = vst [vmem:[#allocation143_spill] sm:$0xff] %v7830_v19  ;;  %v2995_v14 = vsub.f32 %v7432_v30, %v10350_v54  ;;  %v7842_v44 = vsub.f32 %v198_v50, %v1625_v56  ;;  %5367 = vmatprep.subr.bf16.mxu0 %v7544_v48  ;;  %5751 = vmatprep.subr.bf16.mxu1 %v7602_v10  ;;  %v1631_v54 = vand.u32 4294901760, %v205_v9  ;;  %v16_v10 = vld [vmem:[%s9390_s0 + $0x10] sm:$0xff]  ;;  %v10360_v48 = vld [vmem:[#allocation83_spill] sm:$0xff] }
  0xef   :  { %v3002_v43 = vsub.f32 %v7434_v36, %v10351_v62  ;;  %v1635_v15 = vand.u32 4294901760, %v208_v0  ;;  %v10353_v31 = vand.u32 4294901760, %v7460_v12  ;;  %v10354_v50 = vand.u32 4294901760, %v7464_v55  ;;  %3132 = vmatprep.mubr.f32.mxu1 %v10357_v11  ;;  %v10398_v19 = vld [vmem:[#allocation8_spill] sm:$0xff] }
  0xf0   :  { %10352 = vst [vmem:[#allocation144_spill] sm:$0xff] %v7842_v44  ;;  %v7858_v3 = vpack.c.bf16 %v1629_v39, %v1625_v56  ;;  %v7860_v62 = vsub.f32 %v201_v18, %v1629_v39  ;;  %v2996_v22 = vand.u32 4294901760, %v2995_v14  ;;  %v1637_v36 = vand.u32 4294901760, %v207_v17  ;;  %v10359_v56 = vld [vmem:[#allocation82_spill] sm:$0xff] }
  0xf1   :  { %v3121_v40 = vsub.f32 %v7460_v12, %v10353_v31  ;;  %v3128_v25 = vsub.f32 %v7464_v55, %v10354_v50  ;;  %v3003_v31 = vand.u32 4294901760, %v3002_v43  ;;  %v1633_v12 = vand.u32 4294901760, %v204_v58  ;;  %5369 = vmatpush1.bf16.msra.mxu0 %v7581_v37  ;;  %5753 = vmatpush3.bf16.msra.mxu1 %v7634_v26  ;;  %v10365_v50 = vld [vmem:[#allocation10_spill] sm:$0xff]  ;;  %v10366_v37 = vld [vmem:[#allocation11_spill] sm:$0xff] }
  0xf2   :  { %10355 = vst [vmem:[#allocation145_spill] sm:$0xff] %v7858_v3  ;;  %10356 = vst [vmem:[#allocation146_spill] sm:$0xff] %v7860_v62  ;;  %v7870_v39 = vpack.c.bf16 %v3115_v5, %v3108_v20  ;;  %v7872_v18 = vsub.f32 %v205_v9, %v1631_v54  ;;  %5371 = vmatprep.subr.bf16.mxu0 %v7606_v1  ;;  %5755 = vmatprep.subr.bf16.mxu1 %v7657_v60  ;;  %v7880_v55 = vand.u32 4294901760, %v16_v10  ;;  %v10396_v62 = vld [vmem:[#allocation63_spill] sm:$0xff] }
  0xf3   :  { %v7878_v14 = vpack.c.bf16 %v1635_v15, %v1631_v54  ;;  %v3122_v43 = vand.u32 4294901760, %v3121_v40  ;;  %v3129_v11 = vand.u32 4294901760, %v3128_v25  ;;  %v10363_v26 = vand.u32 4294901760, %v7496_v46 }
  0xf4   :  { %10358 = vst [vmem:[#allocation147_spill] sm:$0xff] %v7872_v18  ;;  %10362 = vst [vmem:[#allocation83_spill] sm:$0xff] %v7880_v55  ;;  %v10364_v9 = vand.u32 4294901760, %v7510_v2  ;;  %v9716_v28 = vand.u32 4294901760, %v10365_v50  ;;  %v7890_v30 = vpack.c.bf16 %v3003_v31, %v2996_v22  ;;  %v7892_v60 = vsub.f32 %v208_v0, %v1635_v15 }
  0xf5   :  { %10361 = vst [vmem:[#allocation82_spill] sm:$0xff] %v7878_v14  ;;  %v3009_v20 = vsub.f32 %v7496_v46, %v10363_v26  ;;  %v7894_v54 = vpack.c.bf16 %v1637_v36, %v1633_v12  ;;  %v7896_v40 = vsub.f32 %v204_v58, %v1633_v12  ;;  %5373 = vmatpush1.bf16.msra.mxu0 %v7642_v4  ;;  %v10371_v26 = vand.u32 4294901760, %v10359_v56  ;;  %v10375_v58 = vld [vmem:[#allocation19_spill] sm:$0xff] }
  0xf6   :  { %v3016_v5 = vsub.f32 %v7510_v2, %v10364_v9  ;;  %10367 = vst [vmem:[#allocation148_spill] sm:$0xff] %v7892_v60  ;;  %5757 = vmatpush3.bf16.msra.mxu1 %v7688_v52  ;;  %v7900_v25 = vsub.f32 %v207_v17, %v1637_v36  ;;  %v10372_v1 = vand.u32 4294901760, %v10360_v48  ;;  %5375 = vmatprep.subr.bf16.mxu0 %v7682_v6  ;;  %v10374_v52 = vld [vmem:[#allocation18_spill] sm:$0xff]  ;;  %v10380_v2 = vld [vmem:[#allocation69_spill] sm:$0xff]  ;;  %v10382_v46 = vld [vmem:[#allocation3_spill] sm:$0xff] }
  0xf7   :  { %10368 = vst [vmem:[#allocation149_spill] sm:$0xff] %v7894_v54  ;;  %10369 = vst [vmem:[#allocation150_spill] sm:$0xff] %v7896_v40  ;;  %v1659_v9 = vsub.f32 %v10359_v56, %v10371_v26  ;;  %5759 = vmatprep.subr.bf16.mxu1 %v7731_v13  ;;  %v7910_v12 = vpack.c.bf16 %v3129_v11, %v3122_v43  ;;  %v7913_v0 = vsub.f32 %v16_v10, %v7880_v55  ;;  %v10377_v13 = vld [vmem:[#allocation54_spill] sm:$0xff]  ;;  %v10378_v43 = vld [vmem:[#allocation55_spill] sm:$0xff] }
  0xf8   :  { %10370 = vst [vmem:[#allocation151_spill] sm:$0xff] %v7900_v25  ;;  %v1671_v22 = vsub.f32 %v10360_v48, %v10372_v1  ;;  %v3010_v15 = vand.u32 4294901760, %v3009_v20  ;;  %v3017_v31 = vand.u32 4294901760, %v3016_v5  ;;  %v1665_v26 = vsub.f32 %v10365_v50, %v9716_v28  ;;  %v10379_v10 = vld [vmem:[#allocation67_spill] sm:$0xff]  ;;  %v10381_v17 = vld [vmem:[#allocation2_spill] sm:$0xff]  ;;  %v10386_v11 = vld [vmem:[#allocation13_spill] sm:$0xff] }
  0xf9   :  { %10373 = vst [vmem:[#allocation152_spill] sm:$0xff] %v7913_v0  ;;  %v10376_v1 = vand.u32 4294901760, %v10366_v37  ;;  %5377 = vmatpush1.bf16.msra.mxu0 %v7700_v27  ;;  %v1660_v20 = vand.u32 4294901760, %v1659_v9  ;;  %v7936_v55 = vand.u32 4294901760, %v7913_v0  ;;  %v10384_v36 = vand.u32 4294901760, %v10374_v52 }
  0xfa   :  { %5761 = vmatpush3.bf16.msra.mxu1 %v7739_v49  ;;  %v1672_v5 = vand.u32 4294901760, %v1671_v22  ;;  %5379 = vmatprep.subr.bf16.mxu0 %v7733_v45  ;;  %v10385_v9 = vand.u32 4294901760, %v10375_v58  ;;  %v7944_v28 = vpack.c.bf16 %v3017_v31, %v3010_v15  ;;  %v1666_v25 = vand.u32 4294901760, %v1665_v26 }
  0xfb   :  { %v1677_v6 = vsub.f32 %v10366_v37, %v10376_v1  ;;  %5763 = vmatprep.subr.bf16.mxu1 %v7783_v63  ;;  %10383 = vst [vmem:[#allocation153_spill] sm:$0xff] %v7936_v55  ;;  %v1683_v49 = vsub.f32 %v10374_v52, %v10384_v36  ;;  %v10387_v63 = vld [vmem:[#allocation14_spill] sm:$0xff]  ;;  %v10388_v1 = vand.u32 4294901760, %v10377_v13  ;;  %v10389_v40 = vand.u32 4294901760, %v10378_v43 }
  0xfc   :  { %v1695_v22 = vsub.f32 %v10375_v58, %v10385_v9  ;;  %v10390_v36 = vand.u32 4294901760, %v10379_v10  ;;  %v10391_v15 = vand.u32 4294901760, %v10380_v2  ;;  %v10392_v26 = vand.u32 4294901760, %v10381_v17  ;;  %v10510_v58 = vld [vmem:[#allocation74_spill] sm:$0xff] }
  0xfd   :  { %v1678_v4 = vand.u32 4294901760, %v1677_v6  ;;  %v1689_v27 = vsub.f32 %v10377_v13, %v10388_v1  ;;  %v1701_v60 = vsub.f32 %v10378_v43, %v10389_v40  ;;  %5381 = vmatpush1.bf16.msra.mxu0 %v7759_v61  ;;  %v5394_v6 = vpack.c.bf16 %v1672_v5, %v1660_v20  ;;  %v10394_v61 = vld [vmem:[#allocation20_spill] sm:$0xff]  ;;  %v10400_v20 = vld [vmem:[#allocation25_spill] sm:$0xff] }
  0xfe   :  { %v1707_v18 = vsub.f32 %v10379_v10, %v10390_v36  ;;  %v1719_v31 = vsub.f32 %v10380_v2, %v10391_v15  ;;  %5765 = vmatpush3.bf16.msra.mxu1 %v7789_v34  ;;  %v1713_v1 = vsub.f32 %v10381_v17, %v10392_v26  ;;  %v10393_v9 = vand.u32 4294901760, %v10382_v46  ;;  %5383 = vmatprep.subr.bf16.mxu0 %v7785_v24  ;;  %v10395_v34 = vld [vmem:[#allocation42_spill] sm:$0xff]  ;;  %v10397_v26 = vld [vmem:[#allocation64_spill] sm:$0xff]  ;;  %v10463_v10 = vld [vmem:[#allocation23_spill] sm:$0xff] }
  0xff   :  { %5767 = vmatprep.subr.bf16.mxu1 %v7817_v38  ;;  %v1648_v36 = vsub.f32 %v7913_v0, %v7936_v55  ;;  %v1684_v15 = vand.u32 4294901760, %v1683_v49  ;;  %v1696_v45 = vand.u32 4294901760, %v1695_v22  ;;  %v7974_v5 = vpack.c.bf16 %v1678_v4, %v1666_v25  ;;  %v10401_v25 = vld [vmem:[#allocation21_spill] sm:$0xff]  ;;  %v10408_v4 = vld [vmem:[#allocation36_spill] sm:$0xff]  ;;  %v10409_v0 = vld [vmem:[#allocation35_spill] sm:$0xff] }
 0x100   :  { %v1725_v40 = vsub.f32 %v10382_v46, %v10393_v9  ;;  %v10399_v9 = vld [vmem:[#allocation15_spill] sm:$0xff]  ;;  %v1690_v24 = vand.u32 4294901760, %v1689_v27  ;;  %v1702_v29 = vand.u32 4294901760, %v1701_v60  ;;  %v1708_v38 = vand.u32 4294901760, %v1707_v18  ;;  %v10403_v27 = vld [vmem:[#allocation73_spill] sm:$0xff]  ;;  %v10404_v18 = vld [vmem:[#allocation30_spill] sm:$0xff] }
 0x101   :  { %v1720_v35 = vand.u32 4294901760, %v1719_v31  ;;  %5385 = vmatpush1.bf16.msra.mxu0 %v7811_v51  ;;  %v1714_v49 = vand.u32 4294901760, %v1713_v1  ;;  %v5398_v44 = vpack.c.bf16 %v1696_v45, %v1684_v15  ;;  %v10411_v31 = vld [vmem:[#allocation6_spill] sm:$0xff]  ;;  %v10419_v46 = vld [vmem:[#allocation44_spill] sm:$0xff]  ;;  %v10501_v2 = vld [vmem:[#allocation143_spill] sm:$0xff] }
 0x102   :  { %5769 = vmatpush3.bf16.msra.mxu1 %v7840_v16  ;;  %v1726_v22 = vand.u32 4294901760, %v1725_v40  ;;  %5387 = vmatprep.subr.bf16.mxu0 %v7828_v59  ;;  %v10406_v16 = vand.u32 4294901760, %v10398_v19  ;;  %v10407_v40 = vand.u32 4294901760, %v10399_v9  ;;  %v7998_v45 = vpack.c.bf16 %v1702_v29, %v1690_v24  ;;  %v10426_v17 = vld [vmem:[#allocation56_spill] sm:$0xff]  ;;  %v10507_v43 = vld [vmem:[#allocation150_spill] sm:$0xff] }
 0x103   :  { %5771 = vmatprep.subr.bf16.mxu1 %v7870_v39  ;;  %v8000_v15 = vpack.c.bf16 %v1720_v35, %v1708_v38  ;;  %v10414_v39 = vand.u32 4294901760, %v10400_v20  ;;  %v10415_v29 = vand.u32 4294901760, %v10401_v25  ;;  %v10416_v38 = vand.u32 4294901760, %v10404_v18 }
 0x104   :  { %v1731_v1 = vsub.f32 %v10398_v19, %v10406_v16  ;;  %v1743_v55 = vsub.f32 %v10399_v9, %v10407_v40  ;;  %v8008_v16 = vand.u32 4294901760, %v1648_v36  ;;  %v8010_v40 = vpack.c.bf16 %v1726_v22, %v1714_v49  ;;  %v10418_v22 = vld [vmem:[#allocation45_spill] sm:$0xff] }
 0x105   :  { %5389 = vmatpush1.bf16.msra.mxu0 %v7858_v3  ;;  %v1737_v24 = vsub.f32 %v10400_v20, %v10414_v39  ;;  %v1749_v35 = vsub.f32 %v10401_v25, %v10415_v29  ;;  %v10417_v36 = vand.u32 4294901760, %v10405_v23  ;;  %v10420_v29 = vand.u32 4294901760, %v10408_v4  ;;  %v10424_v25 = vld [vmem:[#allocation51_spill] sm:$0xff] }
 0x106   :  { %5773 = vmatpush3.bf16.msra.mxu1 %v7890_v30  ;;  %10413 = vst [vmem:[#allocation20_spill] sm:$0xff] %v8008_v16  ;;  %5391 = vmatprep.subr.bf16.mxu0 %v7878_v14  ;;  %v1755_v30 = vsub.f32 %v10404_v18, %v10416_v38  ;;  %v1732_v59 = vand.u32 4294901760, %v1731_v1  ;;  %v1744_v3 = vand.u32 4294901760, %v1743_v55  ;;  %v10423_v38 = vld [vmem:[#allocation24_spill] sm:$0xff]  ;;  %v10429_v18 = vpack.c.bf16 %v7064_v33, %v7062_v53 }
 0x107   :  { %5775 = vmatprep.subr.bf16.mxu1 %v7910_v12  ;;  %v1767_v49 = vsub.f32 %v10405_v23, %v10417_v36  ;;  %v1761_v14 = vsub.f32 %v10408_v4, %v10420_v29  ;;  %v10421_v12 = vand.u32 4294901760, %v10409_v0  ;;  %v10425_v36 = vld [vmem:[#allocation50_spill] sm:$0xff]  ;;  %v1738_v55 = vand.u32 4294901760, %v1737_v24  ;;  %v10428_v4 = vld [vmem:[#allocation61_spill] sm:$0xff] }
 0x108   :  { %v1750_v1 = vand.u32 4294901760, %v1749_v35  ;;  %v1756_v20 = vand.u32 4294901760, %v1755_v30  ;;  %v10430_v60 = vand.u32 4294901760, %v10418_v22  ;;  %v5406_v35 = vpack.c.bf16 %v1744_v3, %v1732_v59  ;;  %v10434_v29 = vld [vmem:[#allocation78_spill] sm:$0xff] }
 0x109   :  { %v1773_v47 = vsub.f32 %v10409_v0, %v10421_v12  ;;  %5393 = vmatpush1.bf16.msra.mxu0 %v7894_v54  ;;  %v1768_v23 = vand.u32 4294901760, %v1767_v49  ;;  %v1762_v51 = vand.u32 4294901760, %v1761_v14  ;;  %v10433_v12 = vld [vmem:[#allocation41_spill] sm:$0xff]  ;;  %v10454_v14 = vld [vmem:[#allocation104_spill] sm:$0xff]  ;;  %v10486_v0 = vld [vmem:[#allocation123_spill] sm:$0xff] }
 0x10a   :  { %5777 = vmatpush3.bf16.msra.mxu1 %v7944_v28  ;;  %5395 = vmatprep.subr.bf16.mxu0 %v5394_v6  ;;  %v1779_v54 = vsub.f32 %v10418_v22, %v10430_v60  ;;  %v10431_v28 = vand.u32 4294901760, %v10419_v46  ;;  %v10436_v60 = vand.u32 4294901760, %v10425_v36  ;;  %v5408_v3 = vpack.c.bf16 %v1750_v1, %v1738_v55  ;;  %v10443_v1 = vld [vmem:[#allocation58_spill] sm:$0xff] }
 0x10b   :  { %5779 = vmatprep.subr.bf16.mxu1 %v10429_v18  ;;  %v1774_v39 = vand.u32 4294901760, %v1773_v47  ;;  %v10435_v18 = vand.u32 4294901760, %v10424_v25  ;;  %v10438_v47 = vpack.c.bf16 %v10387_v63, %v10386_v11  ;;  %v10442_v63 = vld [vmem:[#allocation68_spill] sm:$0xff]  ;;  %v10444_v11 = vld [vmem:[#allocation98_spill] sm:$0xff] }
 0x10c   :  { %v1791_v24 = vsub.f32 %v10419_v46, %v10431_v28  ;;  %1650 = vmatmul.mubr.f32.vlgmr.msra.gmra.mrb[0].mxu0 %v8008_v16  ;;  %v1797_v49 = vsub.f32 %v10425_v36, %v10436_v60  ;;  %v10437_v28 = vand.u32 4294901760, %v10426_v17  ;;  %v10440_v16 = vld [vmem:[#allocation65_spill] sm:$0xff]  ;;  %v9768_v53 = vand.u32 4294901760, %v10444_v11  ;;  %v10446_v60 = vld [vmem:[#allocation115_spill] sm:$0xff]  ;;  %v10480_v36 = vld [vmem:[#allocation112_spill] sm:$0xff] }
 0x10d   :  { %3134 = vmatmul.mubr.f32.vlgmr.msra.gmra.mrb[4].mxu1 %v10434_v29  ;;  %v1785_v30 = vsub.f32 %v10424_v25, %v10435_v18  ;;  %5397 = vmatpush1.bf16.msra.mxu0 %v7974_v5  ;;  %v10439_v18 = vand.u32 4294901760, %v10428_v4  ;;  %v5410_v5 = vpack.c.bf16 %v1768_v23, %v1756_v20  ;;  %v1780_v29 = vand.u32 4294901760, %v1779_v54  ;;  %v10473_v25 = vld [vmem:[#allocation95_spill] sm:$0xff]  ;;  %v10489_v20 = vld [vmem:[#allocation128_spill] sm:$0xff]  ;;  %v10490_v22 = vld [vmem:[#allocation130_spill] sm:$0xff] }
 0x10e   :  { %v1803_v59 = vsub.f32 %v10426_v17, %v10437_v28  ;;  %5781 = vmatpush3.bf16.msra.mxu1 %v10438_v47  ;;  %5399 = vmatprep.subr.bf16.mxu0 %v5398_v44  ;;  %v10441_v28 = vpack.c.bf16 %v10395_v34, %v10394_v61  ;;  %v1792_v33 = vand.u32 4294901760, %v1791_v24  ;;  %v9766_v47 = vand.u32 4294901760, %v10442_v63  ;;  %v10476_v17 = vld [vmem:[#allocation34_spill] sm:$0xff]  ;;  %v10492_v46 = vld [vmem:[#allocation132_spill] sm:$0xff] }
 0x10f   :  { %v1815_v6 = vsub.f32 %v10428_v4, %v10439_v18  ;;  %v8080_v55 = vpack.c.bf16 %v1774_v39, %v1762_v51  ;;  %v10445_v18 = vld [vmem:[#allocation80_spill] sm:$0xff]  ;;  %2041 = vmatprep.mubr.f32.mxu0 %v10446_v60  ;;  %v1798_v23 = vand.u32 4294901760, %v1797_v49  ;;  %v10447_v51 = vpack.c.bf16 %v10397_v26, %v10396_v62  ;;  %v10455_v60 = vld [vmem:[#allocation107_spill] sm:$0xff] }
 0x110   :  { %5783 = vmatprep.subr.bf16.mxu1 %v10441_v28  ;;  %3269 = vmatprep.mubr.f32.mxu1 %v10445_v18  ;;  %v1786_v28 = vand.u32 4294901760, %v1785_v30  ;;  %v1804_v54 = vand.u32 4294901760, %v1803_v59  ;;  %v10448_v24 = vand.u32 4294901760, %v10440_v16  ;;  %v5414_v59 = vpack.c.bf16 %v1792_v33, %v1780_v29  ;;  %v10487_v29 = vld [vmem:[#allocation124_spill] sm:$0xff] }
 0x111   :  { %5401 = vmatpush1.bf16.msra.mxu0 %v7998_v45  ;;  %v1816_v39 = vand.u32 4294901760, %v1815_v6  ;;  %v10449_v45 = vpack.c.bf16 %v10403_v27, %v10402_v7  ;;  %v8111_v6 = vsub.f32 %v10442_v63, %v9766_v47  ;;  %v8119_v49 = vsub.f32 %v10444_v11, %v9768_v53  ;;  %v10456_v53 = vld [vmem:[#allocation5_spill] sm:$0xff]  ;;  %v10462_v27 = vld [vmem:[#allocation16_spill] sm:$0xff] }
 0x112   :  { %5785 = vmatpush3.bf16.msra.mxu1 %v10447_v51  ;;  %v8098_v18 = vsub.f32 %v10440_v16, %v10448_v24  ;;  %5403 = vmatprep.subr.bf16.mxu0 %v8000_v15  ;;  %v10450_v51 = vld [vmem:[#allocation99_spill] sm:$0xff]  ;;  %v8126_v47 = vpack.c.bf16 %v1798_v23, %v1786_v28  ;;  %v10457_v44 = vpack.c.bf16 %v10411_v31, %v10456_v53  ;;  %v10470_v9 = vand.u32 4294901760, %v10455_v60  ;;  %v10483_v11 = vld [vmem:[#allocation117_spill] sm:$0xff]  ;;  %v10503_v31 = vld [vmem:[#allocation144_spill] sm:$0xff] }
 0x113   :  { %5787 = vmatprep.subr.bf16.mxu1 %v10449_v45  ;;  %v10451_v15 = vld [vmem:[#allocation103_spill] sm:$0xff]  ;;  %v8136_v13 = vpack.c.bf16 %v1816_v39, %v1804_v54  ;;  %v10464_v30 = vpack.c.bf16 %v10462_v27, %v10463_v10  ;;  %v10465_v19 = vand.u32 4294901760, %v10450_v51  ;;  %v10466_v54 = vld [vmem:[#allocation108_spill] sm:$0xff]  ;;  %v1828_v23 = vand.u32 4294901760, %v8119_v49  ;;  %v10485_v63 = vld [vmem:[#allocation121_spill] sm:$0xff] }
 0x114   :  { %v1810_v33 = vand.u32 4294901760, %v8098_v18  ;;  %v10468_v45 = vand.u32 4294901760, %v10451_v15  ;;  %v8171_v49 = vsub.f32 %v10455_v60, %v10470_v9  ;;  %v10488_v16 = vld [vmem:[#allocation127_spill] sm:$0xff]  ;;  %v10499_v27 = vld [vmem:[#allocation141_spill] sm:$0xff]  ;;  %v10500_v10 = vld [vmem:[#allocation142_spill] sm:$0xff] }
 0x115   :  { %5405 = vmatpush1.bf16.msra.mxu0 %v8010_v40  ;;  %v1822_v40 = vand.u32 4294901760, %v8111_v6  ;;  %v10494_v9 = vld [vmem:[#allocation135_spill] sm:$0xff]  ;;  %v10517_v53 = vld [vmem:[#allocation100_spill] sm:$0xff] }
 0x116   :  { %5789 = vmatpush3.bf16.msra.mxu1 %v10457_v44  ;;  %5407 = vmatprep.subr.bf16.mxu0 %v5406_v35  ;;  %v1839_v44 = vsub.f32 %v10450_v51, %v10465_v19  ;;  %v8157_v35 = vsub.f32 %v10451_v15, %v10468_v45  ;;  %v10469_v19 = vand.u32 4294901760, %v10454_v14  ;;  %v10475_v45 = vld [vmem:[#allocation32_spill] sm:$0xff]  ;;  %v10482_v15 = vld [vmem:[#allocation114_spill] sm:$0xff]  ;;  %v10495_v51 = vpack.c.bf16 %v10433_v12, %v10432_v41  ;;  %v10505_v41 = vld [vmem:[#allocation147_spill] sm:$0xff] }
 0x117   :  { %5791 = vmatprep.subr.bf16.mxu1 %v10464_v30  ;;  %v10471_v30 = vld [vmem:[#allocation27_spill] sm:$0xff]  ;;  %v10477_v4 = vpack.c.bf16 %v10475_v45, %v10476_v17  ;;  %v10493_v45 = vld [vmem:[#allocation133_spill] sm:$0xff]  ;;  %v10502_v17 = vpack.c.bf16 %v10328_v42, %v10327_v21  ;;  %v10504_v12 = vld [vmem:[#allocation146_spill] sm:$0xff]  ;;  %v5420_v52 = vpack.c.bf16 %v1822_v40, %v1810_v33  ;;  %v10513_v33 = vpack.c.bf16 %v10443_v1, %v7376_v32 }
 0x118   :  { %v8166_v39 = vsub.f32 %v10454_v14, %v10469_v19  ;;  %v10472_v6 = vpack.c.bf16 %v10423_v38, %v10471_v30  ;;  %v10474_v19 = vld [vmem:[#allocation109_spill] sm:$0xff]  ;;  %v10496_v14 = vld [vmem:[#allocation136_spill] sm:$0xff]  ;;  %v10497_v38 = vld [vmem:[#allocation138_spill] sm:$0xff]  ;;  %v1852_v40 = vand.u32 4294901760, %v8171_v49 }
 0x119   :  { %5409 = vmatpush1.bf16.msra.mxu0 %v5408_v3  ;;  %v10478_v3 = vand.u32 4294901760, %v10466_v54  ;;  %v10498_v30 = vld [vmem:[#allocation139_spill] sm:$0xff] }
 0x11a   :  { %5793 = vmatpush3.bf16.msra.mxu1 %v10472_v6  ;;  %5411 = vmatprep.subr.bf16.mxu0 %v5410_v5  ;;  %v10479_v6 = vld [vmem:[#allocation111_spill] sm:$0xff]  ;;  %v10481_v5 = vld [vmem:[#allocation113_spill] sm:$0xff]  ;;  %v1846_v28 = vand.u32 4294901760, %v8166_v39 }
 0x11b   :  { %5795 = vmatprep.subr.bf16.mxu1 %v10477_v4  ;;  %v1863_v18 = vsub.f32 %v10466_v54, %v10478_v3  ;;  %v10484_v4 = vld [vmem:[#allocation119_spill] sm:$0xff]  ;;  %v10506_v3 = vld [vmem:[#allocation148_spill] sm:$0xff] }
 0x11c   :  { %v10491_v54 = vld [vmem:[#allocation131_spill] sm:$0xff] }
 0x11d   :  { %5413 = vmatpush1.bf16.msra.mxu0 %v8080_v55  ;;  %v1840_v55 = vand.u32 4294901760, %v1839_v44  ;;  %v10508_v24 = vld [vmem:[#allocation151_spill] sm:$0xff]  ;;  %v1864_v39 = vand.u32 4294901760, %v1863_v18 }
 0x11e   :  { %5797 = vmatpush3.bf16.msra.mxu1 %v10495_v51  ;;  %5415 = vmatprep.subr.bf16.mxu0 %v5414_v59  ;;  %v10509_v60 = vld [vmem:[#allocation75_spill] sm:$0xff]  ;;  %v1834_v59 = vand.u32 4294901760, %v8157_v35  ;;  %v10512_v51 = vand.u32 4294901760, %v10474_v19  ;;  %v10514_v35 = vand.u32 4294901760, %v10479_v6 }
 0x11f   :  { %5799 = vmatprep.subr.bf16.mxu1 %v10502_v17  ;;  %v5804_v26 = vpack.c.bf16 %v10510_v58, %v10509_v60  ;;  %v10511_v17 = vand.u32 4294901760, %v10473_v25  ;;  %v5422_v7 = vpack.c.bf16 %v1840_v55, %v1828_v23  ;;  %v10519_v58 = vld [vmem:[#allocation105_spill] sm:$0xff]  ;;  %v10522_v55 = vand.u32 4294901760, %v10482_v15 }
 0x120   :  { %v1869_v42 = vsub.f32 %v10474_v19, %v10512_v51  ;;  %v5424_v49 = vpack.c.bf16 %v1846_v28, %v1834_v59  ;;  %v5426_v18 = vpack.c.bf16 %v1864_v39, %v1852_v40  ;;  %v10526_v28 = vand.u32 4294901760, %v10486_v0 }
 0x121   :  { %v1857_v44 = vsub.f32 %v10473_v25, %v10511_v17  ;;  %5417 = vmatpush1.bf16.msra.mxu0 %v8126_v47  ;;  %v1875_v17 = vsub.f32 %v10479_v6, %v10514_v35  ;;  %v10515_v25 = vand.u32 4294901760, %v10480_v36  ;;  %v10516_v47 = vpack.c.bf16 %v7412_v8, %v7400_v57  ;;  %v10520_v35 = vld [vmem:[#allocation93_spill] sm:$0xff] }
 0x122   :  { %5801 = vmatpush3.bf16.msra.mxu1 %v10513_v33  ;;  %5419 = vmatprep.subr.bf16.mxu0 %v8136_v13  ;;  %v10518_v33 = vld [vmem:[#allocation101_spill] sm:$0xff]  ;;  %v5808_v6 = vpack.c.bf16 %v10520_v35, %v10519_v58  ;;  %v10521_v8 = vand.u32 4294901760, %v10481_v5  ;;  %v9804_v39 = vand.u32 4294901760, %v10489_v20 }
 0x123   :  { %v1887_v51 = vsub.f32 %v10480_v36, %v10515_v25  ;;  %5803 = vmatprep.subr.bf16.mxu1 %v10516_v47  ;;  %v5806_v19 = vpack.c.bf16 %v10518_v33, %v10517_v53  ;;  %v1858_v13 = vand.u32 4294901760, %v1857_v44  ;;  %v1870_v36 = vand.u32 4294901760, %v1869_v42 }
 0x124   :  { %v1881_v23 = vsub.f32 %v10481_v5, %v10521_v8  ;;  %v1893_v47 = vsub.f32 %v10482_v15, %v10522_v55  ;;  %v1876_v33 = vand.u32 4294901760, %v1875_v17  ;;  %v10523_v25 = vand.u32 4294901760, %v10483_v11 }
 0x125   :  { %5421 = vmatpush1.bf16.msra.mxu0 %v5420_v52  ;;  %v1888_v35 = vand.u32 4294901760, %v1887_v51  ;;  %v10524_v44 = vand.u32 4294901760, %v10484_v4  ;;  %v10525_v52 = vand.u32 4294901760, %v10485_v63  ;;  %v9805_v51 = vand.u32 4294901760, %v10490_v22 }
 0x126   :  { %5805 = vmatpush3.bf16.msra.mxu1 %v5804_v26  ;;  %5423 = vmatprep.subr.bf16.mxu0 %v5422_v7  ;;  %v1899_v42 = vsub.f32 %v10483_v11, %v10523_v25  ;;  %v1917_v7 = vsub.f32 %v10486_v0, %v10526_v28  ;;  %v1882_v59 = vand.u32 4294901760, %v1881_v23  ;;  %v1894_v40 = vand.u32 4294901760, %v1893_v47  ;;  %v10530_v28 = vld [vmem:[#allocation87_spill] sm:$0xff] }
 0x127   :  { %5807 = vmatprep.subr.bf16.mxu1 %v5806_v19  ;;  %v1911_v8 = vsub.f32 %v10484_v4, %v10524_v44  ;;  %v1905_v26 = vsub.f32 %v10485_v63, %v10525_v52  ;;  %v5428_v19 = vpack.c.bf16 %v1870_v36, %v1858_v13  ;;  %v5430_v17 = vpack.c.bf16 %v1888_v35, %v1876_v33  ;;  %v10527_v52 = vld [vmem:[#allocation86_spill] sm:$0xff]  ;;  %v10531_v44 = vld [vmem:[#allocation12_spill] sm:$0xff] }
 0x128   :  { %v9806_v25 = vand.u32 4294901760, %v10491_v54  ;;  %v1900_v55 = vand.u32 4294901760, %v1899_v42  ;;  %v10528_v36 = vand.u32 4294901760, %v10487_v29  ;;  %v10529_v23 = vand.u32 4294901760, %v10488_v16 }
 0x129   :  { %5425 = vmatpush1.bf16.msra.mxu0 %v5424_v49  ;;  %v1912_v60 = vand.u32 4294901760, %v1911_v8  ;;  %v1906_v33 = vand.u32 4294901760, %v1905_v26  ;;  %v1918_v49 = vand.u32 4294901760, %v1917_v7  ;;  %v9809_v35 = vand.u32 4294901760, %v10493_v45 }
 0x12a   :  { %5809 = vmatpush3.bf16.msra.mxu1 %v5808_v6  ;;  %5427 = vmatprep.subr.bf16.mxu0 %v5426_v18  ;;  %v1923_v13 = vsub.f32 %v10487_v29, %v10528_v36  ;;  %v1935_v6 = vsub.f32 %v10488_v16, %v10529_v23  ;;  %v9808_v47 = vand.u32 4294901760, %v10494_v9  ;;  %v5432_v18 = vpack.c.bf16 %v1894_v40, %v1882_v59  ;;  %v10533_v23 = vld [vmem:[#allocation40_spill] sm:$0xff] }
 0x12b   :  { %5811 = vmatprep.subr.bf16.mxu1 %v10527_v52  ;;  %v1929_v42 = vsub.f32 %v10489_v20, %v9804_v39  ;;  %v1941_v26 = vsub.f32 %v10490_v22, %v9805_v51  ;;  %v1947_v7 = vsub.f32 %v10491_v54, %v9806_v25  ;;  %v10532_v59 = vand.u32 4294901760, %v10492_v46  ;;  %v10534_v25 = vld [vmem:[#allocation84_spill] sm:$0xff] }
 0x12c   :  { %v1924_v39 = vand.u32 4294901760, %v1923_v13  ;;  %v5436_v36 = vpack.c.bf16 %v1918_v49, %v1906_v33  ;;  %v1953_v8 = vsub.f32 %v10493_v45, %v9809_v35  ;;  %v1965_v51 = vsub.f32 %v10494_v9, %v9808_v47 }
 0x12d   :  { %3272 = vmatmul.mubr.f32.vlgmr.msra.gmra.mrb[6].mxu1 %v10530_v28  ;;  %5429 = vmatpush1.bf16.msra.mxu0 %v5428_v19  ;;  %v1959_v40 = vsub.f32 %v10492_v46, %v10532_v59  ;;  %v5434_v28 = vpack.c.bf16 %v1912_v60, %v1900_v55  ;;  %v1936_v19 = vand.u32 4294901760, %v1935_v6  ;;  %v10535_v54 = vand.u32 4294901760, %v10496_v14  ;;  %v10537_v6 = vld [vmem:[#allocation96_spill] sm:$0xff] }
 0x12e   :  { %5813 = vmatpush3.bf16.msra.mxu1 %v10531_v44  ;;  %5431 = vmatprep.subr.bf16.mxu0 %v5430_v17  ;;  %v10536_v59 = vand.u32 4294901760, %v10497_v38  ;;  %v1930_v33 = vand.u32 4294901760, %v1929_v42  ;;  %v1942_v49 = vand.u32 4294901760, %v1941_v26  ;;  %v1948_v47 = vand.u32 4294901760, %v1947_v7  ;;  %v10541_v7 = vld [vmem:[#allocation4_spill] sm:$0xff] }
 0x12f   :  { %5815 = vmatprep.subr.bf16.mxu1 %v10533_v23  ;;  %3376 = vmatprep.mubr.f32.mxu1 %v10534_v25  ;;  %v1971_v17 = vsub.f32 %v10496_v14, %v10535_v54  ;;  %v1960_v35 = vand.u32 4294901760, %v1959_v40  ;;  %v10538_v25 = vld [vmem:[#allocation70_spill] sm:$0xff]  ;;  %v5438_v45 = vpack.c.bf16 %v1936_v19, %v1924_v39  ;;  %v9815_v54 = vand.u32 4294901760, %v10500_v10 }
 0x130   :  { %v1983_v60 = vsub.f32 %v10497_v38, %v10536_v59  ;;  %v9814_v14 = vand.u32 4294901760, %v10501_v2  ;;  %v1954_v59 = vand.u32 4294901760, %v1953_v8  ;;  %v1966_v38 = vand.u32 4294901760, %v1965_v51  ;;  %v10542_v51 = vld [vmem:[#allocation22_spill] sm:$0xff] }
 0x131   :  { %5433 = vmatpush1.bf16.msra.mxu0 %v5432_v18  ;;  %v1972_v55 = vand.u32 4294901760, %v1971_v17  ;;  %v10539_v18 = vand.u32 4294901760, %v10498_v30  ;;  %v10540_v42 = vand.u32 4294901760, %v10499_v27  ;;  %v5440_v39 = vpack.c.bf16 %v1942_v49, %v1930_v33 }
 0x132   :  { %5817 = vmatpush3.bf16.msra.mxu1 %v10537_v6  ;;  %5435 = vmatprep.subr.bf16.mxu0 %v5434_v28  ;;  %v1984_v9 = vand.u32 4294901760, %v1983_v60  ;;  %v5442_v40 = vpack.c.bf16 %v1960_v35, %v1948_v47  ;;  %v9817_v28 = vand.u32 4294901760, %v10503_v31  ;;  %v9816_v8 = vand.u32 4294901760, %v10504_v12 }
 0x133   :  { %5819 = vmatprep.subr.bf16.mxu1 %v10538_v25  ;;  %v1977_v13 = vsub.f32 %v10498_v30, %v10539_v18  ;;  %v1989_v26 = vsub.f32 %v10499_v27, %v10540_v42  ;;  %v1995_v19 = vsub.f32 %v10500_v10, %v9815_v54  ;;  %v2007_v17 = vsub.f32 %v10501_v2, %v9814_v14 }
 0x134   :  { %v9820_v60 = vand.u32 4294901760, %v10506_v3  ;;  %v5444_v35 = vpack.c.bf16 %v1966_v38, %v1954_v59  ;;  %v5446_v47 = vpack.c.bf16 %v1984_v9, %v1972_v55  ;;  %v2001_v18 = vsub.f32 %v10503_v31, %v9817_v28  ;;  %v10544_v38 = vld [vmem:[#allocation33_spill] sm:$0xff] }
 0x135   :  { %5437 = vmatpush1.bf16.msra.mxu0 %v5436_v36  ;;  %v9818_v36 = vand.u32 4294901760, %v10505_v41  ;;  %v1978_v33 = vand.u32 4294901760, %v1977_v13  ;;  %v1990_v49 = vand.u32 4294901760, %v1989_v26  ;;  %v2013_v42 = vsub.f32 %v10504_v12, %v9816_v8 }
 0x136   :  { %5821 = vmatpush3.bf16.msra.mxu1 %v10541_v7  ;;  %5439 = vmatprep.subr.bf16.mxu0 %v5438_v45  ;;  %v10543_v45 = vld [vmem:[#allocation28_spill] sm:$0xff]  ;;  %v9821_v14 = vand.u32 4294901760, %v10507_v43  ;;  %v9823_v54 = vand.u32 4294901760, %v10508_v24  ;;  %v1996_v9 = vand.u32 4294901760, %v1995_v19  ;;  %v2008_v55 = vand.u32 4294901760, %v2007_v17 }
 0x137   :  { %5823 = vmatprep.subr.bf16.mxu1 %v10542_v51  ;;  %v2019_v13 = vsub.f32 %v10505_v41, %v9818_v36  ;;  %v2031_v59 = vsub.f32 %v10506_v3, %v9820_v60  ;;  %v5448_v26 = vpack.c.bf16 %v1990_v49, %v1978_v33  ;;  %v2002_v8 = vand.u32 4294901760, %v2001_v18  ;;  %v10546_v17 = vld [vmem:[#allocation48_spill] sm:$0xff] }
 0x138   :  { %v2014_v28 = vand.u32 4294901760, %v2013_v42  ;;  %v2037_v19 = vsub.f32 %v10508_v24, %v9823_v54  ;;  %v5450_v36 = vpack.c.bf16 %v2008_v55, %v1996_v9  ;;  %v10548_v42 = vld [vmem:[#allocation60_spill] sm:$0xff]  ;;  %v10551_v9 = vld [vmem:[#allocation89_spill] sm:$0xff] }
 0x139   :  { %5441 = vmatpush1.bf16.msra.mxu0 %v5440_v39  ;;  %v10545_v39 = vld [vmem:[#allocation38_spill] sm:$0xff]  ;;  %v2020_v41 = vand.u32 4294901760, %v2019_v13  ;;  %v2032_v60 = vand.u32 4294901760, %v2031_v59  ;;  %v10552_v55 = vand.u32 4294901760, %v10551_v9  ;;  %v10553_v13 = vld [vmem:[#allocation91_spill] sm:$0xff]  ;;  %v10565_v9 = vpack.c.bf16 %v10366_v37, %v10365_v50 }
 0x13a   :  { %5825 = vmatpush3.bf16.msra.mxu1 %v10543_v45  ;;  %5443 = vmatprep.subr.bf16.mxu0 %v5442_v40  ;;  %v2025_v40 = vsub.f32 %v10507_v43, %v9821_v14  ;;  %v5452_v33 = vpack.c.bf16 %v2014_v28, %v2002_v8  ;;  %v2038_v18 = vand.u32 4294901760, %v2037_v19  ;;  %v10549_v43 = vld [vmem:[#allocation71_spill] sm:$0xff]  ;;  %v10554_v59 = vand.u32 4294901760, %v10553_v13  ;;  %v10555_v28 = vld [vmem:[#allocation88_spill] sm:$0xff]  ;;  %v10556_v8 = vld [vmem:[#allocation13_spill] sm:$0xff] }
 0x13b   :  { %5827 = vmatprep.subr.bf16.mxu1 %v10544_v38  ;;  %v5454_v14 = vpack.c.bf16 %v2032_v60, %v2020_v41  ;;  %v10560_v60 = vpack.c.bf16 %v10360_v48, %v10359_v56  ;;  %v10567_v13 = vld [vmem:[#allocation64_spill] sm:$0xff]  ;;  %v10592_v37 = vld [vmem:[#allocation3_spill] sm:$0xff]  ;;  %v10593_v50 = vld [vmem:[#allocation2_spill] sm:$0xff] }
 0x13c   :  { %v2026_v49 = vand.u32 4294901760, %v2025_v40  ;;  %v10558_v40 = vld [vmem:[#allocation14_spill] sm:$0xff] }
 0x13d   :  { %5445 = vmatpush1.bf16.msra.mxu0 %v5444_v35  ;;  %v10547_v35 = vld [vmem:[#allocation53_spill] sm:$0xff]  ;;  %v10559_v19 = vand.u32 4294901760, %v10558_v40 }
 0x13e   :  { %5829 = vmatpush3.bf16.msra.mxu1 %v10545_v39  ;;  %5447 = vmatprep.subr.bf16.mxu0 %v5446_v47  ;;  %v5456_v54 = vpack.c.bf16 %v2038_v18, %v2026_v49  ;;  %v10550_v47 = vld [vmem:[#allocation85_spill] sm:$0xff]  ;;  %v10563_v18 = vld [vmem:[#allocation92_spill] sm:$0xff] }
 0x13f   :  { %5831 = vmatprep.subr.bf16.mxu1 %v10546_v17 }
 0x141   :  { %5449 = vmatpush1.bf16.msra.mxu0 %v5448_v26  ;;  %v5842_v26 = vpack.c.bf16 %v10554_v59, %v10552_v55  ;;  %v10566_v55 = vand.u32 4294901760, %v10396_v62  ;;  %v10568_v59 = vand.u32 4294901760, %v10567_v13 }
 0x142   :  { %5833 = vmatpush3.bf16.msra.mxu1 %v10547_v35  ;;  %5451 = vmatprep.subr.bf16.mxu0 %v5450_v36  ;;  %v10557_v36 = vand.u32 4294901760, %v10556_v8 }
 0x143   :  { %5835 = vmatprep.subr.bf16.mxu1 %v10548_v42  ;;  %v5848_v8 = vpack.c.bf16 %v10568_v59, %v10566_v55  ;;  %v10581_v55 = vld [vmem:[#allocation5_spill] sm:$0xff]  ;;  %v10583_v59 = vld [vmem:[#allocation6_spill] sm:$0xff] }
 0x144   :  { %v5844_v41 = vpack.c.bf16 %v10559_v19, %v10557_v36  ;;  %v10570_v36 = vld [vmem:[#allocation18_spill] sm:$0xff]  ;;  %v10574_v19 = vld [vmem:[#allocation73_spill] sm:$0xff]  ;;  %v10582_v13 = vand.u32 4294901760, %v10581_v55  ;;  %v10597_v55 = vld [vmem:[#allocation24_spill] sm:$0xff] }
 0x145   :  { %5453 = vmatpush1.bf16.msra.mxu0 %v5452_v33  ;;  %v10562_v33 = vand.u32 4294901760, %v10395_v34  ;;  %v10572_v34 = vld [vmem:[#allocation72_spill] sm:$0xff] }
 0x146   :  { %5837 = vmatpush3.bf16.msra.mxu1 %v10549_v43  ;;  %5455 = vmatprep.subr.bf16.mxu0 %v5454_v14  ;;  %v10561_v14 = vand.u32 4294901760, %v10394_v61  ;;  %v10573_v40 = vand.u32 4294901760, %v10572_v34 }
 0x147   :  { %5839 = vmatprep.subr.bf16.mxu1 %v10550_v47 }
 0x148   :  { %v5846_v49 = vpack.c.bf16 %v10562_v33, %v10561_v14  ;;  %v10576_v33 = vld [vmem:[#allocation76_spill] sm:$0xff] }
 0x149   :  { %5457 = vmatpush1.bf16.msra.mxu0 %v5456_v54  ;;  %v10564_v54 = vld [vmem:[#allocation83_spill] sm:$0xff] }
 0x14a   :  { %5841 = vmatpush3.bf16.msra.mxu1 %v10555_v28  ;;  %5459 = vmatprep.subr.bf16.mxu0 %v10560_v60  ;;  %v10575_v60 = vand.u32 4294901760, %v10574_v19 }
 0x14b   :  { %5843 = vmatprep.subr.bf16.mxu1 %v5842_v26  ;;  %v10569_v26 = vld [vmem:[#allocation19_spill] sm:$0xff] }
 0x14c   :  { %2043 = vmatmul.mubr.f32.vlgmr.msra.gmra.mrb[0].mxu0 %v10564_v54  ;;  %v10571_v61 = vpack.c.bf16 %v10569_v26, %v10570_v36  ;;  %v5850_v14 = vpack.c.bf16 %v10575_v60, %v10573_v40  ;;  %v10584_v54 = vand.u32 4294901760, %v10583_v59  ;;  %v10586_v26 = vld [vmem:[#allocation67_spill] sm:$0xff]  ;;  %v10590_v60 = vld [vmem:[#allocation16_spill] sm:$0xff]  ;;  %v10598_v59 = vand.u32 4294901760, %v10597_v55 }
 0x14d   :  { %3380 = vmatmul.mubr.f32.vlgmr.msra.gmra.mrb[8].mxu1 %v10563_v18  ;;  %5461 = vmatpush1.bf16.msra.mxu0 %v10565_v9  ;;  %v10577_v18 = vld [vmem:[#allocation118_spill] sm:$0xff]  ;;  %v10588_v40 = vld [vmem:[#allocation23_spill] sm:$0xff]  ;;  %v10591_v36 = vand.u32 4294901760, %v10590_v60 }
 0x14e   :  { %5845 = vmatpush3.bf16.msra.mxu1 %v5844_v41  ;;  %5463 = vmatprep.subr.bf16.mxu0 %v10571_v61  ;;  %v10578_v41 = vld [vmem:[#allocation55_spill] sm:$0xff]  ;;  %v10579_v9 = vld [vmem:[#allocation54_spill] sm:$0xff]  ;;  %v5852_v61 = vpack.c.bf16 %v10584_v54, %v10582_v13  ;;  %v10589_v19 = vand.u32 4294901760, %v10588_v40  ;;  %v10604_v40 = vld [vmem:[#allocation32_spill] sm:$0xff] }
 0x14f   :  { %5847 = vmatprep.subr.bf16.mxu1 %v5846_v49  ;;  %3546 = vmatprep.mubr.f32.mxu1 %v10576_v33  ;;  %v10580_v62 = vpack.c.bf16 %v10578_v41, %v10579_v9  ;;  %v10585_v49 = vld [vmem:[#allocation69_spill] sm:$0xff]  ;;  %v10594_v41 = vpack.c.bf16 %v10592_v37, %v10593_v50  ;;  %v10599_v13 = vld [vmem:[#allocation15_spill] sm:$0xff]  ;;  %v10600_v9 = vld [vmem:[#allocation8_spill] sm:$0xff]  ;;  %v10605_v60 = vand.u32 4294901760, %v10604_v40 }
 0x150   :  { %2243 = vmatprep.mubr.f32.mxu0 %v10577_v18  ;;  %v10587_v34 = vpack.c.bf16 %v10585_v49, %v10586_v26  ;;  %v5854_v18 = vpack.c.bf16 %v10591_v36, %v10589_v19  ;;  %v10601_v49 = vpack.c.bf16 %v10599_v13, %v10600_v9  ;;  %v10606_v19 = vld [vmem:[#allocation21_spill] sm:$0xff]  ;;  %v10614_v50 = vld [vmem:[#allocation30_spill] sm:$0xff]  ;;  %v10619_v40 = vld [vmem:[#allocation35_spill] sm:$0xff] }
 0x151   :  { %5465 = vmatpush1.bf16.msra.mxu0 %v10580_v62  ;;  %v10607_v26 = vld [vmem:[#allocation25_spill] sm:$0xff] }
 0x152   :  { %5849 = vmatpush3.bf16.msra.mxu1 %v5848_v8  ;;  %5467 = vmatprep.subr.bf16.mxu0 %v10587_v34  ;;  %v10595_v8 = vld [vmem:[#allocation27_spill] sm:$0xff]  ;;  %v10608_v37 = vpack.c.bf16 %v10606_v19, %v10607_v26 }
 0x153   :  { %5851 = vmatprep.subr.bf16.mxu1 %v5850_v14  ;;  %v10596_v62 = vand.u32 4294901760, %v10595_v8  ;;  %v10602_v14 = vld [vmem:[#allocation34_spill] sm:$0xff]  ;;  %v10611_v8 = vld [vmem:[#allocation41_spill] sm:$0xff] }
 0x154   :  { %v10603_v34 = vand.u32 4294901760, %v10602_v14  ;;  %v10612_v55 = vand.u32 4294901760, %v10611_v8  ;;  %v10625_v8 = vld [vmem:[#allocation45_spill] sm:$0xff] }
 0x155   :  { %5469 = vmatpush1.bf16.msra.mxu0 %v10594_v41  ;;  %v5856_v54 = vpack.c.bf16 %v10598_v59, %v10596_v62  ;;  %v10609_v41 = vld [vmem:[#allocation39_spill] sm:$0xff]  ;;  %v10613_v59 = vld [vmem:[#allocation29_spill] sm:$0xff] }
 0x156   :  { %5853 = vmatpush3.bf16.msra.mxu1 %v5852_v61  ;;  %5471 = vmatprep.subr.bf16.mxu0 %v10601_v49  ;;  %v5858_v36 = vpack.c.bf16 %v10605_v60, %v10603_v34  ;;  %v10610_v61 = vand.u32 4294901760, %v10609_v41  ;;  %v10615_v13 = vpack.c.bf16 %v10613_v59, %v10614_v50  ;;  %v10617_v49 = vld [vmem:[#allocation47_spill] sm:$0xff]  ;;  %v10620_v60 = vld [vmem:[#allocation36_spill] sm:$0xff] }
 0x157   :  { %5855 = vmatprep.subr.bf16.mxu1 %v5854_v18  ;;  %v10616_v18 = vand.u32 4294901760, %v10327_v21  ;;  %v10618_v14 = vand.u32 4294901760, %v10617_v49  ;;  %v10621_v19 = vpack.c.bf16 %v10619_v40, %v10620_v60  ;;  %v10627_v21 = vand.u32 4294901760, %v7400_v57  ;;  %v10630_v49 = vld [vmem:[#allocation50_spill] sm:$0xff]  ;;  %v10638_v60 = vld [vmem:[#allocation56_spill] sm:$0xff] }
 0x158   :  { %v5860_v62 = vpack.c.bf16 %v10612_v55, %v10610_v61  ;;  %v10624_v61 = vld [vmem:[#allocation44_spill] sm:$0xff]  ;;  %v10640_v57 = vand.u32 4294901760, %v10517_v53  ;;  %v10653_v53 = vld [vmem:[#allocation103_spill] sm:$0xff] }
 0x159   :  { %5473 = vmatpush1.bf16.msra.mxu0 %v10608_v37  ;;  %v5862_v34 = vpack.c.bf16 %v10618_v14, %v10616_v18  ;;  %v10622_v37 = vand.u32 4294901760, %v7376_v32  ;;  %v10626_v55 = vpack.c.bf16 %v10624_v61, %v10625_v8  ;;  %v10631_v14 = vld [vmem:[#allocation51_spill] sm:$0xff] }
 0x15a   :  { %5857 = vmatpush3.bf16.msra.mxu1 %v5856_v54  ;;  %5475 = vmatprep.subr.bf16.mxu0 %v10615_v13  ;;  %v10623_v54 = vand.u32 4294901760, %v10443_v1  ;;  %v10628_v13 = vld [vmem:[#allocation59_spill] sm:$0xff]  ;;  %v10632_v40 = vpack.c.bf16 %v10630_v49, %v10631_v14 }
 0x15b   :  { %5859 = vmatprep.subr.bf16.mxu1 %v5858_v36  ;;  %v10629_v36 = vand.u32 4294901760, %v10628_v13  ;;  %v10643_v13 = vld [vmem:[#allocation68_spill] sm:$0xff] }
 0x15c   :  { %v5864_v41 = vpack.c.bf16 %v10623_v54, %v10622_v37  ;;  %v10637_v54 = vld [vmem:[#allocation61_spill] sm:$0xff] }
 0x15d   :  { %5477 = vmatpush1.bf16.msra.mxu0 %v10621_v19  ;;  %v5866_v18 = vpack.c.bf16 %v10629_v36, %v10627_v21  ;;  %v10633_v19 = vld [vmem:[#allocation75_spill] sm:$0xff]  ;;  %v10639_v61 = vpack.c.bf16 %v10637_v54, %v10638_v60  ;;  %v10644_v36 = vld [vmem:[#allocation65_spill] sm:$0xff] }
 0x15e   :  { %5861 = vmatpush3.bf16.msra.mxu1 %v5860_v62  ;;  %5479 = vmatprep.subr.bf16.mxu0 %v10626_v55  ;;  %v10634_v32 = vand.u32 4294901760, %v10633_v19  ;;  %v10635_v62 = vld [vmem:[#allocation74_spill] sm:$0xff]  ;;  %v10645_v49 = vpack.c.bf16 %v10643_v13, %v10644_v36 }
 0x15f   :  { %5863 = vmatprep.subr.bf16.mxu1 %v5862_v34  ;;  %v10636_v1 = vand.u32 4294901760, %v10635_v62  ;;  %v10641_v34 = vld [vmem:[#allocation101_spill] sm:$0xff]  ;;  %v10649_v62 = vld [vmem:[#allocation99_spill] sm:$0xff]  ;;  %v10745_v36 = vld [vmem:[#allocation106_spill] sm:$0xff] }
 0x160   :  { %v10642_v55 = vand.u32 4294901760, %v10641_v34  ;;  %v10656_v34 = vld [vmem:[#allocation107_spill] sm:$0xff] }
 0x161   :  { %5481 = vmatpush1.bf16.msra.mxu0 %v10632_v40  ;;  %v5868_v37 = vpack.c.bf16 %v10636_v1, %v10634_v32  ;;  %v10646_v40 = vand.u32 4294901760, %v10519_v58  ;;  %v10650_v1 = vld [vmem:[#allocation98_spill] sm:$0xff] }
 0x162   :  { %5865 = vmatpush3.bf16.msra.mxu1 %v5864_v41  ;;  %5483 = vmatprep.subr.bf16.mxu0 %v10639_v61  ;;  %v5870_v21 = vpack.c.bf16 %v10642_v55, %v10640_v57  ;;  %v10647_v41 = vld [vmem:[#allocation93_spill] sm:$0xff]  ;;  %v10651_v54 = vpack.c.bf16 %v10649_v62, %v10650_v1  ;;  %v10652_v61 = vld [vmem:[#allocation104_spill] sm:$0xff]  ;;  %v10658_v58 = vld [vmem:[#allocation78_spill] sm:$0xff] }
 0x163   :  { %5867 = vmatprep.subr.bf16.mxu1 %v5866_v18  ;;  %v10648_v19 = vand.u32 4294901760, %v10647_v41  ;;  %v10654_v18 = vpack.c.bf16 %v10652_v61, %v10653_v53  ;;  %v10655_v57 = vld [vmem:[#allocation108_spill] sm:$0xff]  ;;  %v10714_v61 = vld [vmem:[#allocation46_spill] sm:$0xff] }
 0x164   :  { %v10657_v55 = vpack.c.bf16 %v10655_v57, %v10656_v34 }
 0x165   :  { %5485 = vmatpush1.bf16.msra.mxu0 %v10645_v49  ;;  %v5872_v32 = vpack.c.bf16 %v10648_v19, %v10646_v40  ;;  %v10659_v49 = vld [vmem:[#allocation109_spill] sm:$0xff]  ;;  %v10665_v19 = vpack.c.bf16 %v10482_v15, %v10481_v5  ;;  %v10698_v15 = vld [vmem:[#allocation66_spill] sm:$0xff] }
 0x166   :  { %5869 = vmatpush3.bf16.msra.mxu1 %v5868_v37  ;;  %5487 = vmatprep.subr.bf16.mxu0 %v10651_v54  ;;  %v10660_v37 = vld [vmem:[#allocation95_spill] sm:$0xff]  ;;  %v10662_v54 = vld [vmem:[#allocation112_spill] sm:$0xff] }
 0x167   :  { %5871 = vmatprep.subr.bf16.mxu1 %v5870_v21  ;;  %v10661_v40 = vpack.c.bf16 %v10659_v49, %v10660_v37  ;;  %v10663_v21 = vld [vmem:[#allocation111_spill] sm:$0xff] }
 0x168   :  { %v10664_v41 = vpack.c.bf16 %v10662_v54, %v10663_v21  ;;  %v8698_v21 = vld [vmem:[%s9389_s1 + $0x580] sm:$0xff] }
 0x169   :  { %5489 = vmatpush1.bf16.msra.mxu0 %v10654_v18 }
 0x16a   :  { %5873 = vmatpush3.bf16.msra.mxu1 %v5872_v32  ;;  %5491 = vmatprep.subr.bf16.mxu0 %v10657_v55  ;;  %v10672_v32 = vld [vmem:[#allocation135_spill] sm:$0xff]  ;;  %v10675_v55 = vld [vmem:[#allocation138_spill] sm:$0xff] }
 0x16b   :  { %5875 = vmatprep.subr.bf16.mxu1 %v10527_v52  ;;  %v10666_v52 = vpack.c.bf16 %v10484_v4, %v10483_v11 }
 0x16d   :  { %3548 = vmatmul.mubr.f32.vlgmr.msra.gmra.mrb[10].mxu1 %v10658_v58  ;;  %5493 = vmatpush1.bf16.msra.mxu0 %v10661_v40 }
 0x16e   :  { %5877 = vmatpush3.bf16.msra.mxu1 %v10531_v44  ;;  %5495 = vmatprep.subr.bf16.mxu0 %v10664_v41  ;;  %v10667_v44 = vpack.c.bf16 %v10486_v0, %v10485_v63  ;;  %v10678_v41 = vpack.c.bf16 %v10499_v27, %v10498_v30  ;;  %v10695_v0 = vld [vmem:[#allocation120_spill] sm:$0xff]  ;;  %v10696_v63 = vld [vmem:[#allocation43_spill] sm:$0xff] }
 0x16f   :  { %5879 = vmatprep.subr.bf16.mxu1 %v10533_v23  ;;  %3650 = vmatprep.mubr.f32.mxu1 %v10576_v33  ;;  %v10668_v23 = vpack.c.bf16 %v10488_v16, %v10487_v29  ;;  %v188_v16 = vld [vmem:[%s9389_s1 + $0x550] sm:$0xff]  ;;  %v10694_v29 = vld [vmem:[#allocation125_spill] sm:$0xff] }
 0x171   :  { %5497 = vmatpush1.bf16.msra.mxu0 %v10665_v19 }
 0x172   :  { %5881 = vmatpush3.bf16.msra.mxu1 %v10537_v6  ;;  %5499 = vmatprep.subr.bf16.mxu0 %v10666_v52  ;;  %v10669_v6 = vpack.c.bf16 %v10490_v22, %v10489_v20  ;;  %v8569_v52 = vld [vmem:[%s9389_s1 + $0x310] sm:$0xff] }
 0x173   :  { %5883 = vmatprep.subr.bf16.mxu1 %v10538_v25  ;;  %v10670_v25 = vld [vmem:[#allocation131_spill] sm:$0xff] }
 0x174   :  { %v10671_v33 = vpack.c.bf16 %v10492_v46, %v10670_v25  ;;  %v10692_v46 = vld [vmem:[#allocation17_spill] sm:$0xff] }
 0x175   :  { %5501 = vmatpush1.bf16.msra.mxu0 %v10667_v44  ;;  %v8574_v44 = vld [vmem:[%s9389_s1 + $0x328] sm:$0xff] }
 0x176   :  { %5885 = vmatpush3.bf16.msra.mxu1 %v10541_v7  ;;  %5503 = vmatprep.subr.bf16.mxu0 %v10668_v23  ;;  %v10673_v7 = vld [vmem:[#allocation133_spill] sm:$0xff]  ;;  %v10680_v23 = vpack.c.bf16 %v10504_v12, %v10503_v31 }
 0x177   :  { %5887 = vmatprep.subr.bf16.mxu1 %v10542_v51  ;;  %v10674_v18 = vpack.c.bf16 %v10672_v32, %v10673_v7  ;;  %v10676_v51 = vld [vmem:[#allocation136_spill] sm:$0xff] }
 0x178   :  { %v10677_v40 = vpack.c.bf16 %v10675_v55, %v10676_v51  ;;  %v10690_v55 = vld [vmem:[#allocation9_spill] sm:$0xff] }
 0x179   :  { %5505 = vmatpush1.bf16.msra.mxu0 %v10669_v6  ;;  %v3658_v6 = vand.u32 4294901760, %v8569_v52 }
 0x17a   :  { %5889 = vmatpush3.bf16.msra.mxu1 %v10543_v45  ;;  %5507 = vmatprep.subr.bf16.mxu0 %v10671_v33  ;;  %v8549_v45 = vld [vmem:[%s9389_s1 + $0x490] sm:$0xff]  ;;  %v3661_v33 = vand.u32 4294901760, %v8574_v44 }
 0x17b   :  { %5891 = vmatprep.subr.bf16.mxu1 %v10544_v38  ;;  %v8554_v38 = vld [vmem:[%s9389_s1 + $0x4a8] sm:$0xff]  ;;  %v8693_v54 = vsub.f32 %v8569_v52, %v3658_v6 }
 0x17c   :  { %v9826_v19 = vand.u32 4294901760, %v8554_v38 }
 0x17d   :  { %5509 = vmatpush1.bf16.msra.mxu0 %v10674_v18  ;;  %v10681_v18 = vld [vmem:[#allocation147_spill] sm:$0xff] }
 0x17e   :  { %5893 = vmatpush3.bf16.msra.mxu1 %v10545_v39  ;;  %5511 = vmatprep.subr.bf16.mxu0 %v10677_v40  ;;  %v10679_v39 = vpack.c.bf16 %v10501_v2, %v10500_v10  ;;  %v10682_v40 = vpack.c.bf16 %v10506_v3, %v10681_v18  ;;  %v8624_v18 = vpack.c.bf16 %v3661_v33, %v3658_v6  ;;  %v10687_v2 = vld [vmem:[#allocation79_spill] sm:$0xff]  ;;  %v10702_v6 = vld [vmem:[#allocation77_spill] sm:$0xff] }
 0x17f   :  { %5895 = vmatprep.subr.bf16.mxu1 %v10546_v17  ;;  %v9827_v17 = vand.u32 4294901760, %v8549_v45 }
 0x180   :  { %10686 = vst [vmem:[#allocation63_spill] sm:$0xff] %v8624_v18 }
 0x181   :  { %5513 = vmatpush1.bf16.msra.mxu0 %v10678_v41  ;;  %v8600_v41 = vpack.c.bf16 %v9826_v19, %v9827_v17  ;;  %v8618_v19 = vld [vmem:[%s9389_s1 + $0x508] sm:$0xff]  ;;  %v10684_v17 = vld [vmem:[#allocation150_spill] sm:$0xff] }
 0x182   :  { %5897 = vmatpush3.bf16.msra.mxu1 %v10547_v35  ;;  %5515 = vmatprep.subr.bf16.mxu0 %v10679_v39  ;;  %v8579_v35 = vld [vmem:[%s9389_s1 + $0x4c0] sm:$0xff]  ;;  %v10685_v3 = vpack.c.bf16 %v10508_v24, %v10684_v17  ;;  %v3721_v30 = vand.u32 4294901760, %v8618_v19  ;;  %v185_v24 = vld [vmem:[%s9389_s1 + $0x538] sm:$0xff]  ;;  %v10689_v17 = vld [vmem:[#allocation152_spill] sm:$0xff] }
 0x183   :  { %5899 = vmatprep.subr.bf16.mxu1 %v10548_v42  ;;  %v8584_v42 = vld [vmem:[%s9389_s1 + $0x4d8] sm:$0xff]  ;;  %10683 = vst [vmem:[#allocation42_spill] sm:$0xff] %v8600_v41  ;;  %v3712_v39 = vand.u32 4294901760, %v8579_v35  ;;  %v3727_v20 = vand.u32 4294901760, %v185_v24 }
 0x185   :  { %5517 = vmatpush1.bf16.msra.mxu0 %v10680_v23  ;;  %v122_v23 = vld [vmem:[%s9389_s1 + $0x340] sm:$0xff] }
 0x186   :  { %5901 = vmatpush3.bf16.msra.mxu1 %v10549_v43  ;;  %5519 = vmatprep.subr.bf16.mxu0 %v10682_v40  ;;  %v3715_v43 = vand.u32 4294901760, %v8584_v42  ;;  %v125_v40 = vld [vmem:[%s9389_s1 + $0x358] sm:$0xff]  ;;  %v3664_v12 = vand.u32 4294901760, %v122_v23 }
 0x187   :  { %5903 = vmatprep.subr.bf16.mxu1 %v10550_v47  ;;  %v8613_v47 = vld [vmem:[%s9389_s1 + $0x4f0] sm:$0xff]  ;;  %v3667_v31 = vand.u32 4294901760, %v125_v40 }
 0x188   :  { %v8628_v10 = vpack.c.bf16 %v3715_v43, %v3712_v39  ;;  %v3718_v27 = vand.u32 4294901760, %v8613_v47 }
 0x189   :  { %5521 = vmatpush1.bf16.msra.mxu0 %v10685_v3  ;;  %v128_v3 = vld [vmem:[%s9389_s1 + $0x370] sm:$0xff]  ;;  %v8648_v51 = vpack.c.bf16 %v3667_v31, %v3664_v12  ;;  %v8716_v52 = vsub.f32 %v125_v40, %v3667_v31 }
 0x18a   :  { %5905 = vmatpush3.bf16.msra.mxu1 %v10555_v28  ;;  %5523 = vmatprep.subr.bf16.mxu0 %v10687_v2  ;;  %10688 = vst [vmem:[#allocation58_spill] sm:$0xff] %v8628_v10  ;;  %v131_v28 = vld [vmem:[%s9389_s1 + $0x388] sm:$0xff]  ;;  %v182_v2 = vld [vmem:[%s9389_s1 + $0x520] sm:$0xff]  ;;  %v3670_v32 = vand.u32 4294901760, %v128_v3  ;;  %v8652_v25 = vpack.c.bf16 %v3721_v30, %v3718_v27  ;;  %v8733_v31 = vsub.f32 %v8613_v47, %v3718_v27  ;;  %v8753_v27 = vld [vmem:[%s9389_s1 + $0x5b0] sm:$0xff] }
 0x18b   :  { %5907 = vmatprep.subr.bf16.mxu1 %v8600_v41  ;;  %10691 = vst [vmem:[#allocation80_spill] sm:$0xff] %v8648_v51  ;;  %v3673_v7 = vand.u32 4294901760, %v131_v28  ;;  %v3724_v22 = vand.u32 4294901760, %v182_v2  ;;  %v8703_v41 = vld [vmem:[%s9389_s1 + $0x598] sm:$0xff]  ;;  %v8758_v47 = vld [vmem:[%s9389_s1 + $0x5c8] sm:$0xff] }
 0x18c   :  { %2246 = vmatmul.mubr.f32.vlgmr.msra.gmra.mrb[0].mxu0 %v10689_v17  ;;  %10693 = vst [vmem:[#allocation100_spill] sm:$0xff] %v8652_v25 }
 0x18d   :  { %3652 = vmatmul.mubr.f32.vlgmr.msra.gmra.mrb[12].mxu1 %v10658_v58  ;;  %5525 = vmatpush1.bf16.msra.mxu0 %v10690_v55  ;;  %v134_v58 = vld [vmem:[%s9389_s1 + $0x3a0] sm:$0xff]  ;;  %v137_v55 = vld [vmem:[%s9389_s1 + $0x3b8] sm:$0xff]  ;;  %v8670_v4 = vpack.c.bf16 %v3673_v7, %v3670_v32  ;;  %v8674_v5 = vpack.c.bf16 %v3727_v20, %v3724_v22  ;;  %v8746_v40 = vsub.f32 %v131_v28, %v3673_v7  ;;  %v10708_v28 = vld [vmem:[#allocation31_spill] sm:$0xff] }
 0x18e   :  { %5909 = vmatpush3.bf16.msra.mxu1 %v8624_v18  ;;  %5527 = vmatprep.subr.bf16.mxu0 %v10692_v46  ;;  %v191_v46 = vld [vmem:[%s9389_s1 + $0x568] sm:$0xff]  ;;  %v3676_v11 = vand.u32 4294901760, %v134_v58  ;;  %v3730_v18 = vand.u32 4294901760, %v188_v16 }
 0x18f   :  { %5911 = vmatprep.subr.bf16.mxu1 %v8628_v10  ;;  %3758 = vmatprep.mubr.f32.mxu1 %v10694_v29  ;;  %10697 = vst [vmem:[#allocation105_spill] sm:$0xff] %v8670_v4  ;;  %v3679_v10 = vand.u32 4294901760, %v137_v55  ;;  %10699 = vst [vmem:[#allocation86_spill] sm:$0xff] %v8674_v5  ;;  %v3733_v17 = vand.u32 4294901760, %v191_v46  ;;  %v140_v29 = vld [vmem:[%s9389_s1 + $0x3d0] sm:$0xff] }
 0x190   :  { %2383 = vmatprep.mubr.f32.mxu0 %v10695_v0  ;;  %v3682_v37 = vand.u32 4294901760, %v140_v29 }
 0x191   :  { %5529 = vmatpush1.bf16.msra.mxu0 %v10696_v63  ;;  %v143_v63 = vld [vmem:[%s9389_s1 + $0x3e8] sm:$0xff]  ;;  %v8720_v49 = vpack.c.bf16 %v3679_v10, %v3676_v11 }
 0x192   :  { %5913 = vmatpush3.bf16.msra.mxu1 %v8648_v51  ;;  %5531 = vmatprep.subr.bf16.mxu0 %v10698_v15  ;;  %v10700_v51 = vand.u32 4294901760, %v8549_v45  ;;  %v10701_v15 = vand.u32 4294901760, %v8554_v38  ;;  %v3685_v57 = vand.u32 4294901760, %v143_v63 }
 0x193   :  { %5915 = vmatprep.subr.bf16.mxu1 %v8652_v25  ;;  %10703 = vst [vmem:[#allocation87_spill] sm:$0xff] %v8720_v49 }
 0x194   :  { %v8685_v0 = vsub.f32 %v8549_v45, %v10700_v51  ;;  %v8690_v25 = vsub.f32 %v8554_v38, %v10701_v15  ;;  %v8706_v51 = vsub.f32 %v8574_v44, %v3661_v33  ;;  %v8709_v45 = vsub.f32 %v8579_v35, %v3712_v39  ;;  %v8725_v44 = vld [vmem:[%s9389_s1 + $0x400] sm:$0xff]  ;;  %v10704_v35 = vld [vmem:[#allocation7_spill] sm:$0xff] }
 0x195   :  { %v8712_v15 = vsub.f32 %v8584_v42, %v3715_v43  ;;  %v8714_v38 = vsub.f32 %v122_v23, %v3664_v12  ;;  %5533 = vmatpush1.bf16.msra.mxu0 %v10702_v6  ;;  %v8730_v12 = vld [vmem:[%s9389_s1 + $0x418] sm:$0xff]  ;;  %v8737_v42 = vpack.c.bf16 %v3733_v17, %v3730_v18  ;;  %v3736_v33 = vand.u32 4294901760, %v8698_v21 }
 0x196   :  { %5917 = vmatpush3.bf16.msra.mxu1 %v8670_v4  ;;  %5535 = vmatprep.subr.bf16.mxu0 %v10704_v35  ;;  %v3739_v39 = vand.u32 4294901760, %v8703_v41  ;;  %v8742_v43 = vsub.f32 %v8618_v19, %v3721_v30  ;;  %v8744_v23 = vsub.f32 %v128_v3, %v3670_v32  ;;  %v8748_v6 = vsub.f32 %v182_v2, %v3724_v22  ;;  %v8769_v2 = vld [vmem:[%s9389_s1 + $0x430] sm:$0xff]  ;;  %v8774_v22 = vld [vmem:[%s9389_s1 + $0x448] sm:$0xff]  ;;  %v10706_v19 = vld [vmem:[#allocation26_spill] sm:$0xff] }
 0x197   :  { %5919 = vmatprep.subr.bf16.mxu1 %v8674_v5  ;;  %10705 = vst [vmem:[#allocation12_spill] sm:$0xff] %v8737_v42  ;;  %v8760_v35 = vsub.f32 %v185_v24, %v3727_v20  ;;  %v8762_v30 = vsub.f32 %v134_v58, %v3676_v11  ;;  %v3688_v32 = vand.u32 4294901760, %v8725_v44  ;;  %v3691_v7 = vand.u32 4294901760, %v8730_v12  ;;  %v10711_v24 = vld [vmem:[#allocation37_spill] sm:$0xff] }
 0x198   :  { %v8778_v11 = vsub.f32 %v137_v55, %v3679_v10  ;;  %v8780_v20 = vpack.c.bf16 %v3685_v57, %v3682_v37  ;;  %v8786_v58 = vsub.f32 %v188_v16, %v3730_v18  ;;  %v8788_v5 = vpack.c.bf16 %v3739_v39, %v3736_v33  ;;  %v8806_v16 = vld [vmem:[%s9389_s1 + $0x5f8] sm:$0xff] }
 0x199   :  { %5537 = vmatpush1.bf16.msra.mxu0 %v10706_v19  ;;  %v3742_v19 = vand.u32 4294901760, %v8753_v27  ;;  %v8792_v10 = vsub.f32 %v191_v46, %v3733_v17  ;;  %v8794_v55 = vsub.f32 %v140_v29, %v3682_v37  ;;  %v8808_v18 = vsub.f32 %v143_v63, %v3685_v57  ;;  %v8815_v37 = vld [vmem:[%s9389_s1 + $0x460] sm:$0xff]  ;;  %v8820_v17 = vld [vmem:[%s9389_s1 + $0x478] sm:$0xff] }
 0x19a   :  { %5921 = vmatpush3.bf16.msra.mxu1 %v8720_v49  ;;  %10707 = vst [vmem:[#allocation40_spill] sm:$0xff] %v8780_v20  ;;  %5539 = vmatprep.subr.bf16.mxu0 %v10708_v28  ;;  %10709 = vst [vmem:[#allocation84_spill] sm:$0xff] %v8788_v5  ;;  %v8801_v28 = vld [vmem:[%s9389_s1 + $0x5e0] sm:$0xff]  ;;  %v8810_v46 = vpack.c.bf16 %v3691_v7, %v3688_v32  ;;  %v10712_v63 = vand.u32 4294901760, %v8685_v0  ;;  %v10713_v49 = vand.u32 4294901760, %v8690_v25  ;;  %v10715_v29 = vand.u32 4294901760, %v8758_v47 }
 0x19b   :  { %5923 = vmatprep.subr.bf16.mxu1 %v8737_v42  ;;  %v8837_v3 = vsub.f32 %v8698_v21, %v3736_v33  ;;  %v8848_v4 = vsub.f32 %v8703_v41, %v3739_v39  ;;  %v10718_v34 = vand.u32 4294901760, %v8769_v2  ;;  %v10725_v21 = vand.u32 4294901760, %v8709_v45  ;;  %v10727_v39 = vld [vmem:[#allocation57_spill] sm:$0xff] }
 0x19c   :  { %10710 = vst [vmem:[#allocation96_spill] sm:$0xff] %v8810_v46  ;;  %v3885_v57 = vsub.f32 %v8685_v0, %v10712_v63  ;;  %v3892_v42 = vsub.f32 %v8690_v25, %v10713_v49  ;;  %v10722_v63 = vand.u32 4294901760, %v8693_v54  ;;  %v10728_v53 = vand.u32 4294901760, %v8801_v28 }
 0x19d   :  { %5541 = vmatpush1.bf16.msra.mxu0 %v10711_v24  ;;  %v8841_v24 = vpack.c.bf16 %v10715_v29, %v3742_v19  ;;  %v10731_v1 = vand.u32 4294901760, %v8714_v38  ;;  %v10758_v60 = vand.u32 4294901760, %v8808_v18 }
 0x19e   :  { %5925 = vmatpush3.bf16.msra.mxu1 %v8780_v20  ;;  %5543 = vmatprep.subr.bf16.mxu0 %v10714_v61  ;;  %v10719_v61 = vand.u32 4294901760, %v8774_v22  ;;  %v3773_v20 = vsub.f32 %v8693_v54, %v10722_v63  ;;  %v3893_v33 = vand.u32 4294901760, %v3892_v42  ;;  %v10726_v63 = vand.u32 4294901760, %v8712_v15 }
 0x19f   :  { %5927 = vmatprep.subr.bf16.mxu1 %v8788_v5  ;;  %10716 = vst [vmem:[#allocation70_spill] sm:$0xff] %v8841_v24  ;;  %v8845_v49 = vpop.f32.mrb[0].mxu1 }
 0x1a0   :  { %10717 = vst [vmem:[#allocation4_spill] sm:$0xff] %v8845_v49  ;;  %v8854_v5 = vpack.c.bf16 %v10719_v61, %v10718_v34  ;;  %v8858_v29 = vpop.f32.mrb[1].mxu1  ;;  %v10723_v49 = vand.u32 4294901760, %v8706_v51  ;;  %v10724_v61 = vld [vmem:[#allocation52_spill] sm:$0xff]  ;;  %v3886_v34 = vand.u32 4294901760, %v3885_v57  ;;  %v3906_v62 = vsub.f32 %v8712_v15, %v10726_v63  ;;  %v10737_v63 = vld [vmem:[#allocation81_spill] sm:$0xff] }
 0x1a1   :  { %10721 = vst [vmem:[#allocation28_spill] sm:$0xff] %v8858_v29  ;;  %5545 = vmatpush1.bf16.msra.mxu0 %v10724_v61  ;;  %v3899_v29 = vsub.f32 %v8709_v45, %v10725_v21  ;;  %v10729_v57 = vand.u32 4294901760, %v8806_v16  ;;  %v10733_v61 = vld [vmem:[#allocation62_spill] sm:$0xff] }
 0x1a2   :  { %10720 = vst [vmem:[#allocation22_spill] sm:$0xff] %v8854_v5  ;;  %v3780_v41 = vsub.f32 %v8706_v51, %v10723_v49  ;;  %5929 = vmatpush3.bf16.msra.mxu1 %v8810_v46  ;;  %v8877_v49 = vsub.f32 %v8725_v44, %v3688_v32  ;;  %5547 = vmatprep.subr.bf16.mxu0 %v10727_v39  ;;  %v3774_v39 = vand.u32 4294901760, %v3773_v20  ;;  %v10739_v32 = vand.u32 4294901760, %v8742_v43 }
 0x1a3   :  { %5931 = vmatprep.subr.bf16.mxu1 %v8841_v24  ;;  %v8885_v42 = vpack.c.bf16 %v10729_v57, %v10728_v53  ;;  %v8890_v46 = vsub.f32 %v8730_v12, %v3691_v7  ;;  %v8893_v44 = vsub.f32 %v8753_v27, %v3742_v19  ;;  %v3787_v53 = vsub.f32 %v8714_v38, %v10731_v1 }
 0x1a4   :  { %v3781_v24 = vand.u32 4294901760, %v3780_v41  ;;  %v10732_v57 = vand.u32 4294901760, %v8716_v52  ;;  %v10734_v12 = vand.u32 4294901760, %v8815_v37  ;;  %v10735_v27 = vand.u32 4294901760, %v8820_v17 }
 0x1a5   :  { %10730 = vst [vmem:[#allocation33_spill] sm:$0xff] %v8885_v42  ;;  %5549 = vmatpush1.bf16.msra.mxu0 %v10733_v61  ;;  %v5938_v19 = vpack.c.bf16 %v3893_v33, %v3886_v34  ;;  %v3900_v20 = vand.u32 4294901760, %v3899_v29  ;;  %v3907_v41 = vand.u32 4294901760, %v3906_v62  ;;  %v10738_v1 = vand.u32 4294901760, %v8733_v31 }
 0x1a6   :  { %v3794_v21 = vsub.f32 %v8716_v52, %v10732_v57  ;;  %5933 = vmatpush3.bf16.msra.mxu1 %v8854_v5  ;;  %v8909_v7 = vpack.c.bf16 %v10735_v27, %v10734_v12  ;;  %5551 = vmatprep.subr.bf16.mxu0 %v10737_v63  ;;  %v3920_v61 = vsub.f32 %v8742_v43, %v10739_v32  ;;  %v10740_v33 = vand.u32 4294901760, %v8758_v47 }
 0x1a7   :  { %5935 = vmatprep.subr.bf16.mxu1 %v8885_v42  ;;  %v3913_v57 = vsub.f32 %v8733_v31, %v10738_v1  ;;  %v10741_v29 = vand.u32 4294901760, %v8769_v2  ;;  %v10742_v27 = vand.u32 4294901760, %v8744_v23  ;;  %v10743_v32 = vand.u32 4294901760, %v8746_v40 }
 0x1a8   :  { %10736 = vst [vmem:[#allocation38_spill] sm:$0xff] %v8909_v7  ;;  %v8924_v62 = vsub.f32 %v8758_v47, %v10740_v33  ;;  %v5940_v63 = vpack.c.bf16 %v3781_v24, %v3774_v39  ;;  %v3788_v12 = vand.u32 4294901760, %v3787_v53  ;;  %v3795_v42 = vand.u32 4294901760, %v3794_v21  ;;  %v10744_v47 = vld [vmem:[#allocation102_spill] sm:$0xff] }
 0x1a9   :  { %v8929_v34 = vsub.f32 %v8769_v2, %v10741_v29  ;;  %v3801_v1 = vsub.f32 %v8744_v23, %v10742_v27  ;;  %v3808_v5 = vsub.f32 %v8746_v40, %v10743_v32  ;;  %5553 = vmatpush1.bf16.msra.mxu0 %v10744_v47  ;;  %v5942_v33 = vpack.c.bf16 %v3907_v41, %v3900_v20  ;;  %v10748_v27 = vld [vmem:[#allocation20_spill] sm:$0xff]  ;;  %v10750_v47 = vld [vmem:[#allocation94_spill] sm:$0xff] }
 0x1aa   :  { %5937 = vmatpush3.bf16.msra.mxu1 %v8909_v7  ;;  %5555 = vmatprep.subr.bf16.mxu0 %v10745_v36  ;;  %v3914_v32 = vand.u32 4294901760, %v3913_v57  ;;  %v3921_v24 = vand.u32 4294901760, %v3920_v61  ;;  %v10746_v39 = vand.u32 4294901760, %v8748_v6  ;;  %v10747_v53 = vand.u32 4294901760, %v8760_v35 }
 0x1ab   :  { %5939 = vmatprep.subr.bf16.mxu1 %v5938_v19  ;;  %v3802_v20 = vand.u32 4294901760, %v3801_v1  ;;  %v3809_v41 = vand.u32 4294901760, %v3808_v5  ;;  %v5944_v36 = vpack.c.bf16 %v3795_v42, %v3788_v12  ;;  %v10749_v19 = vand.u32 4294901760, %v8762_v30 }
 0x1ac   :  { %v3927_v21 = vsub.f32 %v8748_v6, %v10746_v39  ;;  %v3934_v13 = vsub.f32 %v8760_v35, %v10747_v53  ;;  %v10751_v5 = vand.u32 4294901760, %v8778_v11  ;;  %v10752_v53 = vand.u32 4294901760, %v8786_v58  ;;  %v10755_v39 = vld [vmem:[#allocation110_spill] sm:$0xff] }
 0x1ad   :  { %3764 = vmatmul.mubr.f32.vlgmr.msra.gmra.mrb[14].mxu1 %v10748_v27  ;;  %v3815_v61 = vsub.f32 %v8762_v30, %v10749_v19  ;;  %5557 = vmatpush1.bf16.msra.mxu0 %v10750_v47  ;;  %v10753_v42 = vand.u32 4294901760, %v8792_v10  ;;  %v10754_v19 = vand.u32 4294901760, %v8774_v22  ;;  %v10757_v7 = vand.u32 4294901760, %v8794_v55 }
 0x1ae   :  { %5941 = vmatpush3.bf16.msra.mxu1 %v5940_v63  ;;  %v3822_v1 = vsub.f32 %v8778_v11, %v10751_v5  ;;  %v3941_v27 = vsub.f32 %v8786_v58, %v10752_v53  ;;  %5559 = vmatprep.subr.bf16.mxu0 %v10755_v39  ;;  %v5946_v63 = vpack.c.bf16 %v3921_v24, %v3914_v32  ;;  %v3928_v29 = vand.u32 4294901760, %v3927_v21  ;;  %v10769_v24 = vld [vmem:[#allocation122_spill] sm:$0xff] }
 0x1af   :  { %v3948_v12 = vsub.f32 %v8792_v10, %v10753_v42  ;;  %v8971_v57 = vsub.f32 %v8774_v22, %v10754_v19  ;;  %5943 = vmatprep.subr.bf16.mxu1 %v5942_v33  ;;  %v3935_v2 = vand.u32 4294901760, %v3934_v13  ;;  %v10756_v5 = vand.u32 4294901760, %v8801_v28  ;;  %v10759_v19 = vld [vmem:[#allocation115_spill] sm:$0xff] }
 0x1b0   :  { %v5948_v53 = vpack.c.bf16 %v3809_v41, %v3802_v20  ;;  %v3829_v42 = vsub.f32 %v8794_v55, %v10757_v7  ;;  %v3836_v22 = vsub.f32 %v8808_v18, %v10758_v60  ;;  %3994 = vmatprep.mubr.f32.mxu1 %v10759_v19  ;;  %v10760_v33 = vand.u32 4294901760, %v8837_v3  ;;  %v10762_v20 = vld [vmem:[#allocation90_spill] sm:$0xff] }
 0x1b1   :  { %v8977_v47 = vsub.f32 %v8801_v28, %v10756_v5  ;;  %v10761_v32 = vand.u32 4294901760, %v8848_v4  ;;  %5561 = vmatpush1.bf16.msra.mxu0 %v10762_v20  ;;  %v3816_v7 = vand.u32 4294901760, %v3815_v61  ;;  %v3823_v41 = vand.u32 4294901760, %v3822_v1 }
 0x1b2   :  { %v3955_v13 = vsub.f32 %v8837_v3, %v10760_v33  ;;  %5945 = vmatpush3.bf16.msra.mxu1 %v5944_v36  ;;  %v3942_v60 = vand.u32 4294901760, %v3941_v27  ;;  %v3949_v5 = vand.u32 4294901760, %v3948_v12  ;;  %v10763_v39 = vand.u32 4294901760, %v8806_v16  ;;  %v10764_v33 = vld [vmem:[#allocation116_spill] sm:$0xff] }
 0x1b3   :  { %v3962_v28 = vsub.f32 %v8848_v4, %v10761_v32  ;;  %5563 = vmatprep.subr.bf16.mxu0 %v10764_v33  ;;  %5947 = vmatprep.subr.bf16.mxu1 %v5946_v63  ;;  %v5950_v32 = vpack.c.bf16 %v3935_v2, %v3928_v29  ;;  %v10765_v20 = vand.u32 4294901760, %v8815_v37  ;;  %v10766_v61 = vand.u32 4294901760, %v8820_v17  ;;  %v10784_v33 = vld [vmem:[#allocation145_spill] sm:$0xff] }
 0x1b4   :  { %v8998_v14 = vsub.f32 %v8806_v16, %v10763_v39  ;;  %v3830_v16 = vand.u32 4294901760, %v3829_v42  ;;  %v3837_v39 = vand.u32 4294901760, %v3836_v22  ;;  %v3956_v27 = vand.u32 4294901760, %v3955_v13  ;;  %v10770_v22 = vld [vmem:[#allocation126_spill] sm:$0xff]  ;;  %v10773_v42 = vld [vmem:[#allocation129_spill] sm:$0xff] }
 0x1b5   :  { %v9006_v36 = vsub.f32 %v8815_v37, %v10765_v20  ;;  %v9011_v1 = vsub.f32 %v8820_v17, %v10766_v61  ;;  %v3963_v12 = vand.u32 4294901760, %v3962_v28  ;;  %v10767_v2 = vand.u32 4294901760, %v8877_v49  ;;  %5565 = vmatpush1.bf16.msra.mxu0 %v10769_v24  ;;  %v10783_v24 = vld [vmem:[#allocation97_spill] sm:$0xff] }
 0x1b6   :  { %v10768_v63 = vand.u32 4294901760, %v8890_v46  ;;  %5949 = vmatpush3.bf16.msra.mxu1 %v5948_v53  ;;  %v5952_v37 = vpack.c.bf16 %v3823_v41, %v3816_v7  ;;  %v5954_v20 = vpack.c.bf16 %v3949_v5, %v3942_v60  ;;  %v9879_v17 = vand.u32 4294901760, %v8929_v34  ;;  %5567 = vmatprep.subr.bf16.mxu0 %v10770_v22  ;;  %v10775_v53 = vld [vmem:[#allocation49_spill] sm:$0xff] }
 0x1b7   :  { %v3843_v29 = vsub.f32 %v8877_v49, %v10767_v2  ;;  %5951 = vmatprep.subr.bf16.mxu1 %v5950_v32  ;;  %v10771_v13 = vand.u32 4294901760, %v8893_v44  ;;  %v10772_v61 = vand.u32 4294901760, %v8924_v62  ;;  %v5956_v7 = vpack.c.bf16 %v3837_v39, %v3830_v16 }
 0x1b8   :  { %v3850_v21 = vsub.f32 %v8890_v46, %v10768_v63  ;;  %v5958_v41 = vpack.c.bf16 %v3963_v12, %v3956_v27  ;;  %v3857_v32 = vsub.f32 %v8929_v34, %v9879_v17  ;;  %v10776_v39 = vand.u32 4294901760, %v8977_v47  ;;  %v10778_v17 = vld [vmem:[#allocation134_spill] sm:$0xff] }
 0x1b9   :  { %v3969_v28 = vsub.f32 %v8893_v44, %v10771_v13  ;;  %v3976_v2 = vsub.f32 %v8924_v62, %v10772_v61  ;;  %v3844_v60 = vand.u32 4294901760, %v3843_v29  ;;  %5569 = vmatpush1.bf16.msra.mxu0 %v10773_v42  ;;  %v10774_v13 = vand.u32 4294901760, %v8971_v57 }
 0x1ba   :  { %v3851_v5 = vand.u32 4294901760, %v3850_v21  ;;  %5953 = vmatpush3.bf16.msra.mxu1 %v5952_v37  ;;  %5571 = vmatprep.subr.bf16.mxu0 %v10775_v53  ;;  %v3983_v27 = vsub.f32 %v8977_v47, %v10776_v39  ;;  %v10777_v12 = vand.u32 4294901760, %v8998_v14  ;;  %v10779_v63 = vand.u32 4294901760, %v9006_v36  ;;  %v10781_v53 = vld [vmem:[#allocation137_spill] sm:$0xff] }
 0x1bb   :  { %v3864_v22 = vsub.f32 %v8971_v57, %v10774_v13  ;;  %5955 = vmatprep.subr.bf16.mxu1 %v5954_v20  ;;  %v3970_v16 = vand.u32 4294901760, %v3969_v28  ;;  %v3977_v21 = vand.u32 4294901760, %v3976_v2  ;;  %v3858_v13 = vand.u32 4294901760, %v3857_v32 }
 0x1bc   :  { %v3990_v29 = vsub.f32 %v8998_v14, %v10777_v12  ;;  %v5960_v37 = vpack.c.bf16 %v3851_v5, %v3844_v60  ;;  %v3871_v20 = vsub.f32 %v9006_v36, %v10779_v63  ;;  %v10780_v28 = vand.u32 4294901760, %v9011_v1 }
 0x1bd   :  { %5573 = vmatpush1.bf16.msra.mxu0 %v10778_v17  ;;  %v3865_v61 = vand.u32 4294901760, %v3864_v22  ;;  %v5962_v39 = vpack.c.bf16 %v3977_v21, %v3970_v16  ;;  %v3984_v42 = vand.u32 4294901760, %v3983_v27  ;;  %v10785_v16 = vld [vmem:[#allocation82_spill] sm:$0xff]  ;;  %v10786_v21 = vand.u32 4294901760, %v10359_v56 }
 0x1be   :  { %5957 = vmatpush3.bf16.msra.mxu1 %v5956_v7  ;;  %v3878_v2 = vsub.f32 %v9011_v1, %v10780_v28  ;;  %5575 = vmatprep.subr.bf16.mxu0 %v10781_v53  ;;  %v3991_v12 = vand.u32 4294901760, %v3990_v29  ;;  %v10782_v7 = vld [vmem:[#allocation140_spill] sm:$0xff]  ;;  %v3872_v32 = vand.u32 4294901760, %v3871_v20  ;;  %v10787_v27 = vand.u32 4294901760, %v10360_v48  ;;  %v10791_v20 = vld [vmem:[#allocation11_spill] sm:$0xff]  ;;  %v10793_v56 = vld [vmem:[#allocation18_spill] sm:$0xff] }
 0x1bf   :  { %5959 = vmatprep.subr.bf16.mxu1 %v5958_v41  ;;  %v4558_v60 = vpop.f32.mrb[2].mxu1  ;;  %v5964_v22 = vpack.c.bf16 %v3865_v61, %v3858_v13  ;;  %v5970_v61 = vpack.c.bf16 %v8690_v25, %v8685_v0  ;;  %v10789_v13 = vld [vmem:[#allocation10_spill] sm:$0xff]  ;;  %v10795_v48 = vld [vmem:[#allocation19_spill] sm:$0xff] }
 0x1c0   :  { %v4559_v5 = vpop.f32.mrb[3].mxu1  ;;  %v3879_v63 = vand.u32 4294901760, %v3878_v2  ;;  %v5966_v28 = vpack.c.bf16 %v3991_v12, %v3984_v42  ;;  %v5586_v29 = vpack.c.bf16 %v10787_v27, %v10786_v21  ;;  %v10790_v42 = vand.u32 4294901760, %v10789_v13  ;;  %v10801_v27 = vld [vmem:[#allocation55_spill] sm:$0xff] }
 0x1c1   :  { %v9055_v17 = vadd.f32 %v4559_v5, %v4558_v60  ;;  %5577 = vmatpush1.bf16.msra.mxu0 %v10782_v7  ;;  %v10792_v2 = vand.u32 4294901760, %v10791_v20  ;;  %v5972_v12 = vpack.c.bf16 %v8706_v51, %v8693_v54  ;;  %v10794_v60 = vand.u32 4294901760, %v10793_v56 }
 0x1c2   :  { %5961 = vmatpush3.bf16.msra.mxu1 %v5960_v37  ;;  %5579 = vmatprep.subr.bf16.mxu0 %v10783_v24  ;;  %v5968_v41 = vpack.c.bf16 %v3879_v63, %v3872_v32  ;;  %v10788_v37 = vld [vmem:[#allocation149_spill] sm:$0xff]  ;;  %v10796_v5 = vand.u32 4294901760, %v10795_v48  ;;  %v5974_v32 = vpack.c.bf16 %v8712_v15, %v8709_v45  ;;  %v10797_v63 = vld [vmem:[#allocation83_spill] sm:$0xff]  ;;  %v10802_v13 = vand.u32 4294901760, %v10801_v27 }
 0x1c3   :  { %5963 = vmatprep.subr.bf16.mxu1 %v5962_v39  ;;  %v5588_v39 = vpack.c.bf16 %v10792_v2, %v10790_v42  ;;  %v10803_v42 = vld [vmem:[#allocation67_spill] sm:$0xff]  ;;  %v10805_v2 = vld [vmem:[#allocation69_spill] sm:$0xff]  ;;  %v5978_v48 = vpack.c.bf16 %v8742_v43, %v8733_v31  ;;  %v10812_v27 = vand.u32 4294901760, %v10600_v9  ;;  %v10818_v9 = vand.u32 4294901760, %v10614_v50 }
 0x1c4   :  { %v10804_v20 = vand.u32 4294901760, %v10803_v42  ;;  %v10806_v56 = vand.u32 4294901760, %v10805_v2  ;;  %v5982_v2 = vpack.c.bf16 %v8760_v35, %v8748_v6  ;;  %v5988_v50 = vpack.c.bf16 %v8808_v18, %v8794_v55 }
 0x1c5   :  { %5581 = vmatpush1.bf16.msra.mxu0 %v10784_v33 }
 0x1c6   :  { %5965 = vmatpush3.bf16.msra.mxu1 %v5964_v22  ;;  %5583 = vmatprep.subr.bf16.mxu0 %v10785_v16  ;;  %v5590_v22 = vpack.c.bf16 %v10796_v5, %v10794_v60  ;;  %v5594_v60 = vpack.c.bf16 %v10806_v56, %v10804_v20  ;;  %v10816_v56 = vld [vmem:[#allocation21_spill] sm:$0xff] }
 0x1c7   :  { %5967 = vmatprep.subr.bf16.mxu1 %v5966_v28  ;;  %v10798_v28 = vld [vmem:[#allocation153_spill] sm:$0xff] }
 0x1c9   :  { %5585 = vmatpush1.bf16.msra.mxu0 %v10788_v37 }
 0x1ca   :  { %5969 = vmatpush3.bf16.msra.mxu1 %v5968_v41  ;;  %5587 = vmatprep.subr.bf16.mxu0 %v5586_v29  ;;  %v10799_v41 = vld [vmem:[#allocation54_spill] sm:$0xff] }
 0x1cb   :  { %5971 = vmatprep.subr.bf16.mxu1 %v5970_v61  ;;  %v10800_v21 = vand.u32 4294901760, %v10799_v41  ;;  %v5976_v61 = vpack.c.bf16 %v8716_v52, %v8714_v38  ;;  %v10810_v41 = vld [vmem:[#allocation3_spill] sm:$0xff] }
 0x1cc   :  { %2387 = vmatmul.mubr.f32.vlgmr.msra.gmra.mrb[0].mxu0 %v10798_v28 }
 0x1cd   :  { %3996 = vmatmul.mubr.f32.vlgmr.msra.gmra.mrb[16].mxu1 %v10797_v63  ;;  %5589 = vmatpush1.bf16.msra.mxu0 %v5588_v39  ;;  %v5592_v29 = vpack.c.bf16 %v10802_v13, %v10800_v21  ;;  %v10807_v39 = vld [vmem:[#allocation118_spill] sm:$0xff]  ;;  %v10811_v21 = vand.u32 4294901760, %v10810_v41  ;;  %v10813_v13 = vld [vmem:[#allocation15_spill] sm:$0xff]  ;;  %v5986_v41 = vpack.c.bf16 %v8792_v10, %v8786_v58 }
 0x1ce   :  { %5973 = vmatpush3.bf16.msra.mxu1 %v5972_v12  ;;  %5591 = vmatprep.subr.bf16.mxu0 %v5590_v22  ;;  %v10808_v12 = vld [vmem:[#allocation2_spill] sm:$0xff]  ;;  %v10814_v42 = vand.u32 4294901760, %v10813_v13 }
 0x1cf   :  { %5975 = vmatprep.subr.bf16.mxu1 %v5974_v32  ;;  %4131 = vmatprep.mubr.f32.mxu1 %v10807_v39  ;;  %v10809_v5 = vand.u32 4294901760, %v10808_v12  ;;  %v5980_v32 = vpack.c.bf16 %v8746_v40, %v8744_v23  ;;  %v10817_v39 = vand.u32 4294901760, %v10816_v56  ;;  %v9138_v56 = vld [vmem:[%s9391_s2] sm:$0x7] }
 0x1d0   :  { %2650 = vmatprep.mubr.f32.mxu0 %v10759_v19  ;;  %v5598_v20 = vpack.c.bf16 %v10814_v42, %v10812_v27  ;;  %v10823_v27 = vld [vmem:[#allocation35_spill] sm:$0xff]  ;;  %10828 = vst [vmem:[#allocation53_spill] sm:$0xff] %v9138_v56 }
 0x1d1   :  { %5593 = vmatpush1.bf16.msra.mxu0 %v5592_v29  ;;  %v5596_v22 = vpack.c.bf16 %v10811_v21, %v10809_v5  ;;  %v212_v29 = vlaneseq  ;;  %v10824_v13 = vand.u32 4294901760, %v10823_v27 }
 0x1d2   :  { %5977 = vmatpush3.bf16.msra.mxu1 %v5976_v61  ;;  %5595 = vmatprep.subr.bf16.mxu0 %v5594_v60  ;;  %v10815_v61 = vand.u32 4294901760, %v10607_v26  ;;  %v5984_v60 = vpack.c.bf16 %v8778_v11, %v8762_v30 }
 0x1d3   :  { %5979 = vmatprep.subr.bf16.mxu1 %v5978_v48  ;;  %v10819_v48 = vand.u32 4294901760, %v10613_v59  ;;  %v9120_v21 = vshrl.u32 %v212_v29, 7  ;;  %v10825_v59 = vand.u32 4294901760, %v10625_v8 }
 0x1d4   :  { %v5600_v12 = vpack.c.bf16 %v10817_v39, %v10815_v61  ;;  %v5990_v61 = vpack.c.bf16 %v8848_v4, %v8837_v3 }
 0x1d5   :  { %5597 = vmatpush1.bf16.msra.mxu0 %v5596_v22  ;;  %v5602_v5 = vpack.c.bf16 %v10819_v48, %v10818_v9  ;;  %10820 = vst [vmem:[#allocation48_spill] sm:$0xff] %v9120_v21  ;;  %v222_v26 = vsub.s32 2, %v9120_v21  ;;  %v10821_v22 = vld [vmem:[#allocation36_spill] sm:$0xff]  ;;  %v10831_v9 = vld [vmem:[#allocation50_spill] sm:$0xff] }
 0x1d6   :  { %5981 = vmatpush3.bf16.msra.mxu1 %v5980_v32  ;;  %5599 = vmatprep.subr.bf16.mxu0 %v5598_v20  ;;  %v10822_v32 = vand.u32 4294901760, %v10821_v22  ;;  %v10826_v20 = vld [vmem:[#allocation44_spill] sm:$0xff]  ;;  %v10832_v48 = vand.u32 4294901760, %v10831_v9 }
 0x1d7   :  { %5983 = vmatprep.subr.bf16.mxu1 %v5982_v2  ;;  %v10827_v2 = vand.u32 4294901760, %v10826_v20  ;;  %v223_v39 = vrot.slane %v9138_v56, %v222_v26  ;;  %v5994_v26 = vpack.c.bf16 %v8924_v62, %v8893_v44 }
 0x1d8   :  { %v5604_v42 = vpack.c.bf16 %v10824_v13, %v10822_v32  ;;  %v10835_v32 = vld [vmem:[#allocation61_spill] sm:$0xff] }
 0x1d9   :  { %5601 = vmatpush1.bf16.msra.mxu0 %v5600_v12  ;;  %v5606_v29 = vpack.c.bf16 %v10827_v2, %v10825_v59  ;;  %v10829_v12 = vld [vmem:[#allocation51_spill] sm:$0xff]  ;;  %v10836_v27 = vand.u32 4294901760, %v10835_v32  ;;  %v10837_v59 = vld [vmem:[#allocation65_spill] sm:$0xff]  ;;  %v10839_v2 = vld [vmem:[#allocation68_spill] sm:$0xff]  ;;  %v2904_v9 = vadd.f32 %v9055_v17, %v223_v39 }
 0x1da   :  { %5985 = vmatpush3.bf16.msra.mxu1 %v5984_v60  ;;  %5603 = vmatprep.subr.bf16.mxu0 %v5602_v5  ;;  %v10830_v60 = vand.u32 4294901760, %v10829_v12  ;;  %v5992_v5 = vpack.c.bf16 %v8890_v46, %v8877_v49  ;;  %v10838_v20 = vand.u32 4294901760, %v10837_v59  ;;  %v10840_v12 = vand.u32 4294901760, %v10839_v2  ;;  %v10845_v17 = vld [vmem:[#allocation103_spill] sm:$0xff] }
 0x1db   :  { %5987 = vmatprep.subr.bf16.mxu1 %v5986_v41  ;;  %v10833_v41 = vld [vmem:[#allocation56_spill] sm:$0xff]  ;;  %v5998_v59 = vpack.c.bf16 %v8998_v14, %v8977_v47  ;;  %v10846_v39 = vand.u32 4294901760, %v10845_v17 }
 0x1dc   :  { %v5608_v8 = vpack.c.bf16 %v10832_v48, %v10830_v60  ;;  %v10834_v22 = vand.u32 4294901760, %v10833_v41  ;;  %v5612_v60 = vpack.c.bf16 %v10840_v12, %v10838_v20  ;;  %v10851_v20 = vld [vmem:[#allocation108_spill] sm:$0xff] }
 0x1dd   :  { %5605 = vmatpush1.bf16.msra.mxu0 %v5604_v42  ;;  %v10852_v12 = vand.u32 4294901760, %v10851_v20 }
 0x1de   :  { %5989 = vmatpush3.bf16.msra.mxu1 %v5988_v50  ;;  %5607 = vmatprep.subr.bf16.mxu0 %v5606_v29  ;;  %v5610_v13 = vpack.c.bf16 %v10836_v27, %v10834_v22  ;;  %v5996_v29 = vpack.c.bf16 %v8971_v57, %v8929_v34  ;;  %v10843_v22 = vld [vmem:[#allocation99_spill] sm:$0xff] }
 0x1df   :  { %5991 = vmatprep.subr.bf16.mxu1 %v5990_v61  ;;  %v10841_v61 = vld [vmem:[#allocation98_spill] sm:$0xff]  ;;  %v10844_v32 = vand.u32 4294901760, %v10843_v22 }
 0x1e0   :  { %v4593_v42 = vpop.f32.mrb[4].mxu1  ;;  %v10842_v41 = vand.u32 4294901760, %v10841_v61  ;;  %v10857_v22 = vld [vmem:[#allocation42_spill] sm:$0xff] }
 0x1e1   :  { %v4594_v50 = vpop.f32.mrb[5].mxu1  ;;  %5609 = vmatpush1.bf16.msra.mxu0 %v5608_v8  ;;  %v10847_v8 = vld [vmem:[#allocation104_spill] sm:$0xff] }
 0x1e2   :  { %v4595_v48 = vadd.f32 %v4594_v50, %v4593_v42  ;;  %5993 = vmatpush3.bf16.msra.mxu1 %v5992_v5  ;;  %5611 = vmatprep.subr.bf16.mxu0 %v5610_v13  ;;  %v5614_v27 = vpack.c.bf16 %v10844_v32, %v10842_v41  ;;  %v10848_v5 = vand.u32 4294901760, %v10847_v8  ;;  %v6000_v13 = vpack.c.bf16 %v9011_v1, %v9006_v36  ;;  %v10858_v32 = vld [vmem:[#allocation111_spill] sm:$0xff]  ;;  %v10862_v8 = vld [vmem:[#allocation152_spill] sm:$0xff] }
 0x1e3   :  { %5995 = vmatprep.subr.bf16.mxu1 %v5994_v26  ;;  %v10849_v26 = vld [vmem:[#allocation107_spill] sm:$0xff]  ;;  %v10859_v17 = vand.u32 4294901760, %v10858_v32  ;;  %v10873_v32 = vld [vmem:[#allocation120_spill] sm:$0xff] }
 0x1e4   :  { %v3136_v2 = vadd.f32 %v4595_v48, %v2904_v9  ;;  %v5616_v42 = vpack.c.bf16 %v10848_v5, %v10846_v39  ;;  %v10850_v50 = vand.u32 4294901760, %v10849_v26  ;;  %v10853_v9 = vld [vmem:[#allocation95_spill] sm:$0xff]  ;;  %v10855_v48 = vld [vmem:[#allocation109_spill] sm:$0xff]  ;;  %v10860_v39 = vld [vmem:[#allocation112_spill] sm:$0xff] }
 0x1e5   :  { %5613 = vmatpush1.bf16.msra.mxu0 %v5612_v60  ;;  %v10854_v60 = vand.u32 4294901760, %v10853_v9  ;;  %v10863_v5 = vld [vmem:[#allocation63_spill] sm:$0xff]  ;;  %v10866_v26 = vld [vmem:[#allocation114_spill] sm:$0xff] }
 0x1e6   :  { %5997 = vmatpush3.bf16.msra.mxu1 %v5996_v29  ;;  %5615 = vmatprep.subr.bf16.mxu0 %v5614_v27  ;;  %v5618_v61 = vpack.c.bf16 %v10852_v12, %v10850_v50  ;;  %v10856_v29 = vand.u32 4294901760, %v10855_v48  ;;  %v10861_v27 = vand.u32 4294901760, %v10860_v39  ;;  %v10867_v50 = vand.u32 4294901760, %v10866_v26  ;;  %v10868_v12 = vld [vmem:[#allocation58_spill] sm:$0xff] }
 0x1e7   :  { %5999 = vmatprep.subr.bf16.mxu1 %v5998_v59 }
 0x1e8   :  { %v5620_v41 = vpack.c.bf16 %v10856_v29, %v10854_v60  ;;  %v5622_v59 = vpack.c.bf16 %v10861_v27, %v10859_v17  ;;  %v10871_v60 = vld [vmem:[#allocation119_spill] sm:$0xff]  ;;  %v10874_v17 = vld [vmem:[#allocation80_spill] sm:$0xff] }
 0x1e9   :  { %5617 = vmatpush1.bf16.msra.mxu0 %v5616_v42  ;;  %v10864_v42 = vld [vmem:[#allocation113_spill] sm:$0xff]  ;;  %v10872_v48 = vand.u32 4294901760, %v10871_v60  ;;  %v10877_v27 = vld [vmem:[#allocation123_spill] sm:$0xff]  ;;  %v10885_v60 = vld [vmem:[#allocation128_spill] sm:$0xff] }
 0x1ea   :  { %6001 = vmatpush3.bf16.msra.mxu1 %v6000_v13  ;;  %5619 = vmatprep.subr.bf16.mxu0 %v5618_v61  ;;  %v10865_v13 = vand.u32 4294901760, %v10864_v42  ;;  %v10869_v61 = vld [vmem:[#allocation117_spill] sm:$0xff] }
 0x1eb   :  { %6003 = vmatprep.subr.bf16.mxu1 %v10857_v22  ;;  %v10870_v9 = vand.u32 4294901760, %v10869_v61 }
 0x1ec   :  { %v5624_v20 = vpack.c.bf16 %v10867_v50, %v10865_v13  ;;  %v10879_v13 = vld [vmem:[#allocation100_spill] sm:$0xff]  ;;  %v10882_v50 = vld [vmem:[#allocation127_spill] sm:$0xff] }
 0x1ed   :  { %4134 = vmatmul.mubr.f32.vlgmr.msra.gmra.mrb[18].mxu1 %v10862_v8  ;;  %5621 = vmatpush1.bf16.msra.mxu0 %v5620_v41  ;;  %v5626_v29 = vpack.c.bf16 %v10872_v48, %v10870_v9  ;;  %v10875_v41 = vld [vmem:[#allocation121_spill] sm:$0xff]  ;;  %v10878_v8 = vand.u32 4294901760, %v10877_v27  ;;  %v10883_v61 = vand.u32 4294901760, %v10882_v50  ;;  %v10887_v48 = vld [vmem:[#allocation130_spill] sm:$0xff]  ;;  %v10892_v27 = vld [vmem:[#allocation132_spill] sm:$0xff] }
 0x1ee   :  { %6005 = vmatpush3.bf16.msra.mxu1 %v10863_v5  ;;  %5623 = vmatprep.subr.bf16.mxu0 %v5622_v59  ;;  %v10876_v39 = vand.u32 4294901760, %v10875_v41  ;;  %v10880_v59 = vld [vmem:[#allocation124_spill] sm:$0xff]  ;;  %v10884_v9 = vld [vmem:[#allocation105_spill] sm:$0xff]  ;;  %v10889_v41 = vld [vmem:[#allocation86_spill] sm:$0xff] }
 0x1ef   :  { %6007 = vmatprep.subr.bf16.mxu1 %v10868_v12  ;;  %4238 = vmatprep.mubr.f32.mxu1 %v10873_v32  ;;  %v10881_v26 = vand.u32 4294901760, %v10880_v59  ;;  %v10888_v32 = vand.u32 4294901760, %v10887_v48  ;;  %v10894_v59 = vld [vmem:[#allocation87_spill] sm:$0xff]  ;;  %v10902_v48 = vld [vmem:[#allocation138_spill] sm:$0xff] }
 0x1f0   :  { %v5628_v42 = vpack.c.bf16 %v10878_v8, %v10876_v39  ;;  %v10890_v39 = vld [vmem:[#allocation131_spill] sm:$0xff]  ;;  %v10893_v8 = vand.u32 4294901760, %v10892_v27  ;;  %v10907_v27 = vld [vmem:[#allocation141_spill] sm:$0xff] }
 0x1f1   :  { %5625 = vmatpush1.bf16.msra.mxu0 %v5624_v20  ;;  %v5630_v56 = vpack.c.bf16 %v10883_v61, %v10881_v26  ;;  %v10886_v20 = vand.u32 4294901760, %v10885_v60  ;;  %v10895_v26 = vld [vmem:[#allocation133_spill] sm:$0xff]  ;;  %v10897_v50 = vld [vmem:[#allocation135_spill] sm:$0xff]  ;;  %v10899_v60 = vld [vmem:[#allocation12_spill] sm:$0xff] }
 0x1f2   :  { %6009 = vmatpush3.bf16.msra.mxu1 %v10874_v17  ;;  %5627 = vmatprep.subr.bf16.mxu0 %v5626_v29  ;;  %v10891_v29 = vand.u32 4294901760, %v10890_v39  ;;  %v10898_v61 = vand.u32 4294901760, %v10897_v50  ;;  %v10904_v39 = vld [vmem:[#allocation40_spill] sm:$0xff]  ;;  %v10912_v50 = vld [vmem:[#allocation143_spill] sm:$0xff] }
 0x1f3   :  { %6011 = vmatprep.subr.bf16.mxu1 %v10879_v13  ;;  %v5632_v21 = vpack.c.bf16 %v10888_v32, %v10886_v20  ;;  %v10900_v20 = vld [vmem:[#allocation136_spill] sm:$0xff]  ;;  %v10903_v32 = vand.u32 4294901760, %v10902_v48 }
 0x1f4   :  { %v5634_v37 = vpack.c.bf16 %v10893_v8, %v10891_v29  ;;  %v10905_v29 = vld [vmem:[#allocation139_spill] sm:$0xff]  ;;  %v10908_v8 = vand.u32 4294901760, %v10907_v27 }
 0x1f5   :  { %5629 = vmatpush1.bf16.msra.mxu0 %v5628_v42  ;;  %v10896_v42 = vand.u32 4294901760, %v10895_v26  ;;  %v10909_v26 = vld [vmem:[#allocation84_spill] sm:$0xff] }
 0x1f6   :  { %6013 = vmatpush3.bf16.msra.mxu1 %v10884_v9  ;;  %5631 = vmatprep.subr.bf16.mxu0 %v5630_v56  ;;  %v10901_v56 = vand.u32 4294901760, %v10900_v20 }
 0x1f7   :  { %6015 = vmatprep.subr.bf16.mxu1 %v10889_v41  ;;  %v5636_v16 = vpack.c.bf16 %v10898_v61, %v10896_v42  ;;  %v10910_v42 = vld [vmem:[#allocation142_spill] sm:$0xff]  ;;  %v10913_v61 = vand.u32 4294901760, %v10912_v50 }
 0x1f8   :  { %v5638_v33 = vpack.c.bf16 %v10903_v32, %v10901_v56  ;;  %v10915_v56 = vld [vmem:[#allocation144_spill] sm:$0xff] }
 0x1f9   :  { %5633 = vmatpush1.bf16.msra.mxu0 %v5632_v21  ;;  %v10906_v21 = vand.u32 4294901760, %v10905_v29  ;;  %v10916_v32 = vand.u32 4294901760, %v10915_v56  ;;  %v10917_v29 = vld [vmem:[#allocation146_spill] sm:$0xff] }
 0x1fa   :  { %6017 = vmatpush3.bf16.msra.mxu1 %v10894_v59  ;;  %5635 = vmatprep.subr.bf16.mxu0 %v5634_v37  ;;  %v10911_v37 = vand.u32 4294901760, %v10910_v42  ;;  %v10922_v42 = vld [vmem:[#allocation148_spill] sm:$0xff] }
 0x1fb   :  { %6019 = vmatprep.subr.bf16.mxu1 %v10899_v60  ;;  %v5640_v24 = vpack.c.bf16 %v10908_v8, %v10906_v21  ;;  %v10920_v21 = vld [vmem:[#allocation147_spill] sm:$0xff] }
 0x1fc   :  { %v5642_v7 = vpack.c.bf16 %v10913_v61, %v10911_v37  ;;  %v10921_v8 = vand.u32 4294901760, %v10920_v21  ;;  %v10924_v61 = vld [vmem:[#allocation22_spill] sm:$0xff] }
 0x1fd   :  { %5637 = vmatpush1.bf16.msra.mxu0 %v5636_v16  ;;  %v10914_v16 = vld [vmem:[#allocation96_spill] sm:$0xff]  ;;  %v10932_v21 = vld [vmem:[#allocation38_spill] sm:$0xff] }
 0x1fe   :  { %6021 = vmatpush3.bf16.msra.mxu1 %v10904_v39  ;;  %5639 = vmatprep.subr.bf16.mxu0 %v5638_v33  ;;  %v10918_v39 = vand.u32 4294901760, %v10917_v29  ;;  %v10919_v33 = vld [vmem:[#allocation70_spill] sm:$0xff]  ;;  %v10929_v29 = vld [vmem:[#allocation33_spill] sm:$0xff] }
 0x1ff   :  { %6023 = vmatprep.subr.bf16.mxu1 %v10909_v26  ;;  %v10923_v26 = vand.u32 4294901760, %v10922_v42 }
 0x200   :  { %v4628_v20 = vpop.f32.mrb[6].mxu1  ;;  %v5644_v27 = vpack.c.bf16 %v10918_v39, %v10916_v32  ;;  %v10931_v39 = vand.u32 4294901760, %v8690_v25  ;;  %v10940_v25 = vand.u32 4294901760, %v8716_v52  ;;  %v10946_v52 = vand.u32 4294901760, %v8746_v40 }
 0x201   :  { %v4629_v53 = vpop.f32.mrb[7].mxu1  ;;  %5641 = vmatpush1.bf16.msra.mxu0 %v5640_v24  ;;  %v5646_v50 = vpack.c.bf16 %v10923_v26, %v10921_v8  ;;  %v10925_v24 = vld [vmem:[#allocation150_spill] sm:$0xff]  ;;  %v10934_v26 = vand.u32 4294901760, %v8706_v51  ;;  %v10937_v8 = vand.u32 4294901760, %v8712_v15  ;;  %v10943_v15 = vand.u32 4294901760, %v8742_v43 }
 0x202   :  { %v4630_v48 = vadd.f32 %v4629_v53, %v4628_v20  ;;  %6025 = vmatpush3.bf16.msra.mxu1 %v10914_v16  ;;  %5643 = vmatprep.subr.bf16.mxu0 %v5642_v7  ;;  %v10926_v53 = vand.u32 4294901760, %v10925_v24  ;;  %v10927_v20 = vld [vmem:[#allocation151_spill] sm:$0xff]  ;;  %v10930_v7 = vand.u32 4294901760, %v8685_v0  ;;  %v10938_v0 = vld [vmem:[#allocation9_spill] sm:$0xff]  ;;  %v10949_v43 = vand.u32 4294901760, %v8760_v35 }
 0x203   :  { %6027 = vmatprep.subr.bf16.mxu1 %v10919_v33  ;;  %v10928_v16 = vand.u32 4294901760, %v10927_v20  ;;  %v10947_v20 = vld [vmem:[#allocation66_spill] sm:$0xff]  ;;  %v10954_v40 = vand.u32 4294901760, %v8786_v58  ;;  %v10957_v35 = vand.u32 4294901760, %v8794_v55  ;;  %v10962_v58 = vld [vmem:[#allocation37_spill] sm:$0xff] }
 0x204   :  { %v3274_v37 = vadd.f32 %v4630_v48, %v3136_v2  ;;  %v6034_v32 = vpack.c.bf16 %v10931_v39, %v10930_v7  ;;  %v10933_v2 = vand.u32 4294901760, %v8693_v54  ;;  %v10939_v54 = vand.u32 4294901760, %v8714_v38  ;;  %v10950_v7 = vld [vmem:[#allocation77_spill] sm:$0xff]  ;;  %v10965_v55 = vld [vmem:[#allocation46_spill] sm:$0xff] }
 0x205   :  { %5645 = vmatpush1.bf16.msra.mxu0 %v5644_v27  ;;  %v5648_v56 = vpack.c.bf16 %v10928_v16, %v10926_v53  ;;  %v10935_v27 = vld [vmem:[#allocation79_spill] sm:$0xff]  ;;  %v10936_v16 = vand.u32 4294901760, %v8709_v45  ;;  %v10942_v45 = vand.u32 4294901760, %v8733_v31  ;;  %v10945_v38 = vand.u32 4294901760, %v8744_v23 }
 0x206   :  { %6029 = vmatpush3.bf16.msra.mxu1 %v10924_v61  ;;  %5647 = vmatprep.subr.bf16.mxu0 %v5646_v50  ;;  %v6036_v48 = vpack.c.bf16 %v10934_v26, %v10933_v2  ;;  %v6040_v51 = vpack.c.bf16 %v10940_v25, %v10939_v54  ;;  %v10941_v50 = vld [vmem:[#allocation17_spill] sm:$0xff]  ;;  %v10948_v31 = vand.u32 4294901760, %v8748_v6  ;;  %v10951_v39 = vand.u32 4294901760, %v8762_v30  ;;  %v10953_v23 = vld [vmem:[#allocation7_spill] sm:$0xff]  ;;  %v10956_v6 = vld [vmem:[#allocation26_spill] sm:$0xff] }
 0x207   :  { %6031 = vmatprep.subr.bf16.mxu1 %v10929_v29  ;;  %v6038_v42 = vpack.c.bf16 %v10937_v8, %v10936_v16  ;;  %v6042_v24 = vpack.c.bf16 %v10943_v15, %v10942_v45  ;;  %v6044_v53 = vpack.c.bf16 %v10946_v52, %v10945_v38  ;;  %v10955_v26 = vand.u32 4294901760, %v8792_v10  ;;  %v10959_v30 = vld [vmem:[#allocation31_spill] sm:$0xff]  ;;  %v10968_v45 = vld [vmem:[#allocation52_spill] sm:$0xff]  ;;  %v10974_v52 = vld [vmem:[#allocation62_spill] sm:$0xff] }
 0x208   :  { %v10961_v8 = vand.u32 4294901760, %v8848_v4  ;;  %v10963_v10 = vand.u32 4294901760, %v8877_v49  ;;  %v10967_v25 = vand.u32 4294901760, %v8924_v62  ;;  %v10969_v15 = vand.u32 4294901760, %v8929_v34 }
 0x209   :  { %5649 = vmatpush1.bf16.msra.mxu0 %v5648_v56  ;;  %v6046_v56 = vpack.c.bf16 %v10949_v43, %v10948_v31  ;;  %v10970_v49 = vand.u32 4294901760, %v8971_v57  ;;  %v10977_v31 = vld [vmem:[#allocation81_spill] sm:$0xff]  ;;  %v10978_v57 = vld [vmem:[#allocation102_spill] sm:$0xff] }
 0x20a   :  { %6033 = vmatpush3.bf16.msra.mxu1 %v10932_v21  ;;  %5651 = vmatprep.subr.bf16.mxu0 %v10935_v27  ;;  %v10958_v27 = vand.u32 4294901760, %v8808_v18  ;;  %v10966_v18 = vand.u32 4294901760, %v8893_v44  ;;  %v10973_v44 = vand.u32 4294901760, %v8998_v14  ;;  %v10979_v43 = vld [vmem:[#allocation106_spill] sm:$0xff] }
 0x20b   :  { %6035 = vmatprep.subr.bf16.mxu1 %v6034_v32  ;;  %v10952_v32 = vand.u32 4294901760, %v8778_v11  ;;  %v10960_v11 = vand.u32 4294901760, %v8837_v3  ;;  %v10980_v14 = vld [vmem:[#allocation94_spill] sm:$0xff] }
 0x20c   :  { %2652 = vmatmul.mubr.f32.vlgmr.msra.gmra.mrb[0].mxu0 %v10797_v63  ;;  %v6052_v16 = vpack.c.bf16 %v10958_v27, %v10957_v35 }
 0x20d   :  { %4242 = vmatmul.mubr.f32.vlgmr.msra.gmra.mrb[20].mxu1 %v10798_v28  ;;  %5653 = vmatpush1.bf16.msra.mxu0 %v10938_v0  ;;  %v10944_v28 = vld [vmem:[#allocation43_spill] sm:$0xff]  ;;  %v6048_v2 = vpack.c.bf16 %v10952_v32, %v10951_v39  ;;  %v10964_v0 = vand.u32 4294901760, %v8890_v46  ;;  %v6060_v46 = vpack.c.bf16 %v10970_v49, %v10969_v15  ;;  %v10993_v32 = vld [vmem:[#allocation96_spill] sm:$0xff]  ;;  %v10999_v15 = vld [vmem:[#allocation53_spill] sm:$0xff] }
 0x20e   :  { %6037 = vmatpush3.bf16.msra.mxu1 %v6036_v48  ;;  %5655 = vmatprep.subr.bf16.mxu0 %v10941_v50  ;;  %v6050_v48 = vpack.c.bf16 %v10955_v26, %v10954_v40  ;;  %v10997_v40 = vld [vmem:[#allocation149_spill] sm:$0xff] }
 0x20f   :  { %6039 = vmatprep.subr.bf16.mxu1 %v6038_v42  ;;  %4408 = vmatprep.mubr.f32.mxu1 %v10759_v19  ;;  %v6054_v42 = vpack.c.bf16 %v10961_v8, %v10960_v11  ;;  %v6056_v54 = vpack.c.bf16 %v10964_v0, %v10963_v10 }
 0x210   :  { %2787 = vmatprep.mubr.f32.mxu0 %v10759_v19 }
 0x211   :  { %5657 = vmatpush1.bf16.msra.mxu0 %v10944_v28  ;;  %v10972_v28 = vand.u32 4294901760, %v8977_v47  ;;  %v10981_v47 = vld [vmem:[#allocation110_spill] sm:$0xff] }
 0x212   :  { %6041 = vmatpush3.bf16.msra.mxu1 %v6040_v51  ;;  %5659 = vmatprep.subr.bf16.mxu0 %v10947_v20  ;;  %v6058_v51 = vpack.c.bf16 %v10967_v25, %v10966_v18  ;;  %v10976_v20 = vand.u32 4294901760, %v9011_v1  ;;  %v10983_v1 = vld [vmem:[#allocation116_spill] sm:$0xff] }
 0x213   :  { %6043 = vmatprep.subr.bf16.mxu1 %v6042_v24  ;;  %v10971_v24 = vld [vmem:[#allocation57_spill] sm:$0xff]  ;;  %v6062_v62 = vpack.c.bf16 %v10973_v44, %v10972_v28  ;;  %v11001_v44 = vld [vmem:[#allocation28_spill] sm:$0xff] }
 0x215   :  { %5661 = vmatpush1.bf16.msra.mxu0 %v10950_v7 }
 0x216   :  { %6045 = vmatpush3.bf16.msra.mxu1 %v6044_v53  ;;  %5663 = vmatprep.subr.bf16.mxu0 %v10953_v23  ;;  %v10975_v53 = vand.u32 4294901760, %v9006_v36  ;;  %v10982_v36 = vld [vmem:[#allocation90_spill] sm:$0xff] }
 0x217   :  { %6047 = vmatprep.subr.bf16.mxu1 %v6046_v56  ;;  %v10991_v56 = vld [vmem:[#allocation84_spill] sm:$0xff]  ;;  %v10996_v23 = vld [vmem:[#allocation82_spill] sm:$0xff] }
 0x218   :  { %v6064_v34 = vpack.c.bf16 %v10976_v20, %v10975_v53 }
 0x219   :  { %5665 = vmatpush1.bf16.msra.mxu0 %v10956_v6 }
 0x21a   :  { %6049 = vmatpush3.bf16.msra.mxu1 %v6048_v2  ;;  %5667 = vmatprep.subr.bf16.mxu0 %v10959_v30  ;;  %v10995_v2 = vld [vmem:[#allocation145_spill] sm:$0xff] }
 0x21b   :  { %6051 = vmatprep.subr.bf16.mxu1 %v6050_v48 }
 0x21d   :  { %5669 = vmatpush1.bf16.msra.mxu0 %v10962_v58 }
 0x21e   :  { %6053 = vmatpush3.bf16.msra.mxu1 %v6052_v16  ;;  %5671 = vmatprep.subr.bf16.mxu0 %v10965_v55 }
 0x21f   :  { %6055 = vmatprep.subr.bf16.mxu1 %v6054_v42 }
 0x220   :  { %v4663_v3 = vpop.f32.mrb[8].mxu1 }
 0x221   :  { %v4664_v50 = vpop.f32.mrb[9].mxu1  ;;  %5673 = vmatpush1.bf16.msra.mxu0 %v10968_v45 }
 0x222   :  { %v4665_v4 = vadd.f32 %v4664_v50, %v4663_v3  ;;  %6057 = vmatpush3.bf16.msra.mxu1 %v6056_v54  ;;  %5675 = vmatprep.subr.bf16.mxu0 %v10971_v24  ;;  %v10998_v50 = vld [vmem:[#allocation48_spill] sm:$0xff] }
 0x223   :  { %6059 = vmatprep.subr.bf16.mxu1 %v6058_v51  ;;  %v218_v45 = vsub.s32 1, %v10998_v50  ;;  %v11000_v24 = vld [vmem:[#allocation4_spill] sm:$0xff] }
 0x224   :  { %v3382_v38 = vadd.f32 %v4665_v4, %v3274_v37  ;;  %v10985_v37 = vld [vmem:[#allocation126_spill] sm:$0xff]  ;;  %v214_v4 = vsub.s32 0, %v10998_v50 }
 0x225   :  { %5677 = vmatpush1.bf16.msra.mxu0 %v10974_v52 }
 0x226   :  { %6061 = vmatpush3.bf16.msra.mxu1 %v6060_v46  ;;  %5679 = vmatprep.subr.bf16.mxu0 %v10977_v31  ;;  %v215_v49 = vrot.slane %v10999_v15, %v214_v4  ;;  %v219_v46 = vrot.slane %v10999_v15, %v218_v45 }
 0x227   :  { %6063 = vmatprep.subr.bf16.mxu1 %v6062_v62 }
 0x228   :  { %v6098_v28 = vadd.f32 %v11000_v24, %v215_v49  ;;  %v6100_v62 = vadd.f32 %v11001_v44, %v219_v46 }
 0x229   :  { %5681 = vmatpush1.bf16.msra.mxu0 %v10978_v57 }
 0x22a   :  { %6065 = vmatpush3.bf16.msra.mxu1 %v6064_v34  ;;  %5683 = vmatprep.subr.bf16.mxu0 %v10979_v43 }
 0x22b   :  { %6067 = vmatprep.subr.bf16.mxu1 %v10857_v22  ;;  %v10984_v22 = vld [vmem:[#allocation122_spill] sm:$0xff] }
 0x22d   :  { %4410 = vmatmul.mubr.f32.vlgmr.msra.gmra.mrb[22].mxu1 %v10797_v63  ;;  %5685 = vmatpush1.bf16.msra.mxu0 %v10980_v14 }
 0x22e   :  { %6069 = vmatpush3.bf16.msra.mxu1 %v10863_v5  ;;  %5687 = vmatprep.subr.bf16.mxu0 %v10981_v47  ;;  %v10986_v5 = vld [vmem:[#allocation129_spill] sm:$0xff] }
 0x22f   :  { %6071 = vmatprep.subr.bf16.mxu1 %v10868_v12  ;;  %4512 = vmatprep.mubr.f32.mxu1 %v10759_v19  ;;  %v10987_v19 = vld [vmem:[#allocation49_spill] sm:$0xff]  ;;  %v10988_v12 = vld [vmem:[#allocation134_spill] sm:$0xff] }
 0x231   :  { %5689 = vmatpush1.bf16.msra.mxu0 %v10982_v36 }
 0x232   :  { %6073 = vmatpush3.bf16.msra.mxu1 %v10874_v17  ;;  %5691 = vmatprep.subr.bf16.mxu0 %v10983_v1  ;;  %v10989_v17 = vld [vmem:[#allocation40_spill] sm:$0xff] }
 0x233   :  { %6075 = vmatprep.subr.bf16.mxu1 %v10879_v13  ;;  %v10990_v13 = vld [vmem:[#allocation137_spill] sm:$0xff] }
 0x235   :  { %5693 = vmatpush1.bf16.msra.mxu0 %v10984_v22 }
 0x236   :  { %6077 = vmatpush3.bf16.msra.mxu1 %v10884_v9  ;;  %5695 = vmatprep.subr.bf16.mxu0 %v10985_v37 }
 0x237   :  { %6079 = vmatprep.subr.bf16.mxu1 %v10889_v41  ;;  %v10992_v41 = vld [vmem:[#allocation140_spill] sm:$0xff] }
 0x239   :  { %5697 = vmatpush1.bf16.msra.mxu0 %v10986_v5 }
 0x23a   :  { %6081 = vmatpush3.bf16.msra.mxu1 %v10894_v59  ;;  %5699 = vmatprep.subr.bf16.mxu0 %v10987_v19  ;;  %v10994_v59 = vld [vmem:[#allocation97_spill] sm:$0xff] }
 0x23b   :  { %6083 = vmatprep.subr.bf16.mxu1 %v10899_v60 }
 0x23d   :  { %5701 = vmatpush1.bf16.msra.mxu0 %v10988_v12 }
 0x23e   :  { %6085 = vmatpush3.bf16.msra.mxu1 %v10989_v17  ;;  %5703 = vmatprep.subr.bf16.mxu0 %v10990_v13 }
 0x23f   :  { %6087 = vmatprep.subr.bf16.mxu1 %v10991_v56 }
 0x240   :  { %v4698_v9 = vpop.f32.mrb[10].mxu1 }
 0x241   :  { %v4699_v7 = vpop.f32.mrb[11].mxu1  ;;  %5705 = vmatpush1.bf16.msra.mxu0 %v10992_v41 }
 0x242   :  { %v4700_v39 = vadd.f32 %v4699_v7, %v4698_v9  ;;  %6089 = vmatpush3.bf16.msra.mxu1 %v10993_v32  ;;  %5707 = vmatprep.subr.bf16.mxu0 %v10994_v59 }
 0x243   :  { %6091 = vmatprep.subr.bf16.mxu1 %v10919_v33 }
 0x244   :  { %v3550_v60 = vadd.f32 %v4700_v39, %v3382_v38 }
 0x245   :  { %5709 = vmatpush1.bf16.msra.mxu0 %v10995_v2 }
 0x246   :  { %6093 = vmatpush3.bf16.msra.mxu1 %v10924_v61  ;;  %5711 = vmatprep.subr.bf16.mxu0 %v10996_v23 }
 0x247   :  { %6095 = vmatprep.subr.bf16.mxu1 %v10929_v29 }
 0x249   :  { %5713 = vmatpush1.bf16.msra.mxu0 %v10997_v40 }
 0x24a   :  { %6097 = vmatpush3.bf16.msra.mxu1 %v10932_v21 }
 0x24c   :  { %2789 = vmatmul.mubr.f32.vlgmr.msra.gmra.mrb[0].mxu0 %v10797_v63 }
 0x24d   :  { %4514 = vmatmul.mubr.f32.vlgmr.msra.gmra.mrb[24].mxu1 %v10797_v63 }
 0x260   :  { %v4733_v26 = vpop.f32.mrb[12].mxu1 }
 0x261   :  { %v4734_v48 = vpop.f32.mrb[13].mxu1 }
 0x262   :  { %v4735_v33 = vadd.f32 %v4734_v48, %v4733_v26 }
 0x264   :  { %v3654_v6 = vadd.f32 %v4735_v33, %v3550_v60 }
 0x280   :  { %v4768_v35 = vpop.f32.mrb[14].mxu1 }
 0x281   :  { %v4769_v27 = vpop.f32.mrb[15].mxu1 }
 0x282   :  { %v4770_v16 = vadd.f32 %v4769_v27, %v4768_v35 }
 0x284   :  { %v3766_v61 = vadd.f32 %v4770_v16, %v3654_v6 }
 0x2a0   :  { %v4803_v30 = vpop.f32.mrb[16].mxu1 }
 0x2a1   :  { %v4804_v11 = vpop.f32.mrb[17].mxu1 }
 0x2a2   :  { %v4805_v8 = vadd.f32 %v4804_v11, %v4803_v30 }
 0x2a4   :  { %v3998_v29 = vadd.f32 %v4805_v8, %v3766_v61 }
 0x2c0   :  { %v4838_v42 = vpop.f32.mrb[18].mxu1 }
 0x2c1   :  { %v4839_v58 = vpop.f32.mrb[19].mxu1 }
 0x2c2   :  { %v4840_v10 = vadd.f32 %v4839_v58, %v4838_v42 }
 0x2c4   :  { %v4136_v21 = vadd.f32 %v4840_v10, %v3998_v29 }
 0x2e0   :  { %v4873_v0 = vpop.f32.mrb[20].mxu1 }
 0x2e1   :  { %v4874_v54 = vpop.f32.mrb[21].mxu1 }
 0x2e2   :  { %v4875_v55 = vadd.f32 %v4874_v54, %v4873_v0 }
 0x2e4   :  { %v4244_v63 = vadd.f32 %v4875_v55, %v4136_v21 }
 0x300   :  { %v4908_v18 = vpop.f32.mrb[22].mxu1 }
 0x301   :  { %v4909_v25 = vpop.f32.mrb[23].mxu1 }
 0x302   :  { %v4910_v51 = vadd.f32 %v4909_v25, %v4908_v18 }
 0x304   :  { %v4412_v3 = vadd.f32 %v4910_v51, %v4244_v63 }
 0x31f   :  { %v2790_v38 = vpop.f32.mrb[0].mxu0 }
 0x320   :  { %v4943_v52 = vpop.f32.mrb[24].mxu1  ;;  %v6099_v53 = vadd.f32 %v6098_v28, %v2790_v38  ;;  %v2792_v20 = vpop.f32.mrb[1].mxu0 }
 0x321   :  { %v4944_v34 = vpop.f32.mrb[25].mxu1  ;;  %v6101_v31 = vadd.f32 %v6100_v62, %v2792_v20 }
 0x322   :  { %v4945_v57 = vadd.f32 %v4944_v34, %v4943_v52  ;;  %4519 = vst [vmem:[%s9392_s3] sm:$0xff] %v6099_v53 }
 0x323   :  { %4520 = vst [vmem:[%s9392_s3 + $0x8] sm:$0xff] %v6101_v31 }
 0x324   :  { %v4516_v43 = vadd.f32 %v4945_v57, %v4412_v3 }
 0x326   :  { %4521 = vst [vmem:[%s9392_s3 + $0x10] sm:$0xff] %v4516_v43 }

</bundles_post_ra>
